<compile_context>
chip_gen: v6e
topology: v6e:2x2x1
jax: 0.10.0
libtpu: 0.0.40
codegen_flags: <defaults>
</compile_context>

<pallas_src>
import math

import jax
import jax.numpy as jnp
from jax.experimental import pallas as pl
from jax.experimental.pallas import tpu as pltpu

E = 512          # CONFORMER_FEATURE_LEN
H = 8            # HEAD_NUM
DH = E // H      # head dim = 64
LN_EPS = 1e-5


def _attention_block_kernel(x_ref, gamma_ref, beta_ref,
                            wqkv_ref, bqkv_ref, wo_ref, bo_ref,
                            o_ref):
    """Processes one (L, bb, E) slab of the seq-first (L, N, E) input.

    x_ref     : (L, bb, E)  f32   input block (native seq-first layout)
    gamma/beta: (1, E)      f32   LayerNorm affine
    wqkv_ref  : (E, 3E)     bf16  in_proj weight^T, 1/sqrt(DH) folded into Q cols
    bqkv_ref  : (1, 3E)     f32   in_proj bias (Q part pre-scaled)
    wo_ref    : (E, E)      bf16  out_proj weight^T
    bo_ref    : (1, E)      f32   out_proj bias
    o_ref     : (L, bb, E)        output block
    """
    L, bb, _ = x_ref.shape
    x = x_ref[...].astype(jnp.float32)

    # ---- LayerNorm over the feature dim (f32 math; v5e has no bf16 VPU/EUP) ----
    mean = jnp.mean(x, axis=-1, keepdims=True)
    cent = x - mean
    var = jnp.mean(cent * cent, axis=-1, keepdims=True)
    xn = cent * jax.lax.rsqrt(var + LN_EPS)
    xn = (xn * gamma_ref[0] + beta_ref[0]).astype(jnp.bfloat16)       # (L, bb, E)

    # ---- VMEM-local (L, bb, E) -> (bb*L, E) batch-major rows.  This replaces the
    #      two wrapper HBM transposes of the previous version with one cheap
    #      in-VMEM rearrangement of bf16 data. ----
    if bb == 1:
        rows = xn.reshape(L, E)
    else:
        rows = jnp.concatenate([xn[:, b, :] for b in range(bb)], axis=0)  # (bb*L, E)

    # ---- QKV projection: one MXU matmul over bb*L rows, bf16 in / f32 acc.
    #      Softmax scale is already folded into the Q weight/bias. ----
    qkv = jnp.dot(rows, wqkv_ref[...], preferred_element_type=jnp.float32)
    qkv = (qkv + bqkv_ref[0]).astype(jnp.bfloat16)                    # single bulk cast
    q_all = qkv[:, :E].reshape(bb, L, E)        # lane-aligned 512-wide slices
    k_all = qkv[:, E:2 * E].reshape(bb, L, E)
    v_all = qkv[:, 2 * E:].reshape(bb, L, E)

    # ---- Per-head attention, batched over bb via dot_general batch dims. ----
    # TODO(synk): for long sequences, KV-block this with an online (flash-style)
    # softmax instead of materializing the (bb, L, L) score tile per head.
    ctx_heads = []
    for h in range(H):
        sl = slice(h * DH, (h + 1) * DH)
        q = q_all[:, :, sl]
        k = k_all[:, :, sl]
        v = v_all[:, :, sl]
        # s[b, l, m] = q[b, l, :] . k[b, m, :]  — contract last dims, batch over bb.
        s = jax.lax.dot_general(q, k, (((2,), (2,)), ((0,), (0,))),
                                preferred_element_type=jnp.float32)    # (bb, L, L)
        s = s - jnp.max(s, axis=-1, keepdims=True)
        p = jnp.exp(s)
        p = p * pl.reciprocal(jnp.sum(p, axis=-1, keepdims=True), approx=True)
        ctx = jax.lax.dot_general(p.astype(jnp.bfloat16), v,
                                  (((2,), (1,)), ((0,), (0,))),
                                  preferred_element_type=jnp.float32)  # (bb, L, DH)
        ctx_heads.append(ctx.astype(jnp.bfloat16))

    # ---- Head concat + single K=512 output projection (full MXU contraction
    #      depth; replaces the 8 serial K=64 projections of the old version). ----
    ctx_all = jnp.concatenate(ctx_heads, axis=-1).reshape(bb * L, E)   # bf16
    out = jnp.dot(ctx_all, wo_ref[...], preferred_element_type=jnp.float32) + bo_ref[0]
    out = out.reshape(bb, L, E).astype(o_ref.dtype)

    # Dropout (eval mode) = identity.
    if bb == 1:
        o_ref[...] = out.reshape(L, 1, E)
    else:
        for b in range(bb):
            o_ref[:, b, :] = out[b]


def attention_block(x, gamma, beta, w_in, b_in, w_out, b_out, *, target_rows=512):
    """x: (L, N, E) seq-first, like PyTorch nn.MultiheadAttention's default."""
    L, N, _ = x.shape

    # Batch-block size.  The trailing (N, E) dims of the block must either equal
    # the array dims or be (8, 128)-aligned, so bb is the whole batch (preferred)
    # or a multiple of 8.
    bb = min(N, max(1, target_rows // max(L, 1)))
    if bb >= N or N <= 8:
        bb = N
    else:
        bb = max(8, min(32, (bb // 8) * 8))
    n_pad = (-N) % bb
    x_p = jnp.pad(x, ((0, 0), (0, n_pad), (0, 0))) if n_pad else x
    n_blocks = x_p.shape[1] // bb

    # Fold the 1/sqrt(DH) softmax scale into the Q projection (exact: power of
    # two), pre-transpose weights and cast to bf16 (f32 accumulation happens in
    # the kernel via preferred_element_type).
    scale = 1.0 / math.sqrt(DH)
    w_in_f = w_in.astype(jnp.float32).at[:E, :].multiply(scale)
    b_in_f = b_in.astype(jnp.float32).at[:E].multiply(scale)
    wqkv_t = w_in_f.T.astype(jnp.bfloat16)                        # (E, 3E)
    bqkv = b_in_f.reshape(1, 3 * E)
    wo_t = w_out.astype(jnp.float32).T.astype(jnp.bfloat16)       # (E, E)
    bo = b_out.reshape(1, E).astype(jnp.float32)
    gamma2 = gamma.reshape(1, E).astype(jnp.float32)
    beta2 = beta.reshape(1, E).astype(jnp.float32)

    # VMEM budget proportional to the chip's physical VMEM (v5e/v6e: 128 MiB,
    # v7x: 64 MiB); never below the 32 MiB scoped default.
    try:
        vmem_cap = int(pltpu.get_tpu_info().vmem_capacity_bytes)
    except Exception:
        vmem_cap = 64 << 20
    vmem_limit = max(32 << 20, min(100 << 20, (vmem_cap * 3) // 4))

    out = pl.pallas_call(
        _attention_block_kernel,
        out_shape=jax.ShapeDtypeStruct(x_p.shape, x.dtype),
        grid_spec=pltpu.PrefetchScalarGridSpec(
            num_scalar_prefetch=0,
            grid=(n_blocks,),
            in_specs=[
                pl.BlockSpec((L, bb, E), lambda nb: (0, nb, 0)),       # x
                pl.BlockSpec((1, E), lambda nb: (0, 0)),               # gamma
                pl.BlockSpec((1, E), lambda nb: (0, 0)),               # beta
                pl.BlockSpec((E, 3 * E), lambda nb: (0, 0)),           # Wqkv^T (bf16)
                pl.BlockSpec((1, 3 * E), lambda nb: (0, 0)),           # bqkv
                pl.BlockSpec((E, E), lambda nb: (0, 0)),               # Wo^T (bf16)
                pl.BlockSpec((1, E), lambda nb: (0, 0)),               # bo
            ],
            out_specs=pl.BlockSpec((L, bb, E), lambda nb: (0, nb, 0)),
        ),
        compiler_params=pltpu.CompilerParams(
            dimension_semantics=("parallel",),
            vmem_limit_bytes=vmem_limit,
        ),
    )(x_p, gamma2, beta2, wqkv_t, bqkv, wo_t, bo)

    return out[:, :N, :] if n_pad else out


def _reference(x, gamma, beta, w_in, b_in, w_out, b_out):
    """Pure-JAX f32 reference mirroring PyTorch semantics (eval mode)."""
    mean = jnp.mean(x, axis=-1, keepdims=True)
    var = jnp.mean((x - mean) ** 2, axis=-1, keepdims=True)
    xn = (x - mean) / jnp.sqrt(var + LN_EPS) * gamma + beta            # (L, N, E)

    L, N, _ = x.shape
    qkv = jnp.einsum('lne,fe->lnf', xn, w_in) + b_in                   # (L, N, 3E)
    q, k, v = jnp.split(qkv, 3, axis=-1)

    def split_heads(t):  # (L, N, E) -> (N, H, L, DH)
        return jnp.transpose(t.reshape(L, N, H, DH), (1, 2, 0, 3))

    qh, kh, vh = split_heads(q), split_heads(k), split_heads(v)
    s = jnp.einsum('nhld,nhmd->nhlm', qh, kh) / math.sqrt(DH)
    p = jax.nn.softmax(s, axis=-1)
    ctx = jnp.einsum('nhlm,nhmd->nhld', p, vh)                         # (N, H, L, DH)
    ctx = jnp.transpose(ctx, (2, 0, 1, 3)).reshape(L, N, E)
    return jnp.einsum('lne,fe->lnf', ctx, w_out) + b_out


if __name__ == "__main__":
    key = jax.random.PRNGKey(0)
    k_x, k_g, k_b, k_wi, k_bi, k_wo, k_bo = jax.random.split(key, 7)

    L, N = 8, 2                                    # small seq / batch
    x = jax.random.normal(k_x, (L, N, E), dtype=jnp.float32)

    # Deterministic synthetic parameters (shapes match nn.LayerNorm / nn.MultiheadAttention)
    gamma = 1.0 + 0.02 * jax.random.normal(k_g, (E,), dtype=jnp.float32)
    beta = 0.02 * jax.random.normal(k_b, (E,), dtype=jnp.float32)
    w_in = 0.02 * jax.random.normal(k_wi, (3 * E, E), dtype=jnp.float32)   # in_proj_weight
    b_in = 0.02 * jax.random.normal(k_bi, (3 * E,), dtype=jnp.float32)     # in_proj_bias
    w_out = 0.02 * jax.random.normal(k_wo, (E, E), dtype=jnp.float32)      # out_proj.weight
    b_out = 0.02 * jax.random.normal(k_bo, (E,), dtype=jnp.float32)        # out_proj.bias

    out = attention_block(x, gamma, beta, w_in, b_in, w_out, b_out)
    out = jax.block_until_ready(out)

    ref = _reference(x, gamma, beta, w_in, b_in, w_out, b_out)
    assert out.shape == (L, N, E), out.shape
    err = float(jnp.max(jnp.abs(out - ref)))
    # Tolerance accounts for bf16 matmul operands + approx reciprocal vs f32 reference.
    assert err < 3e-2, f"max abs err {err}"

    print("KERNEL_OK")
</pallas_src>

<mosaic_0001>
module attributes {stable_mosaic.version = 11 : i64} {
  func.func @_attention_block_kernel(%arg0: i32, %arg1: memref<8x2x512xf32, #tpu.memory_space<vmem>>, %arg2: memref<1x512xf32, #tpu.memory_space<vmem>>, %arg3: memref<1x512xf32, #tpu.memory_space<vmem>>, %arg4: memref<512x1536xbf16, #tpu.memory_space<vmem>>, %arg5: memref<1x1536xf32, #tpu.memory_space<vmem>>, %arg6: memref<512x512xbf16, #tpu.memory_space<vmem>>, %arg7: memref<1x512xf32, #tpu.memory_space<vmem>>, %arg8: memref<8x2x512xf32, #tpu.memory_space<vmem>>) attributes {dimension_semantics = [#tpu.dimension_semantics<parallel>], iteration_bounds = array<i64: 1>, scalar_prefetch = 0 : i64, scratch_operands = 0 : i64, tpu.core_type = #tpu.core_type<tc>, window_params = [{transform_indices = @transform_0, window_bounds = array<i64: 8, 2, 512>}, {pipeline_mode = #tpu.pipeline_mode<synchronous>, transform_indices = @transform_1, window_bounds = array<i64: 1, 512>}, {pipeline_mode = #tpu.pipeline_mode<synchronous>, transform_indices = @transform_2, window_bounds = array<i64: 1, 512>}, {pipeline_mode = #tpu.pipeline_mode<synchronous>, transform_indices = @transform_3, window_bounds = array<i64: 512, 1536>}, {pipeline_mode = #tpu.pipeline_mode<synchronous>, transform_indices = @transform_4, window_bounds = array<i64: 1, 1536>}, {pipeline_mode = #tpu.pipeline_mode<synchronous>, transform_indices = @transform_5, window_bounds = array<i64: 512, 512>}, {pipeline_mode = #tpu.pipeline_mode<synchronous>, transform_indices = @transform_6, window_bounds = array<i64: 1, 512>}, {transform_indices = @transform_7, window_bounds = array<i64: 8, 2, 512>}]} {
    %c0 = arith.constant 0 : index
    %c0_0 = arith.constant 0 : index
    %c0_1 = arith.constant 0 : index
    %0 = vector.load %arg1[%c0, %c0_0, %c0_1] : memref<8x2x512xf32, #tpu.memory_space<vmem>>, vector<8x2x512xf32>
    %cst = arith.constant dense<0.000000e+00> : vector<8x2xf32>
    %1 = vector.multi_reduction <add>, %0, %cst [2] : vector<8x2x512xf32> to vector<8x2xf32>
    %2 = vector.shape_cast %1 : vector<8x2xf32> to vector<8x2x1xf32>
    %cst_2 = arith.constant 5.120000e+02 : f32
    %3 = vector.broadcast %cst_2 : f32 to vector<8x2x1xf32>
    %4 = arith.divf %2, %3 : vector<8x2x1xf32>
    %5 = vector.broadcast %4 : vector<8x2x1xf32> to vector<8x2x512xf32>
    %6 = arith.subf %0, %5 : vector<8x2x512xf32>
    %7 = arith.mulf %6, %6 : vector<8x2x512xf32>
    %cst_3 = arith.constant dense<0.000000e+00> : vector<8x2xf32>
    %8 = vector.multi_reduction <add>, %7, %cst_3 [2] : vector<8x2x512xf32> to vector<8x2xf32>
    %9 = vector.shape_cast %8 : vector<8x2xf32> to vector<8x2x1xf32>
    %cst_4 = arith.constant 5.120000e+02 : f32
    %10 = vector.broadcast %cst_4 : f32 to vector<8x2x1xf32>
    %11 = arith.divf %9, %10 : vector<8x2x1xf32>
    %cst_5 = arith.constant 9.99999974E-6 : f32
    %12 = vector.broadcast %cst_5 : f32 to vector<8x2x1xf32>
    %13 = arith.addf %11, %12 : vector<8x2x1xf32>
    %14 = math.rsqrt %13 : vector<8x2x1xf32>
    %15 = vector.broadcast %14 : vector<8x2x1xf32> to vector<8x2x512xf32>
    %16 = arith.mulf %6, %15 : vector<8x2x512xf32>
    %c0_6 = arith.constant 0 : index
    %c0_7 = arith.constant 0 : index
    %17 = vector.load %arg2[%c0_6, %c0_7] : memref<1x512xf32, #tpu.memory_space<vmem>>, vector<1x512xf32>
    %18 = vector.shape_cast %17 : vector<1x512xf32> to vector<512xf32>
    %19 = vector.shape_cast %18 : vector<512xf32> to vector<1x1x512xf32>
    %20 = vector.broadcast %19 : vector<1x1x512xf32> to vector<8x2x512xf32>
    %21 = arith.mulf %16, %20 : vector<8x2x512xf32>
    %c0_8 = arith.constant 0 : index
    %c0_9 = arith.constant 0 : index
    %22 = vector.load %arg3[%c0_8, %c0_9] : memref<1x512xf32, #tpu.memory_space<vmem>>, vector<1x512xf32>
    %23 = vector.shape_cast %22 : vector<1x512xf32> to vector<512xf32>
    %24 = vector.shape_cast %23 : vector<512xf32> to vector<1x1x512xf32>
    %25 = vector.broadcast %24 : vector<1x1x512xf32> to vector<8x2x512xf32>
    %26 = arith.addf %21, %25 : vector<8x2x512xf32>
    %27 = arith.truncf %26 : vector<8x2x512xf32> to vector<8x2x512xbf16>
    %28 = vector.extract_strided_slice %27 {offsets = [0, 0, 0], sizes = [8, 1, 512], strides = [1, 1, 1]} : vector<8x2x512xbf16> to vector<8x1x512xbf16>
    %29 = vector.shape_cast %28 : vector<8x1x512xbf16> to vector<8x512xbf16>
    %30 = vector.extract_strided_slice %27 {offsets = [0, 1, 0], sizes = [8, 1, 512], strides = [1, 1, 1]} : vector<8x2x512xbf16> to vector<8x1x512xbf16>
    %31 = vector.shape_cast %30 : vector<8x1x512xbf16> to vector<8x512xbf16>
    %32 = tpu.concatenate %29, %31 in 0 : vector<8x512xbf16>, vector<8x512xbf16> -> vector<16x512xbf16>
    %c0_10 = arith.constant 0 : index
    %c0_11 = arith.constant 0 : index
    %33 = vector.load %arg4[%c0_10, %c0_11] : memref<512x1536xbf16, #tpu.memory_space<vmem>>, vector<512x1536xbf16>
    %cst_12 = arith.constant dense<0.000000e+00> : vector<16x1536xf32>
    %34 = tpu.matmul %32, %33, %cst_12 {dimension_numbers = #tpu.dot_dimension_numbers<[1], [0], [0], [1], [0, 0, 1, 1], [], []>} : vector<16x512xbf16>, vector<512x1536xbf16>, vector<16x1536xf32> -> vector<16x1536xf32>
    %c0_13 = arith.constant 0 : index
    %c0_14 = arith.constant 0 : index
    %35 = vector.load %arg5[%c0_13, %c0_14] : memref<1x1536xf32, #tpu.memory_space<vmem>>, vector<1x1536xf32>
    %36 = vector.shape_cast %35 : vector<1x1536xf32> to vector<1536xf32>
    %37 = vector.shape_cast %36 : vector<1536xf32> to vector<1x1536xf32>
    %38 = vector.broadcast %37 : vector<1x1536xf32> to vector<16x1536xf32>
    %39 = arith.addf %34, %38 : vector<16x1536xf32>
    %40 = arith.truncf %39 : vector<16x1536xf32> to vector<16x1536xbf16>
    %41 = vector.extract_strided_slice %40 {offsets = [0, 0], sizes = [16, 512], strides = [1, 1]} : vector<16x1536xbf16> to vector<16x512xbf16>
    %42 = vector.shape_cast %41 : vector<16x512xbf16> to vector<2x8x512xbf16>
    %43 = vector.extract_strided_slice %40 {offsets = [0, 512], sizes = [16, 512], strides = [1, 1]} : vector<16x1536xbf16> to vector<16x512xbf16>
    %44 = vector.shape_cast %43 : vector<16x512xbf16> to vector<2x8x512xbf16>
    %45 = vector.extract_strided_slice %40 {offsets = [0, 1024], sizes = [16, 512], strides = [1, 1]} : vector<16x1536xbf16> to vector<16x512xbf16>
    %46 = vector.shape_cast %45 : vector<16x512xbf16> to vector<2x8x512xbf16>
    %47 = vector.extract_strided_slice %42 {offsets = [0, 0, 0], sizes = [2, 8, 64], strides = [1, 1, 1]} : vector<2x8x512xbf16> to vector<2x8x64xbf16>
    %48 = vector.extract_strided_slice %44 {offsets = [0, 0, 0], sizes = [2, 8, 64], strides = [1, 1, 1]} : vector<2x8x512xbf16> to vector<2x8x64xbf16>
    %49 = vector.extract_strided_slice %46 {offsets = [0, 0, 0], sizes = [2, 8, 64], strides = [1, 1, 1]} : vector<2x8x512xbf16> to vector<2x8x64xbf16>
    %cst_15 = arith.constant dense<0.000000e+00> : vector<2x8x8xf32>
    %50 = tpu.matmul %47, %48, %cst_15 {dimension_numbers = #tpu.dot_dimension_numbers<[2], [2], [1], [1], [0, 0, 0, 1, 1, 1], [0], [0]>} : vector<2x8x64xbf16>, vector<2x8x64xbf16>, vector<2x8x8xf32> -> vector<2x8x8xf32>
    %cst_16 = arith.constant dense<0xFF800000> : vector<2x8xf32>
    %51 = vector.multi_reduction <maximumf>, %50, %cst_16 [2] : vector<2x8x8xf32> to vector<2x8xf32>
    %52 = vector.shape_cast %51 : vector<2x8xf32> to vector<2x8x1xf32>
    %53 = vector.broadcast %52 : vector<2x8x1xf32> to vector<2x8x8xf32>
    %54 = arith.subf %50, %53 : vector<2x8x8xf32>
    %55 = math.exp %54 : vector<2x8x8xf32>
    %cst_17 = arith.constant dense<0.000000e+00> : vector<2x8xf32>
    %56 = vector.multi_reduction <add>, %55, %cst_17 [2] : vector<2x8x8xf32> to vector<2x8xf32>
    %57 = vector.shape_cast %56 : vector<2x8xf32> to vector<2x8x1xf32>
    %58 = tpu.reciprocal %57 {approx = true} : vector<2x8x1xf32> -> vector<2x8x1xf32>
    %59 = vector.broadcast %58 : vector<2x8x1xf32> to vector<2x8x8xf32>
    %60 = arith.mulf %55, %59 : vector<2x8x8xf32>
    %61 = arith.truncf %60 : vector<2x8x8xf32> to vector<2x8x8xbf16>
    %cst_18 = arith.constant dense<0.000000e+00> : vector<2x8x64xf32>
    %62 = tpu.matmul %61, %49, %cst_18 {dimension_numbers = #tpu.dot_dimension_numbers<[2], [1], [1], [2], [0, 0, 0, 1, 1, 2], [0], [0]>} : vector<2x8x8xbf16>, vector<2x8x64xbf16>, vector<2x8x64xf32> -> vector<2x8x64xf32>
    %63 = arith.truncf %62 : vector<2x8x64xf32> to vector<2x8x64xbf16>
    %64 = vector.extract_strided_slice %42 {offsets = [0, 0, 64], sizes = [2, 8, 64], strides = [1, 1, 1]} : vector<2x8x512xbf16> to vector<2x8x64xbf16>
    %65 = vector.extract_strided_slice %44 {offsets = [0, 0, 64], sizes = [2, 8, 64], strides = [1, 1, 1]} : vector<2x8x512xbf16> to vector<2x8x64xbf16>
    %66 = vector.extract_strided_slice %46 {offsets = [0, 0, 64], sizes = [2, 8, 64], strides = [1, 1, 1]} : vector<2x8x512xbf16> to vector<2x8x64xbf16>
    %cst_19 = arith.constant dense<0.000000e+00> : vector<2x8x8xf32>
    %67 = tpu.matmul %64, %65, %cst_19 {dimension_numbers = #tpu.dot_dimension_numbers<[2], [2], [1], [1], [0, 0, 0, 1, 1, 1], [0], [0]>} : vector<2x8x64xbf16>, vector<2x8x64xbf16>, vector<2x8x8xf32> -> vector<2x8x8xf32>
    %cst_20 = arith.constant dense<0xFF800000> : vector<2x8xf32>
    %68 = vector.multi_reduction <maximumf>, %67, %cst_20 [2] : vector<2x8x8xf32> to vector<2x8xf32>
    %69 = vector.shape_cast %68 : vector<2x8xf32> to vector<2x8x1xf32>
    %70 = vector.broadcast %69 : vector<2x8x1xf32> to vector<2x8x8xf32>
    %71 = arith.subf %67, %70 : vector<2x8x8xf32>
    %72 = math.exp %71 : vector<2x8x8xf32>
    %cst_21 = arith.constant dense<0.000000e+00> : vector<2x8xf32>
    %73 = vector.multi_reduction <add>, %72, %cst_21 [2] : vector<2x8x8xf32> to vector<2x8xf32>
    %74 = vector.shape_cast %73 : vector<2x8xf32> to vector<2x8x1xf32>
    %75 = tpu.reciprocal %74 {approx = true} : vector<2x8x1xf32> -> vector<2x8x1xf32>
    %76 = vector.broadcast %75 : vector<2x8x1xf32> to vector<2x8x8xf32>
    %77 = arith.mulf %72, %76 : vector<2x8x8xf32>
    %78 = arith.truncf %77 : vector<2x8x8xf32> to vector<2x8x8xbf16>
    %cst_22 = arith.constant dense<0.000000e+00> : vector<2x8x64xf32>
    %79 = tpu.matmul %78, %66, %cst_22 {dimension_numbers = #tpu.dot_dimension_numbers<[2], [1], [1], [2], [0, 0, 0, 1, 1, 2], [0], [0]>} : vector<2x8x8xbf16>, vector<2x8x64xbf16>, vector<2x8x64xf32> -> vector<2x8x64xf32>
    %80 = arith.truncf %79 : vector<2x8x64xf32> to vector<2x8x64xbf16>
    %81 = vector.extract_strided_slice %42 {offsets = [0, 0, 128], sizes = [2, 8, 64], strides = [1, 1, 1]} : vector<2x8x512xbf16> to vector<2x8x64xbf16>
    %82 = vector.extract_strided_slice %44 {offsets = [0, 0, 128], sizes = [2, 8, 64], strides = [1, 1, 1]} : vector<2x8x512xbf16> to vector<2x8x64xbf16>
    %83 = vector.extract_strided_slice %46 {offsets = [0, 0, 128], sizes = [2, 8, 64], strides = [1, 1, 1]} : vector<2x8x512xbf16> to vector<2x8x64xbf16>
    %cst_23 = arith.constant dense<0.000000e+00> : vector<2x8x8xf32>
    %84 = tpu.matmul %81, %82, %cst_23 {dimension_numbers = #tpu.dot_dimension_numbers<[2], [2], [1], [1], [0, 0, 0, 1, 1, 1], [0], [0]>} : vector<2x8x64xbf16>, vector<2x8x64xbf16>, vector<2x8x8xf32> -> vector<2x8x8xf32>
    %cst_24 = arith.constant dense<0xFF800000> : vector<2x8xf32>
    %85 = vector.multi_reduction <maximumf>, %84, %cst_24 [2] : vector<2x8x8xf32> to vector<2x8xf32>
    %86 = vector.shape_cast %85 : vector<2x8xf32> to vector<2x8x1xf32>
    %87 = vector.broadcast %86 : vector<2x8x1xf32> to vector<2x8x8xf32>
    %88 = arith.subf %84, %87 : vector<2x8x8xf32>
    %89 = math.exp %88 : vector<2x8x8xf32>
    %cst_25 = arith.constant dense<0.000000e+00> : vector<2x8xf32>
    %90 = vector.multi_reduction <add>, %89, %cst_25 [2] : vector<2x8x8xf32> to vector<2x8xf32>
    %91 = vector.shape_cast %90 : vector<2x8xf32> to vector<2x8x1xf32>
    %92 = tpu.reciprocal %91 {approx = true} : vector<2x8x1xf32> -> vector<2x8x1xf32>
    %93 = vector.broadcast %92 : vector<2x8x1xf32> to vector<2x8x8xf32>
    %94 = arith.mulf %89, %93 : vector<2x8x8xf32>
    %95 = arith.truncf %94 : vector<2x8x8xf32> to vector<2x8x8xbf16>
    %cst_26 = arith.constant dense<0.000000e+00> : vector<2x8x64xf32>
    %96 = tpu.matmul %95, %83, %cst_26 {dimension_numbers = #tpu.dot_dimension_numbers<[2], [1], [1], [2], [0, 0, 0, 1, 1, 2], [0], [0]>} : vector<2x8x8xbf16>, vector<2x8x64xbf16>, vector<2x8x64xf32> -> vector<2x8x64xf32>
    %97 = arith.truncf %96 : vector<2x8x64xf32> to vector<2x8x64xbf16>
    %98 = vector.extract_strided_slice %42 {offsets = [0, 0, 192], sizes = [2, 8, 64], strides = [1, 1, 1]} : vector<2x8x512xbf16> to vector<2x8x64xbf16>
    %99 = vector.extract_strided_slice %44 {offsets = [0, 0, 192], sizes = [2, 8, 64], strides = [1, 1, 1]} : vector<2x8x512xbf16> to vector<2x8x64xbf16>
    %100 = vector.extract_strided_slice %46 {offsets = [0, 0, 192], sizes = [2, 8, 64], strides = [1, 1, 1]} : vector<2x8x512xbf16> to vector<2x8x64xbf16>
    %cst_27 = arith.constant dense<0.000000e+00> : vector<2x8x8xf32>
    %101 = tpu.matmul %98, %99, %cst_27 {dimension_numbers = #tpu.dot_dimension_numbers<[2], [2], [1], [1], [0, 0, 0, 1, 1, 1], [0], [0]>} : vector<2x8x64xbf16>, vector<2x8x64xbf16>, vector<2x8x8xf32> -> vector<2x8x8xf32>
    %cst_28 = arith.constant dense<0xFF800000> : vector<2x8xf32>
    %102 = vector.multi_reduction <maximumf>, %101, %cst_28 [2] : vector<2x8x8xf32> to vector<2x8xf32>
    %103 = vector.shape_cast %102 : vector<2x8xf32> to vector<2x8x1xf32>
    %104 = vector.broadcast %103 : vector<2x8x1xf32> to vector<2x8x8xf32>
    %105 = arith.subf %101, %104 : vector<2x8x8xf32>
    %106 = math.exp %105 : vector<2x8x8xf32>
    %cst_29 = arith.constant dense<0.000000e+00> : vector<2x8xf32>
    %107 = vector.multi_reduction <add>, %106, %cst_29 [2] : vector<2x8x8xf32> to vector<2x8xf32>
    %108 = vector.shape_cast %107 : vector<2x8xf32> to vector<2x8x1xf32>
    %109 = tpu.reciprocal %108 {approx = true} : vector<2x8x1xf32> -> vector<2x8x1xf32>
    %110 = vector.broadcast %109 : vector<2x8x1xf32> to vector<2x8x8xf32>
    %111 = arith.mulf %106, %110 : vector<2x8x8xf32>
    %112 = arith.truncf %111 : vector<2x8x8xf32> to vector<2x8x8xbf16>
    %cst_30 = arith.constant dense<0.000000e+00> : vector<2x8x64xf32>
    %113 = tpu.matmul %112, %100, %cst_30 {dimension_numbers = #tpu.dot_dimension_numbers<[2], [1], [1], [2], [0, 0, 0, 1, 1, 2], [0], [0]>} : vector<2x8x8xbf16>, vector<2x8x64xbf16>, vector<2x8x64xf32> -> vector<2x8x64xf32>
    %114 = arith.truncf %113 : vector<2x8x64xf32> to vector<2x8x64xbf16>
    %115 = vector.extract_strided_slice %42 {offsets = [0, 0, 256], sizes = [2, 8, 64], strides = [1, 1, 1]} : vector<2x8x512xbf16> to vector<2x8x64xbf16>
    %116 = vector.extract_strided_slice %44 {offsets = [0, 0, 256], sizes = [2, 8, 64], strides = [1, 1, 1]} : vector<2x8x512xbf16> to vector<2x8x64xbf16>
    %117 = vector.extract_strided_slice %46 {offsets = [0, 0, 256], sizes = [2, 8, 64], strides = [1, 1, 1]} : vector<2x8x512xbf16> to vector<2x8x64xbf16>
    %cst_31 = arith.constant dense<0.000000e+00> : vector<2x8x8xf32>
    %118 = tpu.matmul %115, %116, %cst_31 {dimension_numbers = #tpu.dot_dimension_numbers<[2], [2], [1], [1], [0, 0, 0, 1, 1, 1], [0], [0]>} : vector<2x8x64xbf16>, vector<2x8x64xbf16>, vector<2x8x8xf32> -> vector<2x8x8xf32>
    %cst_32 = arith.constant dense<0xFF800000> : vector<2x8xf32>
    %119 = vector.multi_reduction <maximumf>, %118, %cst_32 [2] : vector<2x8x8xf32> to vector<2x8xf32>
    %120 = vector.shape_cast %119 : vector<2x8xf32> to vector<2x8x1xf32>
    %121 = vector.broadcast %120 : vector<2x8x1xf32> to vector<2x8x8xf32>
    %122 = arith.subf %118, %121 : vector<2x8x8xf32>
    %123 = math.exp %122 : vector<2x8x8xf32>
    %cst_33 = arith.constant dense<0.000000e+00> : vector<2x8xf32>
    %124 = vector.multi_reduction <add>, %123, %cst_33 [2] : vector<2x8x8xf32> to vector<2x8xf32>
    %125 = vector.shape_cast %124 : vector<2x8xf32> to vector<2x8x1xf32>
    %126 = tpu.reciprocal %125 {approx = true} : vector<2x8x1xf32> -> vector<2x8x1xf32>
    %127 = vector.broadcast %126 : vector<2x8x1xf32> to vector<2x8x8xf32>
    %128 = arith.mulf %123, %127 : vector<2x8x8xf32>
    %129 = arith.truncf %128 : vector<2x8x8xf32> to vector<2x8x8xbf16>
    %cst_34 = arith.constant dense<0.000000e+00> : vector<2x8x64xf32>
    %130 = tpu.matmul %129, %117, %cst_34 {dimension_numbers = #tpu.dot_dimension_numbers<[2], [1], [1], [2], [0, 0, 0, 1, 1, 2], [0], [0]>} : vector<2x8x8xbf16>, vector<2x8x64xbf16>, vector<2x8x64xf32> -> vector<2x8x64xf32>
    %131 = arith.truncf %130 : vector<2x8x64xf32> to vector<2x8x64xbf16>
    %132 = vector.extract_strided_slice %42 {offsets = [0, 0, 320], sizes = [2, 8, 64], strides = [1, 1, 1]} : vector<2x8x512xbf16> to vector<2x8x64xbf16>
    %133 = vector.extract_strided_slice %44 {offsets = [0, 0, 320], sizes = [2, 8, 64], strides = [1, 1, 1]} : vector<2x8x512xbf16> to vector<2x8x64xbf16>
    %134 = vector.extract_strided_slice %46 {offsets = [0, 0, 320], sizes = [2, 8, 64], strides = [1, 1, 1]} : vector<2x8x512xbf16> to vector<2x8x64xbf16>
    %cst_35 = arith.constant dense<0.000000e+00> : vector<2x8x8xf32>
    %135 = tpu.matmul %132, %133, %cst_35 {dimension_numbers = #tpu.dot_dimension_numbers<[2], [2], [1], [1], [0, 0, 0, 1, 1, 1], [0], [0]>} : vector<2x8x64xbf16>, vector<2x8x64xbf16>, vector<2x8x8xf32> -> vector<2x8x8xf32>
    %cst_36 = arith.constant dense<0xFF800000> : vector<2x8xf32>
    %136 = vector.multi_reduction <maximumf>, %135, %cst_36 [2] : vector<2x8x8xf32> to vector<2x8xf32>
    %137 = vector.shape_cast %136 : vector<2x8xf32> to vector<2x8x1xf32>
    %138 = vector.broadcast %137 : vector<2x8x1xf32> to vector<2x8x8xf32>
    %139 = arith.subf %135, %138 : vector<2x8x8xf32>
    %140 = math.exp %139 : vector<2x8x8xf32>
    %cst_37 = arith.constant dense<0.000000e+00> : vector<2x8xf32>
    %141 = vector.multi_reduction <add>, %140, %cst_37 [2] : vector<2x8x8xf32> to vector<2x8xf32>
    %142 = vector.shape_cast %141 : vector<2x8xf32> to vector<2x8x1xf32>
    %143 = tpu.reciprocal %142 {approx = true} : vector<2x8x1xf32> -> vector<2x8x1xf32>
    %144 = vector.broadcast %143 : vector<2x8x1xf32> to vector<2x8x8xf32>
    %145 = arith.mulf %140, %144 : vector<2x8x8xf32>
    %146 = arith.truncf %145 : vector<2x8x8xf32> to vector<2x8x8xbf16>
    %cst_38 = arith.constant dense<0.000000e+00> : vector<2x8x64xf32>
    %147 = tpu.matmul %146, %134, %cst_38 {dimension_numbers = #tpu.dot_dimension_numbers<[2], [1], [1], [2], [0, 0, 0, 1, 1, 2], [0], [0]>} : vector<2x8x8xbf16>, vector<2x8x64xbf16>, vector<2x8x64xf32> -> vector<2x8x64xf32>
    %148 = arith.truncf %147 : vector<2x8x64xf32> to vector<2x8x64xbf16>
    %149 = vector.extract_strided_slice %42 {offsets = [0, 0, 384], sizes = [2, 8, 64], strides = [1, 1, 1]} : vector<2x8x512xbf16> to vector<2x8x64xbf16>
    %150 = vector.extract_strided_slice %44 {offsets = [0, 0, 384], sizes = [2, 8, 64], strides = [1, 1, 1]} : vector<2x8x512xbf16> to vector<2x8x64xbf16>
    %151 = vector.extract_strided_slice %46 {offsets = [0, 0, 384], sizes = [2, 8, 64], strides = [1, 1, 1]} : vector<2x8x512xbf16> to vector<2x8x64xbf16>
    %cst_39 = arith.constant dense<0.000000e+00> : vector<2x8x8xf32>
    %152 = tpu.matmul %149, %150, %cst_39 {dimension_numbers = #tpu.dot_dimension_numbers<[2], [2], [1], [1], [0, 0, 0, 1, 1, 1], [0], [0]>} : vector<2x8x64xbf16>, vector<2x8x64xbf16>, vector<2x8x8xf32> -> vector<2x8x8xf32>
    %cst_40 = arith.constant dense<0xFF800000> : vector<2x8xf32>
    %153 = vector.multi_reduction <maximumf>, %152, %cst_40 [2] : vector<2x8x8xf32> to vector<2x8xf32>
    %154 = vector.shape_cast %153 : vector<2x8xf32> to vector<2x8x1xf32>
    %155 = vector.broadcast %154 : vector<2x8x1xf32> to vector<2x8x8xf32>
    %156 = arith.subf %152, %155 : vector<2x8x8xf32>
    %157 = math.exp %156 : vector<2x8x8xf32>
    %cst_41 = arith.constant dense<0.000000e+00> : vector<2x8xf32>
    %158 = vector.multi_reduction <add>, %157, %cst_41 [2] : vector<2x8x8xf32> to vector<2x8xf32>
    %159 = vector.shape_cast %158 : vector<2x8xf32> to vector<2x8x1xf32>
    %160 = tpu.reciprocal %159 {approx = true} : vector<2x8x1xf32> -> vector<2x8x1xf32>
    %161 = vector.broadcast %160 : vector<2x8x1xf32> to vector<2x8x8xf32>
    %162 = arith.mulf %157, %161 : vector<2x8x8xf32>
    %163 = arith.truncf %162 : vector<2x8x8xf32> to vector<2x8x8xbf16>
    %cst_42 = arith.constant dense<0.000000e+00> : vector<2x8x64xf32>
    %164 = tpu.matmul %163, %151, %cst_42 {dimension_numbers = #tpu.dot_dimension_numbers<[2], [1], [1], [2], [0, 0, 0, 1, 1, 2], [0], [0]>} : vector<2x8x8xbf16>, vector<2x8x64xbf16>, vector<2x8x64xf32> -> vector<2x8x64xf32>
    %165 = arith.truncf %164 : vector<2x8x64xf32> to vector<2x8x64xbf16>
    %166 = vector.extract_strided_slice %42 {offsets = [0, 0, 448], sizes = [2, 8, 64], strides = [1, 1, 1]} : vector<2x8x512xbf16> to vector<2x8x64xbf16>
    %167 = vector.extract_strided_slice %44 {offsets = [0, 0, 448], sizes = [2, 8, 64], strides = [1, 1, 1]} : vector<2x8x512xbf16> to vector<2x8x64xbf16>
    %168 = vector.extract_strided_slice %46 {offsets = [0, 0, 448], sizes = [2, 8, 64], strides = [1, 1, 1]} : vector<2x8x512xbf16> to vector<2x8x64xbf16>
    %cst_43 = arith.constant dense<0.000000e+00> : vector<2x8x8xf32>
    %169 = tpu.matmul %166, %167, %cst_43 {dimension_numbers = #tpu.dot_dimension_numbers<[2], [2], [1], [1], [0, 0, 0, 1, 1, 1], [0], [0]>} : vector<2x8x64xbf16>, vector<2x8x64xbf16>, vector<2x8x8xf32> -> vector<2x8x8xf32>
    %cst_44 = arith.constant dense<0xFF800000> : vector<2x8xf32>
    %170 = vector.multi_reduction <maximumf>, %169, %cst_44 [2] : vector<2x8x8xf32> to vector<2x8xf32>
    %171 = vector.shape_cast %170 : vector<2x8xf32> to vector<2x8x1xf32>
    %172 = vector.broadcast %171 : vector<2x8x1xf32> to vector<2x8x8xf32>
    %173 = arith.subf %169, %172 : vector<2x8x8xf32>
    %174 = math.exp %173 : vector<2x8x8xf32>
    %cst_45 = arith.constant dense<0.000000e+00> : vector<2x8xf32>
    %175 = vector.multi_reduction <add>, %174, %cst_45 [2] : vector<2x8x8xf32> to vector<2x8xf32>
    %176 = vector.shape_cast %175 : vector<2x8xf32> to vector<2x8x1xf32>
    %177 = tpu.reciprocal %176 {approx = true} : vector<2x8x1xf32> -> vector<2x8x1xf32>
    %178 = vector.broadcast %177 : vector<2x8x1xf32> to vector<2x8x8xf32>
    %179 = arith.mulf %174, %178 : vector<2x8x8xf32>
    %180 = arith.truncf %179 : vector<2x8x8xf32> to vector<2x8x8xbf16>
    %cst_46 = arith.constant dense<0.000000e+00> : vector<2x8x64xf32>
    %181 = tpu.matmul %180, %168, %cst_46 {dimension_numbers = #tpu.dot_dimension_numbers<[2], [1], [1], [2], [0, 0, 0, 1, 1, 2], [0], [0]>} : vector<2x8x8xbf16>, vector<2x8x64xbf16>, vector<2x8x64xf32> -> vector<2x8x64xf32>
    %182 = arith.truncf %181 : vector<2x8x64xf32> to vector<2x8x64xbf16>
    %183 = tpu.concatenate %63, %80, %97, %114, %131, %148, %165, %182 in 2 : vector<2x8x64xbf16>, vector<2x8x64xbf16>, vector<2x8x64xbf16>, vector<2x8x64xbf16>, vector<2x8x64xbf16>, vector<2x8x64xbf16>, vector<2x8x64xbf16>, vector<2x8x64xbf16> -> vector<2x8x512xbf16>
    %184 = vector.shape_cast %183 : vector<2x8x512xbf16> to vector<16x512xbf16>
    %c0_47 = arith.constant 0 : index
    %c0_48 = arith.constant 0 : index
    %185 = vector.load %arg6[%c0_47, %c0_48] : memref<512x512xbf16, #tpu.memory_space<vmem>>, vector<512x512xbf16>
    %cst_49 = arith.constant dense<0.000000e+00> : vector<16x512xf32>
    %186 = tpu.matmul %184, %185, %cst_49 {dimension_numbers = #tpu.dot_dimension_numbers<[1], [0], [0], [1], [0, 0, 1, 1], [], []>} : vector<16x512xbf16>, vector<512x512xbf16>, vector<16x512xf32> -> vector<16x512xf32>
    %c0_50 = arith.constant 0 : index
    %c0_51 = arith.constant 0 : index
    %187 = vector.load %arg7[%c0_50, %c0_51] : memref<1x512xf32, #tpu.memory_space<vmem>>, vector<1x512xf32>
    %188 = vector.shape_cast %187 : vector<1x512xf32> to vector<512xf32>
    %189 = vector.shape_cast %188 : vector<512xf32> to vector<1x512xf32>
    %190 = vector.broadcast %189 : vector<1x512xf32> to vector<16x512xf32>
    %191 = arith.addf %186, %190 : vector<16x512xf32>
    %192 = vector.shape_cast %191 : vector<16x512xf32> to vector<2x8x512xf32>
    %193 = vector.extract_strided_slice %192 {offsets = [0, 0, 0], sizes = [1, 8, 512], strides = [1, 1, 1]} : vector<2x8x512xf32> to vector<1x8x512xf32>
    %194 = vector.shape_cast %193 : vector<1x8x512xf32> to vector<8x512xf32>
    %c0_52 = arith.constant 0 : index
    %c0_53 = arith.constant 0 : index
    %c0_54 = arith.constant 0 : index
    %195 = vector.load %arg8[%c0_52, %c0_53, %c0_54] : memref<8x2x512xf32, #tpu.memory_space<vmem>>, vector<8x1x512xf32>
    %196 = vector.shape_cast %195 : vector<8x1x512xf32> to vector<8x512xf32>
    %197 = vector.shape_cast %194 : vector<8x512xf32> to vector<8x1x512xf32>
    tpu.vector_store %arg8[%c0_52, %c0_53, %c0_54], %197 {strides = array<i32>} : memref<8x2x512xf32, #tpu.memory_space<vmem>>, vector<8x1x512xf32>,
    %198 = vector.extract_strided_slice %192 {offsets = [1, 0, 0], sizes = [1, 8, 512], strides = [1, 1, 1]} : vector<2x8x512xf32> to vector<1x8x512xf32>
    %199 = vector.shape_cast %198 : vector<1x8x512xf32> to vector<8x512xf32>
    %c0_55 = arith.constant 0 : index
    %c1 = arith.constant 1 : index
    %c0_56 = arith.constant 0 : index
    %200 = vector.load %arg8[%c0_55, %c1, %c0_56] : memref<8x2x512xf32, #tpu.memory_space<vmem>>, vector<8x1x512xf32>
    %201 = vector.shape_cast %200 : vector<8x1x512xf32> to vector<8x512xf32>
    %202 = vector.shape_cast %199 : vector<8x512xf32> to vector<8x1x512xf32>
    tpu.vector_store %arg8[%c0_55, %c1, %c0_56], %202 {strides = array<i32>} : memref<8x2x512xf32, #tpu.memory_space<vmem>>, vector<8x1x512xf32>,
    return
  }
  func.func @transform_0(%arg0: i32) -> (i32, i32, i32) {
    %c0_i32 = arith.constant 0 : i32
    %c0_i32_0 = arith.constant 0 : i32
    %c0_i32_1 = arith.constant 0 : i32
    return %c0_i32, %arg0, %c0_i32_0 : i32, i32, i32
  }
  func.func @transform_1(%arg0: i32) -> (i32, i32) {
    %c0_i32 = arith.constant 0 : i32
    %c0_i32_0 = arith.constant 0 : i32
    %c0_i32_1 = arith.constant 0 : i32
    return %c0_i32, %c0_i32_0 : i32, i32
  }
  func.func @transform_2(%arg0: i32) -> (i32, i32) {
    %c0_i32 = arith.constant 0 : i32
    %c0_i32_0 = arith.constant 0 : i32
    %c0_i32_1 = arith.constant 0 : i32
    return %c0_i32, %c0_i32_0 : i32, i32
  }
  func.func @transform_3(%arg0: i32) -> (i32, i32) {
    %c0_i32 = arith.constant 0 : i32
    %c0_i32_0 = arith.constant 0 : i32
    %c0_i32_1 = arith.constant 0 : i32
    return %c0_i32, %c0_i32_0 : i32, i32
  }
  func.func @transform_4(%arg0: i32) -> (i32, i32) {
    %c0_i32 = arith.constant 0 : i32
    %c0_i32_0 = arith.constant 0 : i32
    %c0_i32_1 = arith.constant 0 : i32
    return %c0_i32, %c0_i32_0 : i32, i32
  }
  func.func @transform_5(%arg0: i32) -> (i32, i32) {
    %c0_i32 = arith.constant 0 : i32
    %c0_i32_0 = arith.constant 0 : i32
    %c0_i32_1 = arith.constant 0 : i32
    return %c0_i32, %c0_i32_0 : i32, i32
  }
  func.func @transform_6(%arg0: i32) -> (i32, i32) {
    %c0_i32 = arith.constant 0 : i32
    %c0_i32_0 = arith.constant 0 : i32
    %c0_i32_1 = arith.constant 0 : i32
    return %c0_i32, %c0_i32_0 : i32, i32
  }
  func.func @transform_7(%arg0: i32) -> (i32, i32, i32) {
    %c0_i32 = arith.constant 0 : i32
    %c0_i32_0 = arith.constant 0 : i32
    %c0_i32_1 = arith.constant 0 : i32
    return %c0_i32, %arg0, %c0_i32_0 : i32, i32, i32
  }
}

</mosaic_0001>

<bundles_post_ra>
// kernel: tpu_custom_call.1
= control target key start
LH: loop header
LB: loop body
LE: loop exit
PB: predicated region body
PF: predicated region fallthrough
CT: control target
= control target key end

     0   :  { %12 = vsyncpa [#allocation3], 0  ;;  %s10205_s0 = inlined_call_operand.hbm [shape: f32[8,2,512], index: 0, kind: input, shape index: {}]   ;;  %s10206_s1 = inlined_call_operand.hbm [shape: f32[1,512], index: 1, kind: input, shape index: {}]   ;;  %s10207_s2 = inlined_call_operand.hbm [shape: f32[1,512], index: 2, kind: input, shape index: {}]   ;;  %s10208_s3 = inlined_call_operand.hbm [shape: bf16[512,1536], index: 3, kind: input, shape index: {}]   ;;  %s10209_s4 = inlined_call_operand.hbm [shape: f32[1,1536], index: 4, kind: input, shape index: {}]   ;;  %s10210_s5 = inlined_call_operand.hbm [shape: bf16[512,512], index: 5, kind: input, shape index: {}]   ;;  %s10211_s6 = inlined_call_operand.hbm [shape: f32[1,512], index: 6, kind: input, shape index: {}]   ;;  %s10212_s7 = inlined_call_operand.hbm [shape: f32[8,2,512], index: 7, kind: output, shape index: {}]  }
   0x1   :  { %13 = vsyncpa [#allocation6], 0 }
   0x2   :  { %14 = vsyncpa [#allocation9], 0 }
   0x3   :  { %15 = vsyncpa [#allocation12], 0 }
   0x4   :  { %16 = vsyncpa [#allocation4], 0  ;;  %s9190_s24 = smov [#allocation5]   ;;  %s9191_s26 = smov [#allocation8]  }
   0x5   :  { %s35_s25 = sshll.u32 %s9190_s24, 4  ;;  %s54_s27 = sshll.u32 %s9191_s26, 4  ;;  %s36_s25 = int_to_ptr.vmem [resolvable:$true] %s35_s25  ;;  %s55_s27 = int_to_ptr.vmem [resolvable:$true] %s54_s27 }
   0x6   :  { %s9028_s28 = scalar_lea.vmem %s36_s25, 64  ;;  %p9033_p1 = scmp.lt.s32.totalorder %s36_s25, %s36_s25 }
   0x7   :  { %p9029_p0 = scmp.ne.s32.totalorder %s36_s25, %s9028_s28  ;;  %p9034_p2 = scmp.lt.s32.totalorder %s9028_s28, %s9028_s28 }
   0x9   :  { %p9035_p3 = por %p9034_p2, %p9033_p1 }
   0xb   :  { %p9036_p4 = pnand %p9035_p3, %p9029_p0 }
   0xd   :  { %9039 = shalt.err (!%p9036_p4)
}
   0xe   :  { %38 = dma.hbm_to_vmem [thread:$0]  %s10206_s1, 64, %s36_s25, [#allocation6]  }
   0xf   :  { %s9048_s8 = scalar_lea.vmem %s55_s27, 49152  ;;  %p9053_p6 = scmp.lt.s32.totalorder %s55_s27, %s55_s27 }
  0x10   :  { %p9049_p5 = scmp.ne.s32.totalorder %s55_s27, %s9048_s8  ;;  %p9054_p7 = scmp.lt.s32.totalorder %s9048_s8, %s9048_s8 }
  0x12   :  { %p9055_p8 = por %p9054_p7, %p9053_p6 }
  0x14   :  { %p9056_p9 = pnand %p9055_p8, %p9049_p5 }
  0x16   :  { %9059 = shalt.err (!%p9056_p9)
}
  0x17   :  { %s9192_s9 = smov 768   ;;  %s9193_s10 = smov 48  }
  0x18   :  { %60 = dma.hbm_to_vmem [thread:$0]  %s10208_s3, 49152, %s55_s27, [#allocation9], %s9192_s9, %s9192_s9, %s9193_s10  }
  0x19   :  { %s9194_s13 = smov [#allocation11]  }
  0x1a   :  { %s76_s14 = sshll.u32 %s9194_s13, 4  ;;  %s77_s14 = int_to_ptr.vmem [resolvable:$true] %s76_s14 }
  0x1b   :  { %s9068_s15 = scalar_lea.vmem %s77_s14, 16384  ;;  %p9073_p11 = scmp.lt.s32.totalorder %s77_s14, %s77_s14 }
  0x1c   :  { %p9069_p10 = scmp.ne.s32.totalorder %s77_s14, %s9068_s15  ;;  %p9074_p12 = scmp.lt.s32.totalorder %s9068_s15, %s9068_s15 }
  0x1e   :  { %p9075_p13 = por %p9074_p12, %p9073_p11 }
  0x20   :  { %p9076_p0 = pnand %p9075_p13, %p9069_p10 }
  0x22   :  { %9079 = shalt.err (!%p9076_p0)
}
  0x23   :  { %s9195_s1 = smov 256   ;;  %s9196_s16 = smov 16  }
  0x24   :  { %82 = dma.hbm_to_vmem [thread:$0]  %s10210_s5, 16384, %s77_s14, [#allocation12], %s9195_s1, %s9195_s1, %s9196_s16  }
  0x25   :  { %s9197_s19 = smov [#allocation2]  }
  0x26   :  { %s22_s20 = sshll.u32 %s9197_s19, 4  ;;  %s23_s20 = int_to_ptr.vmem [resolvable:$true] %s22_s20 }
  0x27   :  { %s9088_s3 = scalar_lea.vmem %s23_s20, 1024  ;;  %p9093_p2 = scmp.lt.s32.totalorder %s23_s20, %s23_s20 }
  0x28   :  { %p9089_p1 = scmp.ne.s32.totalorder %s23_s20, %s9088_s3  ;;  %p9094_p3 = scmp.lt.s32.totalorder %s9088_s3, %s9088_s3 }
  0x2a   :  { %p9095_p4 = por %p9094_p3, %p9093_p2 }
  0x2c   :  { %p9096_p5 = pnand %p9095_p4, %p9089_p1 }
  0x2e   :  { %9099 = shalt.err (!%p9096_p5)
}
  0x2f   :  { %s9198_s21 = smov 128   ;;  %s9199_s22 = smov 8  }
  0x30   :  { %28 = dma.hbm_to_vmem [thread:$0]  %s10205_s0, 1024, %s23_s20, [#allocation3], %s9198_s21, %s9198_s21, %s9199_s22  }
  0x31   :  { %s9200_s5 = smov [#allocation7]   ;;  %s9201_s26 = smov [#allocation10]  }
  0x32   :  { %s45_s25 = sshll.u32 %s9200_s5, 4  ;;  %s67_s27 = sshll.u32 %s9201_s26, 4  ;;  %s46_s25 = int_to_ptr.vmem [resolvable:$true] %s45_s25  ;;  %s68_s27 = int_to_ptr.vmem [resolvable:$true] %s67_s27 }
  0x33   :  { %s9108_s28 = scalar_lea.vmem %s46_s25, 64  ;;  %p9113_p7 = scmp.lt.s32.totalorder %s46_s25, %s46_s25 }
  0x34   :  { %p9109_p6 = scmp.ne.s32.totalorder %s46_s25, %s9108_s28  ;;  %p9114_p8 = scmp.lt.s32.totalorder %s9108_s28, %s9108_s28 }
  0x36   :  { %p9115_p9 = por %p9114_p8, %p9113_p7 }
  0x38   :  { %p9116_p10 = pnand %p9115_p9, %p9109_p6 }
  0x3a   :  { %9119 = shalt.err (!%p9116_p10)
}
  0x3b   :  { %48 = dma.hbm_to_vmem [thread:$0]  %s10207_s2, 64, %s46_s25, [#allocation6]  }
  0x3c   :  { %s9128_s8 = scalar_lea.vmem %s68_s27, 192  ;;  %p9133_p12 = scmp.lt.s32.totalorder %s68_s27, %s68_s27 }
  0x3d   :  { %p9129_p11 = scmp.ne.s32.totalorder %s68_s27, %s9128_s8  ;;  %p9134_p13 = scmp.lt.s32.totalorder %s9128_s8, %s9128_s8 }
  0x3f   :  { %p9135_p0 = por %p9134_p13, %p9133_p12 }
  0x41   :  { %p9136_p1 = pnand %p9135_p0, %p9129_p11 }
  0x43   :  { %9139 = shalt.err (!%p9136_p1)
}
  0x44   :  { %70 = dma.hbm_to_vmem [thread:$0]  %s10209_s4, 192, %s68_s27, [#allocation9]  }
  0x45   :  { %s9202_s10 = smov [#allocation13]  }
  0x46   :  { %s89_s11 = sshll.u32 %s9202_s10, 4  ;;  %s90_s11 = int_to_ptr.vmem [resolvable:$true] %s89_s11 }
  0x47   :  { %s9148_s12 = scalar_lea.vmem %s90_s11, 64  ;;  %p9153_p3 = scmp.lt.s32.totalorder %s90_s11, %s90_s11 }
  0x48   :  { %p9149_p2 = scmp.ne.s32.totalorder %s90_s11, %s9148_s12  ;;  %p9154_p4 = scmp.lt.s32.totalorder %s9148_s12, %s9148_s12 }
  0x4a   :  { %p9155_p5 = por %p9154_p4, %p9153_p3 }
  0x4c   :  { %p9156_p6 = pnand %p9155_p5, %p9149_p2 }
  0x4e   :  { %9159 = shalt.err (!%p9156_p6)
}
  0x4f   :  { %92 = dma.hbm_to_vmem [thread:$0]  %s10211_s6, 64, %s90_s11, [#allocation12]  }
  0x50   :  { %9180 = dma.done.wait [#allocation3], 1024  }
  0x51   :  { %9181 = vsyncadd [#allocation3], 4294966272 }
  0x52   :  { %9182 = dma.done.wait [#allocation6], 128  }
  0x53   :  { %9183 = vsyncadd [#allocation6], 4294967168 }
  0x54   :  { %9184 = dma.done.wait [#allocation9], 49344  }
  0x55   :  { %9185 = vsyncadd [#allocation9], 4294917952 }
  0x56   :  { %9186 = dma.done.wait [#allocation12], 16448  }
  0x57   :  { %9187 = vsyncadd [#allocation12], 4294950848  ;;  %v135_v0 = vlaneseq  ;;  %v9203_v1 = vmov 1983009808   ;;  %v115_v6 = vld [vmem:[#allocation2] sm:$0xff]  ;;  %vm299_vm0 = vcmask 1041408  }
  0x58   :  { %v133_v2 = vunpack.c.l.s4 %v9203_v1  ;;  %v117_v7 = vld [vmem:[#allocation2 + $0x10] sm:$0xff]  ;;  %v116_v8 = vld [vmem:[#allocation2 + $0x8] sm:$0xff]  ;;  %v131_v9 = vcombine.high %v115_v6, %v115_v6  ;;  %v118_v13 = vld [vmem:[#allocation2 + $0x18] sm:$0xff]  ;;  %vm1182_vm1 = vcmask 1041409   ;;  %vm1185_vm2 = vcmask 1042434   ;;  %s9207_s4 = smov 64  }
  0x59   :  { %v9275_v3 = vshrl.u32 %v135_v0, 7  ;;  %v165_v11 = vcombine.high %v117_v7, %v117_v7  ;;  %v148_v14 = vcombine.high %v116_v8, %v116_v8  ;;  %v182_v16 = vcombine.high %v118_v13, %v118_v13  ;;  %v119_v30 = vld [vmem:[#allocation2 + $0x20] sm:$0xff]  ;;  %v120_v51 = vld [vmem:[#allocation2 + $0x28] sm:$0xff]  ;;  %v121_v56 = vld [vmem:[#allocation2 + $0x30] sm:$0xff]  ;;  %s9209_s6 = smov [#allocation14]  }
  0x5a   :  { %v134_v4 = vunpack.c.0.s8 %v133_v2  ;;  %v199_v49 = vcombine.high %v119_v30, %v119_v30  ;;  %v216_v1 = vcombine.high %v120_v51, %v120_v51  ;;  %v122_v2 = vld [vmem:[#allocation2 + $0x38] sm:$0xff]  ;;  %vm1188_vm3 = vcmask 1043459   ;;  %s7269_s14 = sshll.u32 %s9209_s6, 4  ;;  %s7270_s14 = int_to_ptr.vmem [resolvable:$true] %s7269_s14 }
  0x5b   :  { %vm1191_vm4 = vcmask 1044484   ;;  %vm1194_vm5 = vcmask 1045509   ;;  %vm1197_vm6 = vcmask 1046534   ;;  %vm1200_vm7 = vcmask 1047559   ;;  %s9160_s15 = scalar_lea.vmem %s7270_s14, 1024  ;;  %p9165_p8 = scmp.lt.s32.totalorder %s7270_s14, %s7270_s14 }
  0x5c   :  { %v9278_v5 = vsub.s32 %v134_v4, %v9275_v3  ;;  %vm1308_vm8 = vcmask 1043456   ;;  %vm9206_vm9 = vmmov 0   ;;  %vm4269_vm10 = vcmask 523264   ;;  %p9161_p7 = scmp.ne.s32.totalorder %s7270_s14, %s9160_s15  ;;  %p9166_p9 = scmp.lt.s32.totalorder %s9160_s15, %s9160_s15 }
  0x5d   :  { %vm4362_vm11 = vcmask 64512   ;;  %vm10163_vm12 = vcmp.lt.s32.totalorder %v135_v0, 512 }
  0x5e   :  { %v138_v10 = vrot.slane %v115_v6, %v9278_v5  ;;  %v172_v12 = vrot.slane %v117_v7, %v9278_v5  ;;  %v155_v15 = vrot.slane %v116_v8, %v9278_v5  ;;  %v189_v17 = vrot.slane %v118_v13, %v9278_v5  ;;  %p9167_p10 = por %p9166_p9, %p9165_p8 }
  0x5f   :  { %v145_v18 = vrot.slane %v131_v9, %v9278_v5  ;;  %v179_v21 = vrot.slane %v165_v11, %v9278_v5  ;;  %v162_v24 = vrot.slane %v148_v14, %v9278_v5  ;;  %v196_v45 = vrot.slane %v182_v16, %v9278_v5 }
  0x60   :  { %v146_v19 = vcombine.high %v138_v10, %v138_v10  ;;  %v300_v20 = vsel %vm299_vm0, %v138_v10, 0.0  ;;  %v180_v22 = vcombine.high %v172_v12, %v172_v12  ;;  %v318_v23 = vsel %vm299_vm0, %v172_v12, 0.0  ;;  %p9168_p11 = pnand %p9167_p10, %p9161_p7 }
  0x61   :  { %v163_v25 = vcombine.high %v155_v15, %v155_v15  ;;  %v147_v26 = vcombine.high %v145_v18, %v145_v18  ;;  %v303_v28 = vsel %vm299_vm0, %v145_v18, 0.0  ;;  %v181_v29 = vcombine.high %v179_v21, %v179_v21 }
  0x62   :  { %v301_v27 = vsel %vm299_vm0, %v146_v19, 0.0  ;;  %v319_v32 = vsel %vm299_vm0, %v180_v22, 0.0  ;;  %v321_v33 = vsel %vm299_vm0, %v179_v21, 0.0  ;;  %v164_v34 = vcombine.high %v162_v24, %v162_v24 }
  0x63   :  { %v302_v31 = vadd.f32 %v301_v27, %v300_v20  ;;  %v305_v35 = vsel %vm299_vm0, %v147_v26, 0.0  ;;  %v320_v36 = vadd.f32 %v319_v32, %v318_v23  ;;  %v323_v37 = vsel %vm299_vm0, %v181_v29, 0.0 }
  0x64   :  { %v309_v38 = vsel %vm299_vm0, %v155_v15, 0.0  ;;  %v310_v40 = vsel %vm299_vm0, %v163_v25, 0.0  ;;  %v312_v41 = vsel %vm299_vm0, %v162_v24, 0.0  ;;  %v314_v42 = vsel %vm299_vm0, %v164_v34, 0.0 }
  0x65   :  { %v304_v39 = vadd.f32 %v303_v28, %v302_v31  ;;  %v322_v43 = vadd.f32 %v321_v33, %v320_v36  ;;  %v311_v44 = vadd.f32 %v310_v40, %v309_v38  ;;  %v197_v46 = vcombine.high %v189_v17, %v189_v17 }
  0x66   :  { %v327_v48 = vsel %vm299_vm0, %v189_v17, 0.0  ;;  %v206_v50 = vrot.slane %v119_v30, %v9278_v5  ;;  %v198_v54 = vcombine.high %v196_v45, %v196_v45  ;;  %v330_v58 = vsel %vm299_vm0, %v196_v45, 0.0 }
  0x67   :  { %v306_v47 = vadd.f32 %v305_v35, %v304_v39  ;;  %v324_v52 = vadd.f32 %v323_v37, %v322_v43  ;;  %v313_v53 = vadd.f32 %v312_v41, %v311_v44  ;;  %v328_v55 = vsel %vm299_vm0, %v197_v46, 0.0 }
  0x68   :  { %v329_v57 = vadd.f32 %v328_v55, %v327_v48  ;;  %v213_v59 = vrot.slane %v199_v49, %v9278_v5  ;;  %v214_v60 = vcombine.high %v206_v50, %v206_v50  ;;  %v332_v62 = vsel %vm299_vm0, %v198_v54, 0.0  ;;  %v8164_v49 = vld [vmem:[#allocation8 + $0x2a4] ss:$48 sps:$4 sm:$0xff]   ;;  %v8172_v55 = vld [vmem:[#allocation8 + $0x240] ss:$48 sps:$4 sm:$0xff]  }
  0x69   :  { %307 = vadd.xlane.f32.xlu0 %v306_v47  ;;  %325 = vadd.xlane.f32.xlu1 %v324_v52  ;;  %v315_v61 = vadd.f32 %v314_v42, %v313_v53  ;;  %v336_v63 = vsel %vm299_vm0, %v206_v50, 0.0  ;;  %v223_v10 = vrot.slane %v120_v51, %v9278_v5  ;;  %v230_v11 = vrot.slane %v216_v1, %v9278_v5  ;;  %v8166_v50 = vld [vmem:[#allocation8 + $0x2a0] ss:$48 sps:$4 sm:$0xff]   ;;  %v8167_v51 = vld [vmem:[#allocation8 + $0x8a4] ss:$48 sps:$4 sm:$0xff]  }
  0x6a   :  { %v331_v4 = vadd.f32 %v330_v58, %v329_v57  ;;  %v215_v6 = vcombine.high %v213_v59, %v213_v59  ;;  %v337_v7 = vsel %vm299_vm0, %v214_v60, 0.0  ;;  %v339_v8 = vsel %vm299_vm0, %v213_v59, 0.0  ;;  %v8169_v52 = vld [vmem:[#allocation8 + $0x8a0] ss:$48 sps:$4 sm:$0xff]   ;;  %v8170_v53 = vld [vmem:[#allocation8 + $0x244] ss:$48 sps:$4 sm:$0xff]   ;;  %3693 = vmatprep.subr.bf16.mxu0 %v8164_v49  ;;  %3736 = vmatprep.subr.bf16.mxu1 %v8167_v51 }
  0x6b   :  { %v338_v9 = vadd.f32 %v337_v7, %v336_v63  ;;  %v233_v12 = vcombine.high %v121_v56, %v121_v56  ;;  %v240_v15 = vrot.slane %v121_v56, %v9278_v5  ;;  %v250_v16 = vcombine.high %v122_v2, %v122_v2  ;;  %v8173_v54 = vld [vmem:[#allocation8 + $0x844] ss:$48 sps:$4 sm:$0xff]   ;;  %3694 = vmatpush1.bf16.msra.mxu0 %v8166_v50  ;;  %v8175_v56 = vld [vmem:[#allocation8 + $0x840] ss:$48 sps:$4 sm:$0xff]   ;;  %v9012_v7 = vld [vmem:[#allocation2] sm:$0xff] }
  0x6c   :  { %v333_v13 = vadd.f32 %v332_v62, %v331_v4  ;;  %v341_v14 = vsel %vm299_vm0, %v215_v6, 0.0  ;;  %v231_v18 = vcombine.high %v223_v10, %v223_v10  ;;  %v232_v19 = vcombine.high %v230_v11, %v230_v11  ;;  %3737 = vmatpush1.bf16.msra.mxu1 %v8169_v52  ;;  %3695 = vmatprep.subr.bf16.mxu0 %v8170_v53 }
  0x6d   :  { %316 = vadd.xlane.f32.xlu0 %v315_v61  ;;  %v340_v17 = vadd.f32 %v339_v8, %v338_v9  ;;  %v345_v20 = vsel %vm299_vm0, %v223_v10, 0.0  ;;  %v348_v21 = vsel %vm299_vm0, %v230_v11, 0.0  ;;  %v247_v22 = vrot.slane %v233_v12, %v9278_v5  ;;  %3738 = vmatprep.subr.bf16.mxu1 %v8173_v54  ;;  %v9013_v10 = vld [vmem:[#allocation2 + $0x10] sm:$0xff] }
  0x6e   :  { %334 = vadd.xlane.f32.xlu1 %v333_v13  ;;  %v248_v23 = vcombine.high %v240_v15, %v240_v15  ;;  %v354_v24 = vsel %vm299_vm0, %v240_v15, 0.0  ;;  %v346_v26 = vsel %vm299_vm0, %v231_v18, 0.0  ;;  %v350_v27 = vsel %vm299_vm0, %v232_v19, 0.0 }
  0x6f   :  { %v342_v25 = vadd.f32 %v341_v14, %v340_v17  ;;  %v257_v28 = vrot.slane %v122_v2, %v9278_v5  ;;  %v347_v29 = vadd.f32 %v346_v26, %v345_v20  ;;  %v249_v30 = vcombine.high %v247_v22, %v247_v22  ;;  %3696 = vmatpush1.bf16.msra.mxu0 %v8172_v55  ;;  %v9014_v17 = vld [vmem:[#allocation2 + $0x8] sm:$0xff] }
  0x70   :  { %v355_v31 = vsel %vm299_vm0, %v248_v23, 0.0  ;;  %v357_v32 = vsel %vm299_vm0, %v247_v22, 0.0  ;;  %v264_v34 = vrot.slane %v250_v16, %v9278_v5  ;;  %3739 = vmatpush1.bf16.msra.mxu1 %v8175_v56  ;;  %v9204_v57 = vmov 269488144  }
  0x71   :  { %343 = vadd.xlane.f32.xlu0 %v342_v25  ;;  %v356_v33 = vadd.f32 %v355_v31, %v354_v24  ;;  %v265_v35 = vcombine.high %v257_v28, %v257_v28  ;;  %v363_v36 = vsel %vm299_vm0, %v257_v28, 0.0  ;;  %v349_v37 = vadd.f32 %v348_v21, %v347_v29 }
  0x72   :  { %v359_v38 = vsel %vm299_vm0, %v249_v30, 0.0  ;;  %v266_v40 = vcombine.high %v264_v34, %v264_v34  ;;  %v366_v42 = vsel %vm299_vm0, %v264_v34, 0.0  ;;  %v390_v58 = vunpack.c.l.s4 %v9204_v57 }
  0x73   :  { %v358_v39 = vadd.f32 %v357_v32, %v356_v33  ;;  %v364_v41 = vsel %vm299_vm0, %v265_v35, 0.0  ;;  %v351_v43 = vadd.f32 %v350_v27, %v349_v37  ;;  %v9015_v27 = vld [vmem:[#allocation2 + $0x18] sm:$0xff] }
  0x74   :  { %v365_v44 = vadd.f32 %v364_v41, %v363_v36  ;;  %v368_v46 = vsel %vm299_vm0, %v266_v40, 0.0  ;;  %v391_v59 = vunpack.c.0.s8 %v390_v58 }
  0x75   :  { %v360_v45 = vadd.f32 %v359_v38, %v358_v39  ;;  %352 = vadd.xlane.f32.xlu1 %v351_v43  ;;  %v9016_v39 = vld [vmem:[#allocation2 + $0x20] sm:$0xff] }
  0x76   :  { %v367_v47 = vadd.f32 %v366_v42, %v365_v44  ;;  %v9329_v60 = vsub.s32 %v391_v59, %v9275_v3 }
  0x77   :  { %361 = vadd.xlane.f32.xlu0 %v360_v45 }
  0x78   :  { %v369_v48 = vadd.f32 %v368_v46, %v367_v47 }
  0x7a   :  { %370 = vadd.xlane.f32.xlu1 %v369_v48 }
  0xf2   :  { %v308_v61 = vpop.xlane.xlu0 %307  ;;  %v326_v63 = vpop.xlane.xlu1 %325 }
  0xf3   :  { %v373_v62 = vmul.f32 0.001953125, %v308_v61  ;;  %v375_v1 = vmul.f32 0.001953125, %v326_v63 }
  0xf5   :  { %v395_v2 = vrot.slane %v373_v62, %v9329_v60  ;;  %v409_v4 = vrot.slane %v375_v1, %v9329_v60  ;;  %v9017_v1 = vld [vmem:[#allocation2 + $0x28] sm:$0xff] }
  0xf6   :  { %v317_v6 = vpop.xlane.xlu0 %316 }
  0xf7   :  { %v9333_v8 = vsub.f32 %v9012_v7, %v395_v2  ;;  %v374_v9 = vmul.f32 0.001953125, %v317_v6  ;;  %v9335_v11 = vsub.f32 %v9013_v10, %v409_v4  ;;  %v335_v12 = vpop.xlane.xlu1 %334 }
  0xf8   :  { %v376_v15 = vmul.f32 0.001953125, %v335_v12 }
  0xf9   :  { %v461_v13 = vmul.f32 %v9333_v8, %v9333_v8  ;;  %v402_v14 = vrot.slane %v374_v9, %v9329_v60  ;;  %v463_v16 = vmul.f32 %v9335_v11, %v9335_v11  ;;  %v9018_v9 = vld [vmem:[#allocation2 + $0x30] sm:$0xff] }
  0xfa   :  { %v416_v19 = vrot.slane %v376_v15, %v9329_v60  ;;  %v344_v20 = vpop.xlane.xlu0 %343 }
  0xfb   :  { %v9342_v18 = vsub.f32 %v9014_v17, %v402_v14  ;;  %v477_v21 = vcombine.high %v461_v13, %v461_v13  ;;  %v484_v22 = vrot.slane %v461_v13, %v9278_v5  ;;  %v377_v23 = vmul.f32 0.001953125, %v344_v20 }
  0xfc   :  { %v511_v24 = vcombine.high %v463_v16, %v463_v16  ;;  %v518_v25 = vrot.slane %v463_v16, %v9278_v5  ;;  %v9349_v28 = vsub.f32 %v9015_v27, %v416_v19 }
  0xfd   :  { %v462_v26 = vmul.f32 %v9342_v18, %v9342_v18  ;;  %v491_v29 = vrot.slane %v477_v21, %v9278_v5  ;;  %v492_v30 = vcombine.high %v484_v22, %v484_v22  ;;  %v423_v31 = vrot.slane %v377_v23, %v9329_v60 }
  0xfe   :  { %v645_v32 = vsel %vm299_vm0, %v484_v22, 0.0  ;;  %v525_v33 = vrot.slane %v511_v24, %v9278_v5  ;;  %v526_v34 = vcombine.high %v518_v25, %v518_v25  ;;  %v464_v35 = vmul.f32 %v9349_v28, %v9349_v28  ;;  %v353_v41 = vpop.xlane.xlu1 %352  ;;  %v9019_v24 = vld [vmem:[#allocation2 + $0x38] sm:$0xff] }
  0xff   :  { %v493_v36 = vcombine.high %v491_v29, %v491_v29  ;;  %v646_v37 = vsel %vm299_vm0, %v492_v30, 0.0  ;;  %v648_v38 = vsel %vm299_vm0, %v491_v29, 0.0  ;;  %v9359_v40 = vsub.f32 %v9016_v39, %v423_v31 }
 0x100   :  { %v647_v42 = vadd.f32 %v646_v37, %v645_v32  ;;  %v527_v43 = vcombine.high %v525_v33, %v525_v33  ;;  %v663_v44 = vsel %vm299_vm0, %v518_v25, 0.0  ;;  %v378_v45 = vmul.f32 0.001953125, %v353_v41  ;;  %v362_v46 = vpop.xlane.xlu0 %361 }
 0x101   :  { %v650_v47 = vsel %vm299_vm0, %v493_v36, 0.0  ;;  %v664_v48 = vsel %vm299_vm0, %v526_v34, 0.0  ;;  %v666_v49 = vsel %vm299_vm0, %v525_v33, 0.0  ;;  %v465_v50 = vmul.f32 %v9359_v40, %v9359_v40 }
 0x102   :  { %v379_v51 = vmul.f32 0.001953125, %v362_v46  ;;  %v649_v52 = vadd.f32 %v648_v38, %v647_v42  ;;  %v665_v53 = vadd.f32 %v664_v48, %v663_v44  ;;  %v430_v54 = vrot.slane %v378_v45, %v9329_v60 }
 0x103   :  { %v668_v55 = vsel %vm299_vm0, %v527_v43, 0.0  ;;  %v494_v56 = vcombine.high %v462_v26, %v462_v26  ;;  %v501_v57 = vrot.slane %v462_v26, %v9278_v5  ;;  %v371_v59 = vpop.xlane.xlu1 %370  ;;  %v528_v63 = vcombine.high %v464_v35, %v464_v35 }
 0x104   :  { %v437_v58 = vrot.slane %v379_v51, %v9329_v60  ;;  %v651_v61 = vadd.f32 %v650_v47, %v649_v52  ;;  %v667_v62 = vadd.f32 %v666_v49, %v665_v53  ;;  %v9371_v2 = vsub.f32 %v9017_v1, %v430_v54 }
 0x105   :  { %v380_v4 = vmul.f32 0.001953125, %v371_v59  ;;  %v508_v6 = vrot.slane %v494_v56, %v9278_v5  ;;  %v509_v7 = vcombine.high %v501_v57, %v501_v57  ;;  %v654_v13 = vsel %vm299_vm0, %v501_v57, 0.0 }
 0x106   :  { %v9374_v10 = vsub.f32 %v9018_v9, %v437_v58  ;;  %652 = vadd.xlane.f32.xlu0 %v651_v61  ;;  %v669_v12 = vadd.f32 %v668_v55, %v667_v62  ;;  %v535_v14 = vrot.slane %v464_v35, %v9278_v5  ;;  %v466_v15 = vmul.f32 %v9371_v2, %v9371_v2 }
 0x107   :  { %v444_v16 = vrot.slane %v380_v4, %v9329_v60  ;;  %v510_v17 = vcombine.high %v508_v6, %v508_v6  ;;  %v655_v19 = vsel %vm299_vm0, %v509_v7, 0.0  ;;  %v657_v22 = vsel %vm299_vm0, %v508_v6, 0.0 }
 0x108   :  { %v467_v20 = vmul.f32 %v9374_v10, %v9374_v10  ;;  %v656_v21 = vadd.f32 %v655_v19, %v654_v13  ;;  %v542_v23 = vrot.slane %v528_v63, %v9278_v5  ;;  %v543_v27 = vcombine.high %v535_v14, %v535_v14 }
 0x109   :  { %v9386_v25 = vsub.f32 %v9019_v24, %v444_v16  ;;  %v659_v26 = vsel %vm299_vm0, %v510_v17, 0.0  ;;  %v672_v29 = vsel %vm299_vm0, %v535_v14, 0.0  ;;  %v545_v33 = vcombine.high %v465_v50, %v465_v50 }
 0x10a   :  { %670 = vadd.xlane.f32.xlu0 %v669_v12  ;;  %v658_v30 = vadd.f32 %v657_v22, %v656_v21  ;;  %v544_v31 = vcombine.high %v542_v23, %v542_v23  ;;  %v675_v32 = vsel %vm299_vm0, %v542_v23, 0.0  ;;  %v673_v35 = vsel %vm299_vm0, %v543_v27, 0.0 }
 0x10b   :  { %v468_v34 = vmul.f32 %v9386_v25, %v9386_v25  ;;  %v552_v36 = vrot.slane %v465_v50, %v9278_v5  ;;  %v562_v37 = vcombine.high %v466_v15, %v466_v15  ;;  %v674_v39 = vadd.f32 %v673_v35, %v672_v29  ;;  %v8178_v35 = vld [vmem:[#allocation8 + $0x1e0] ss:$48 sps:$4 sm:$0xff]  }
 0x10c   :  { %v660_v38 = vadd.f32 %v659_v26, %v658_v30  ;;  %v677_v41 = vsel %vm299_vm0, %v544_v31, 0.0  ;;  %v559_v42 = vrot.slane %v545_v33, %v9278_v5  ;;  %v569_v45 = vrot.slane %v466_v15, %v9278_v5  ;;  %v8176_v33 = vld [vmem:[#allocation8 + $0x1e4] ss:$48 sps:$4 sm:$0xff]  }
 0x10d   :  { %v560_v43 = vcombine.high %v552_v36, %v552_v36  ;;  %v681_v44 = vsel %vm299_vm0, %v552_v36, 0.0  ;;  %v576_v46 = vrot.slane %v562_v37, %v9278_v5  ;;  %v676_v47 = vadd.f32 %v675_v32, %v674_v39  ;;  %3697 = vmatprep.subr.bf16.mxu0 %v8176_v33  ;;  %v8179_v37 = vld [vmem:[#allocation8 + $0x7e4] ss:$48 sps:$4 sm:$0xff]   ;;  %v8181_v39 = vld [vmem:[#allocation8 + $0x7e0] ss:$48 sps:$4 sm:$0xff]  }
 0x10e   :  { %661 = vadd.xlane.f32.xlu1 %v660_v38  ;;  %v561_v48 = vcombine.high %v559_v42, %v559_v42  ;;  %v684_v49 = vsel %vm299_vm0, %v559_v42, 0.0  ;;  %v579_v50 = vcombine.high %v467_v20, %v467_v20  ;;  %v577_v52 = vcombine.high %v569_v45, %v569_v45  ;;  %3698 = vmatpush1.bf16.msra.mxu0 %v8178_v35  ;;  %v8184_v42 = vld [vmem:[#allocation8 + $0x180] ss:$48 sps:$4 sm:$0xff]   ;;  %v8251_v33 = vld [vmem:[#allocation8 + $0x964] ss:$48 sps:$4 sm:$0xff]  }
 0x10f   :  { %v682_v51 = vsel %vm299_vm0, %v560_v43, 0.0  ;;  %v578_v53 = vcombine.high %v576_v46, %v576_v46  ;;  %v690_v54 = vsel %vm299_vm0, %v569_v45, 0.0  ;;  %v678_v55 = vadd.f32 %v677_v41, %v676_v47  ;;  %3740 = vmatprep.subr.bf16.mxu1 %v8179_v37  ;;  %v8182_v41 = vld [vmem:[#allocation8 + $0x184] ss:$48 sps:$4 sm:$0xff]  }
 0x110   :  { %v683_v56 = vadd.f32 %v682_v51, %v681_v44  ;;  %v686_v57 = vsel %vm299_vm0, %v561_v48, 0.0  ;;  %v691_v58 = vsel %vm299_vm0, %v577_v52, 0.0  ;;  %v693_v59 = vsel %vm299_vm0, %v576_v46, 0.0  ;;  %3741 = vmatpush1.bf16.msra.mxu1 %v8181_v39  ;;  %3699 = vmatprep.subr.bf16.mxu0 %v8182_v41  ;;  %v8185_v43 = vld [vmem:[#allocation8 + $0x784] ss:$48 sps:$4 sm:$0xff]  }
 0x111   :  { %v586_v61 = vrot.slane %v467_v20, %v9278_v5  ;;  %v593_v62 = vrot.slane %v579_v50, %v9278_v5  ;;  %v692_v1 = vadd.f32 %v691_v58, %v690_v54  ;;  %v596_v4 = vcombine.high %v468_v34, %v468_v34  ;;  %v8187_v44 = vld [vmem:[#allocation8 + $0x780] ss:$48 sps:$4 sm:$0xff]   ;;  %3742 = vmatprep.subr.bf16.mxu1 %v8185_v43  ;;  %v8188_v45 = vld [vmem:[#allocation8 + $0x124] ss:$48 sps:$4 sm:$0xff]   ;;  %v8262_v41 = vld [vmem:[#allocation8 + $0x2ac] ss:$48 sps:$4 sm:$0xff]  }
 0x112   :  { %679 = vadd.xlane.f32.xlu1 %v678_v55  ;;  %v685_v63 = vadd.f32 %v684_v49, %v683_v56  ;;  %v603_v6 = vrot.slane %v468_v34, %v9278_v5  ;;  %v695_v7 = vsel %vm299_vm0, %v578_v53, 0.0  ;;  %3700 = vmatpush1.bf16.msra.mxu0 %v8184_v42  ;;  %v8190_v46 = vld [vmem:[#allocation8 + $0x120] ss:$48 sps:$4 sm:$0xff]   ;;  %v8191_v47 = vld [vmem:[#allocation8 + $0x724] ss:$48 sps:$4 sm:$0xff]  }
 0x113   :  { %v594_v9 = vcombine.high %v586_v61, %v586_v61  ;;  %v595_v12 = vcombine.high %v593_v62, %v593_v62  ;;  %v699_v13 = vsel %vm299_vm0, %v586_v61, 0.0  ;;  %v694_v15 = vadd.f32 %v693_v59, %v692_v1  ;;  %3701 = vmatprep.subr.bf16.mxu0 %v8188_v45  ;;  %v8193_v48 = vld [vmem:[#allocation8 + $0x720] ss:$48 sps:$4 sm:$0xff]   ;;  %v8194_v49 = vld [vmem:[#allocation8 + $0xc4] ss:$48 sps:$4 sm:$0xff]  }
 0x114   :  { %v687_v14 = vadd.f32 %v686_v57, %v685_v63  ;;  %v610_v16 = vrot.slane %v596_v4, %v9278_v5  ;;  %v611_v17 = vcombine.high %v603_v6, %v603_v6  ;;  %v702_v20 = vsel %vm299_vm0, %v593_v62, 0.0  ;;  %3743 = vmatpush1.bf16.msra.mxu1 %v8187_v44  ;;  %v8196_v50 = vld [vmem:[#allocation8 + $0xc0] ss:$48 sps:$4 sm:$0xff]   ;;  %v8197_v51 = vld [vmem:[#allocation8 + $0x6c4] ss:$48 sps:$4 sm:$0xff]  }
 0x115   :  { %v700_v19 = vsel %vm299_vm0, %v594_v9, 0.0  ;;  %v708_v21 = vsel %vm299_vm0, %v603_v6, 0.0  ;;  %v696_v22 = vadd.f32 %v695_v7, %v694_v15  ;;  %v704_v27 = vsel %vm299_vm0, %v595_v12, 0.0  ;;  %3744 = vmatprep.subr.bf16.mxu1 %v8191_v47  ;;  %v8199_v52 = vld [vmem:[#allocation8 + $0x6c0] ss:$48 sps:$4 sm:$0xff]  }
 0x116   :  { %688 = vadd.xlane.f32.xlu0 %v687_v14  ;;  %v701_v23 = vadd.f32 %v700_v19, %v699_v13  ;;  %v612_v24 = vcombine.high %v610_v16, %v610_v16  ;;  %v709_v26 = vsel %vm299_vm0, %v611_v17, 0.0  ;;  %v711_v30 = vsel %vm299_vm0, %v610_v16, 0.0  ;;  %3702 = vmatpush1.bf16.msra.mxu0 %v8190_v46  ;;  %v8200_v53 = vld [vmem:[#allocation8 + $0x64] ss:$48 sps:$4 sm:$0xff]   ;;  %v8202_v54 = vld [vmem:[#allocation8 + $0x60] ss:$48 sps:$4 sm:$0xff]  }
 0x117   :  { %v710_v29 = vadd.f32 %v709_v26, %v708_v21  ;;  %697 = vadd.xlane.f32.xlu1 %v696_v22  ;;  %3703 = vmatprep.subr.bf16.mxu0 %v8194_v49  ;;  %v8203_v55 = vld [vmem:[#allocation8 + $0x664] ss:$48 sps:$4 sm:$0xff]   ;;  %v8205_v56 = vld [vmem:[#allocation8 + $0x660] ss:$48 sps:$4 sm:$0xff]   ;;  %v8265_v42 = vld [vmem:[#allocation8 + $0x8ac] ss:$48 sps:$4 sm:$0xff]  }
 0x118   :  { %v703_v31 = vadd.f32 %v702_v20, %v701_v23  ;;  %v713_v32 = vsel %vm299_vm0, %v612_v24, 0.0  ;;  %3745 = vmatpush1.bf16.msra.mxu1 %v8193_v48  ;;  %v8206_v57 = vld [vmem:[#allocation8 + $0x4] ss:$48 sps:$4 sm:$0xff]   ;;  %v8208_v58 = vld [vmem:[#allocation8] ss:$48 sps:$4 sm:$0xff]   ;;  %v9420_v46 = vsub.s32 0, %v9275_v3 }
 0x119   :  { %v712_v34 = vadd.f32 %v711_v30, %v710_v29  ;;  %3746 = vmatprep.subr.bf16.mxu1 %v8197_v51  ;;  %v8209_v59 = vld [vmem:[#allocation8 + $0x604] ss:$48 sps:$4 sm:$0xff]   ;;  %v8211_v61 = vld [vmem:[#allocation8 + $0x600] ss:$48 sps:$4 sm:$0xff]   ;;  %v821_v45 = vld [vmem:[#allocation5] sm:$0xf] }
 0x11a   :  { %v705_v36 = vadd.f32 %v704_v27, %v703_v31  ;;  %3704 = vmatpush1.bf16.msra.mxu0 %v8196_v50  ;;  %v8212_v62 = vld [vmem:[#allocation8 + $0x5a4] ss:$48 sps:$4 sm:$0xff]   ;;  %v8214_v63 = vld [vmem:[#allocation8 + $0x5a0] ss:$48 sps:$4 sm:$0xff]   ;;  %v9423_v47 = vsub.s32 1, %v9275_v3  ;;  %v9426_v48 = vsub.s32 2, %v9275_v3 }
 0x11b   :  { %v714_v38 = vadd.f32 %v713_v32, %v712_v34  ;;  %3705 = vmatprep.subr.bf16.mxu0 %v8200_v53  ;;  %v8215_v1 = vld [vmem:[#allocation8 + $0xba4] ss:$48 sps:$4 sm:$0xff]   ;;  %v8217_v4 = vld [vmem:[#allocation8 + $0xba0] ss:$48 sps:$4 sm:$0xff]   ;;  %v9429_v49 = vsub.s32 3, %v9275_v3 }
 0x11c   :  { %706 = vadd.xlane.f32.xlu0 %v705_v36  ;;  %3747 = vmatpush1.bf16.msra.mxu1 %v8199_v52  ;;  %v8218_v6 = vld [vmem:[#allocation8 + $0x544] ss:$48 sps:$4 sm:$0xff]   ;;  %v8220_v7 = vld [vmem:[#allocation8 + $0x540] ss:$48 sps:$4 sm:$0xff]   ;;  %v865_v52 = vld [vmem:[#allocation7] sm:$0xf] }
 0x11d   :  { %715 = vadd.xlane.f32.xlu1 %v714_v38  ;;  %3748 = vmatprep.subr.bf16.mxu1 %v8203_v55  ;;  %v8221_v9 = vld [vmem:[#allocation8 + $0xb44] ss:$48 sps:$4 sm:$0xff]   ;;  %v8223_v12 = vld [vmem:[#allocation8 + $0xb40] ss:$48 sps:$4 sm:$0xff]   ;;  %v830_v55 = vrot.slane %v821_v45, %v9423_v47 }
 0x11e   :  { %3706 = vmatpush1.bf16.msra.mxu0 %v8202_v54  ;;  %v8224_v13 = vld [vmem:[#allocation8 + $0x4e4] ss:$48 sps:$4 sm:$0xff]   ;;  %v8226_v14 = vld [vmem:[#allocation8 + $0x4e0] ss:$48 sps:$4 sm:$0xff]   ;;  %v826_v54 = vrot.slane %v821_v45, %v9420_v46 }
 0x11f   :  { %3707 = vmatprep.subr.bf16.mxu0 %v8206_v57  ;;  %v8227_v15 = vld [vmem:[#allocation8 + $0xae4] ss:$48 sps:$4 sm:$0xff]   ;;  %v8229_v16 = vld [vmem:[#allocation8 + $0xae0] ss:$48 sps:$4 sm:$0xff]   ;;  %v838_v57 = vrot.slane %v821_v45, %v9429_v49 }
 0x120   :  { %3749 = vmatpush1.bf16.msra.mxu1 %v8205_v56  ;;  %v8230_v17 = vld [vmem:[#allocation8 + $0x484] ss:$48 sps:$4 sm:$0xff]   ;;  %v8232_v19 = vld [vmem:[#allocation8 + $0x480] ss:$48 sps:$4 sm:$0xff]   ;;  %v834_v56 = vrot.slane %v821_v45, %v9426_v48 }
 0x121   :  { %3750 = vmatprep.subr.bf16.mxu1 %v8209_v59  ;;  %v8233_v20 = vld [vmem:[#allocation8 + $0xa84] ss:$48 sps:$4 sm:$0xff]   ;;  %v8235_v21 = vld [vmem:[#allocation8 + $0xa80] ss:$48 sps:$4 sm:$0xff]   ;;  %v870_v59 = vrot.slane %v865_v52, %v9420_v46 }
 0x122   :  { %3708 = vmatpush1.bf16.msra.mxu0 %v8208_v58  ;;  %v8236_v22 = vld [vmem:[#allocation8 + $0x424] ss:$48 sps:$4 sm:$0xff]   ;;  %v8238_v23 = vld [vmem:[#allocation8 + $0x420] ss:$48 sps:$4 sm:$0xff]  }
 0x123   :  { %3709 = vmatprep.subr.bf16.mxu0 %v8212_v62  ;;  %v8239_v24 = vld [vmem:[#allocation8 + $0xa24] ss:$48 sps:$4 sm:$0xff]   ;;  %v8241_v26 = vld [vmem:[#allocation8 + $0xa20] ss:$48 sps:$4 sm:$0xff]  }
 0x124   :  { %3751 = vmatpush1.bf16.msra.mxu1 %v8211_v61  ;;  %v8242_v27 = vld [vmem:[#allocation8 + $0x3c4] ss:$48 sps:$4 sm:$0xff]   ;;  %v8244_v30 = vld [vmem:[#allocation8 + $0x3c0] ss:$48 sps:$4 sm:$0xff]   ;;  %v874_v61 = vrot.slane %v865_v52, %v9423_v47 }
 0x125   :  { %3752 = vmatprep.subr.bf16.mxu1 %v8215_v1  ;;  %v8245_v29 = vld [vmem:[#allocation8 + $0x9c4] ss:$48 sps:$4 sm:$0xff]   ;;  %v8247_v32 = vld [vmem:[#allocation8 + $0x9c0] ss:$48 sps:$4 sm:$0xff]   ;;  %v882_v1 = vrot.slane %v865_v52, %v9429_v49 }
 0x126   :  { %3710 = vmatpush2.bf16.msra.mxu0 %v8214_v63  ;;  %v8248_v31 = vld [vmem:[#allocation8 + $0x364] ss:$48 sps:$4 sm:$0xff]   ;;  %v8250_v34 = vld [vmem:[#allocation8 + $0x360] ss:$48 sps:$4 sm:$0xff]   ;;  %v878_v63 = vrot.slane %v865_v52, %v9426_v48 }
 0x127   :  { %3711 = vmatprep.subr.bf16.mxu0 %v8218_v6  ;;  %v8254_v35 = vld [vmem:[#allocation8 + $0x304] ss:$48 sps:$4 sm:$0xff]   ;;  %v8253_v36 = vld [vmem:[#allocation8 + $0x960] ss:$48 sps:$4 sm:$0xff]   ;;  %v839_v6 = vcombine.low %v826_v54, %v830_v55 }
 0x128   :  { %3753 = vmatpush2.bf16.msra.mxu1 %v8217_v4  ;;  %v8257_v37 = vld [vmem:[#allocation8 + $0x904] ss:$48 sps:$4 sm:$0xff]   ;;  %v8256_v38 = vld [vmem:[#allocation8 + $0x300] ss:$48 sps:$4 sm:$0xff]  }
 0x129   :  { %3754 = vmatprep.subr.bf16.mxu1 %v8221_v9  ;;  %v8259_v39 = vld [vmem:[#allocation8 + $0x900] ss:$48 sps:$4 sm:$0xff]  }
 0x12a   :  { %3712 = vmatpush2.bf16.msra.mxu0 %v8220_v7  ;;  %v840_v7 = vcombine.low %v834_v56, %v838_v57 }
 0x12b   :  { %3713 = vmatprep.subr.bf16.mxu0 %v8224_v13  ;;  %v883_v13 = vcombine.low %v870_v59, %v874_v61 }
 0x12c   :  { %3755 = vmatpush2.bf16.msra.mxu1 %v8223_v12 }
 0x12d   :  { %3756 = vmatprep.subr.bf16.mxu1 %v8227_v15 }
 0x12e   :  { %3714 = vmatpush2.bf16.msra.mxu0 %v8226_v14  ;;  %v884_v14 = vcombine.low %v878_v63, %v882_v1 }
 0x12f   :  { %3715 = vmatprep.subr.bf16.mxu0 %v8230_v17  ;;  %v854_v17 = vrot.slane %v840_v7, %v9278_v5 }
 0x130   :  { %3757 = vmatpush2.bf16.msra.mxu1 %v8229_v16  ;;  %v847_v16 = vrot.slane %v839_v6, %v9278_v5 }
 0x131   :  { %3758 = vmatprep.subr.bf16.mxu1 %v8233_v20 }
 0x132   :  { %3716 = vmatpush2.bf16.msra.mxu0 %v8232_v19 }
 0x133   :  { %3717 = vmatprep.subr.bf16.mxu0 %v8236_v22  ;;  %v898_v22 = vrot.slane %v884_v14, %v9278_v5 }
 0x134   :  { %3759 = vmatpush2.bf16.msra.mxu1 %v8235_v21  ;;  %v891_v21 = vrot.slane %v883_v13, %v9278_v5 }
 0x135   :  { %3760 = vmatprep.subr.bf16.mxu1 %v8239_v24 }
 0x136   :  { %3718 = vmatpush2.bf16.msra.mxu0 %v8238_v23 }
 0x137   :  { %3719 = vmatprep.subr.bf16.mxu0 %v8242_v27  ;;  %v9443_v27 = vcombine.low %v847_v16, %v854_v17 }
 0x138   :  { %3761 = vmatpush2.bf16.msra.mxu1 %v8241_v26 }
 0x139   :  { %3762 = vmatprep.subr.bf16.mxu1 %v8245_v29 }
 0x13a   :  { %3720 = vmatpush2.bf16.msra.mxu0 %v8244_v30 }
 0x13b   :  { %3721 = vmatprep.subr.bf16.mxu0 %v8248_v31  ;;  %v9446_v31 = vcombine.low %v891_v21, %v898_v22 }
 0x13c   :  { %3763 = vmatpush2.bf16.msra.mxu1 %v8247_v32 }
 0x13d   :  { %3764 = vmatprep.subr.bf16.mxu1 %v8251_v33 }
 0x13e   :  { %3722 = vmatpush2.bf16.msra.mxu0 %v8250_v34 }
 0x13f   :  { %3723 = vmatprep.subr.bf16.mxu0 %v8254_v35 }
 0x140   :  { %3765 = vmatpush2.bf16.msra.mxu1 %v8253_v36 }
 0x141   :  { %3766 = vmatprep.subr.bf16.mxu1 %v8257_v37 }
 0x142   :  { %3724 = vmatpush2.bf16.msra.mxu0 %v8256_v38 }
 0x143   :  { %3779 = vmatprep.subr.bf16.mxu0 %v8262_v41 }
 0x144   :  { %3767 = vmatpush2.bf16.msra.mxu1 %v8259_v39 }
 0x145   :  { %3822 = vmatprep.subr.bf16.mxu1 %v8265_v42 }
 0x18f   :  { %v653_v43 = vpop.xlane.xlu0 %652 }
 0x190   :  { %v717_v44 = vmul.f32 0.001953125, %v653_v43 }
 0x192   :  { %v725_v50 = vadd.f32 1e-05, %v717_v44 }
 0x193   :  { %v671_v51 = vpop.xlane.xlu0 %670 }
 0x194   :  { %8932 = vrsqrt.f32 %v725_v50  ;;  %v719_v53 = vmul.f32 0.001953125, %v671_v51 }
 0x196   :  { %v727_v58 = vadd.f32 1e-05, %v719_v53 }
 0x197   :  { %v662_v62 = vpop.xlane.xlu1 %661 }
 0x198   :  { %v718_v4 = vmul.f32 0.001953125, %v662_v62  ;;  %8934 = vrsqrt.f32 %v727_v58 }
 0x19a   :  { %v726_v9 = vadd.f32 1e-05, %v718_v4 }
 0x19b   :  { %v680_v12 = vpop.xlane.xlu1 %679 }
 0x19c   :  { %8936 = vrsqrt.f32 %v726_v9  ;;  %v720_v15 = vmul.f32 0.001953125, %v680_v12 }
 0x19e   :  { %v728_v19 = vadd.f32 1e-05, %v720_v15 }
 0x19f   :  { %v689_v20 = vpop.xlane.xlu0 %688 }
 0x1a0   :  { %8938 = vrsqrt.f32 %v728_v19  ;;  %v721_v23 = vmul.f32 0.001953125, %v689_v20  ;;  %v698_v26 = vpop.xlane.xlu1 %697 }
 0x1a1   :  { %v8933_v24 = vpop.eup %8932  ;;  %v722_v30 = vmul.f32 0.001953125, %v698_v26 }
 0x1a2   :  { %v755_v29 = vrot.slane %v8933_v24, %v9329_v60  ;;  %v729_v33 = vadd.f32 1e-05, %v721_v23 }
 0x1a3   :  { %v730_v35 = vadd.f32 1e-05, %v722_v30 }
 0x1a4   :  { %v813_v32 = vmul.f32 %v755_v29, %v9333_v8  ;;  %8940 = vrsqrt.f32 %v729_v33 }
 0x1a5   :  { %v8935_v34 = vpop.eup %8934  ;;  %v707_v36 = vpop.xlane.xlu0 %706  ;;  %8942 = vrsqrt.f32 %v730_v35 }
 0x1a6   :  { %v857_v37 = vmul.f32 %v9443_v27, %v813_v32  ;;  %v769_v38 = vrot.slane %v8935_v34, %v9329_v60  ;;  %v723_v39 = vmul.f32 0.001953125, %v707_v36  ;;  %v716_v41 = vpop.xlane.xlu1 %715 }
 0x1a7   :  { %v724_v42 = vmul.f32 0.001953125, %v716_v41 }
 0x1a8   :  { %v901_v43 = vadd.f32 %v9446_v31, %v857_v37  ;;  %v815_v44 = vmul.f32 %v769_v38, %v9335_v11  ;;  %v731_v45 = vadd.f32 1e-05, %v723_v39 }
 0x1a9   :  { %v8937_v50 = vpop.eup %8936  ;;  %v732_v8 = vadd.f32 1e-05, %v724_v42 }
 0x1aa   :  { %v917_v51 = vcombine.high %v901_v43, %v901_v43  ;;  %v924_v52 = vrot.slane %v901_v43, %v9278_v5  ;;  %v762_v53 = vrot.slane %v8937_v50, %v9329_v60  ;;  %v859_v54 = vmul.f32 %v9443_v27, %v815_v44 }
 0x1ab   :  { %8944 = vrsqrt.f32 %v731_v45 }
 0x1ac   :  { %v931_v55 = vrot.slane %v917_v51, %v9278_v5  ;;  %v932_v56 = vcombine.high %v924_v52, %v924_v52  ;;  %v1085_v57 = vpack.c.bf16 %v924_v52, %v924_v52  ;;  %v814_v58 = vmul.f32 %v762_v53, %v9342_v18 }
 0x1ad   :  { %v8939_v11 = vpop.eup %8938  ;;  %v903_v59 = vadd.f32 %v9446_v31, %v859_v54  ;;  %8946 = vrsqrt.f32 %v732_v8 }
 0x1ae   :  { %v933_v61 = vcombine.high %v931_v55, %v931_v55  ;;  %v1086_v62 = vpack.c.bf16 %v932_v56, %v932_v56  ;;  %v1087_v63 = vpack.c.bf16 %v931_v55, %v931_v55  ;;  %v9459_v1 = vunpack.c.l.b16 %v1085_v57 }
 0x1af   :  { %v858_v4 = vmul.f32 %v9443_v27, %v814_v58  ;;  %v951_v6 = vcombine.high %v903_v59, %v903_v59  ;;  %v958_v7 = vrot.slane %v903_v59, %v9278_v5  ;;  %v776_v9 = vrot.slane %v8939_v11, %v9329_v60 }
 0x1b0   :  { %v1088_v12 = vpack.c.bf16 %v933_v61, %v933_v61  ;;  %v9464_v13 = vunpack.c.l.b16 %v1086_v62  ;;  %v9466_v18 = vunpack.c.l.b16 %v1087_v63  ;;  %v1248_v14 = vrot.slane %v9459_v1, 1 }
 0x1b1   :  { %v902_v15 = vadd.f32 %v9446_v31, %v858_v4  ;;  %v965_v16 = vrot.slane %v951_v6, %v9278_v5  ;;  %v966_v17 = vcombine.high %v958_v7, %v958_v7  ;;  %v1093_v19 = vpack.c.bf16 %v958_v7, %v958_v7  ;;  %v8941_v36 = vpop.eup %8940 }
 0x1b2   :  { %v9471_v20 = vunpack.c.l.b16 %v1088_v12  ;;  %v1262_v21 = vrot.slane %v9464_v13, 1  ;;  %v1276_v22 = vrot.slane %v9466_v18, 1  ;;  %v816_v23 = vmul.f32 %v776_v9, %v9349_v28  ;;  %v8943_v42 = vpop.eup %8942 }
 0x1b3   :  { %v934_v24 = vcombine.high %v902_v15, %v902_v15  ;;  %v941_v26 = vrot.slane %v902_v15, %v9278_v5  ;;  %v967_v29 = vcombine.high %v965_v16, %v965_v16  ;;  %v1094_v30 = vpack.c.bf16 %v966_v17, %v966_v17 }
 0x1b4   :  { %v1290_v32 = vrot.slane %v9471_v20, 1  ;;  %v1095_v33 = vpack.c.bf16 %v965_v16, %v965_v16  ;;  %v9478_v34 = vunpack.c.l.b16 %v1093_v19  ;;  %v860_v35 = vmul.f32 %v9443_v27, %v816_v23 }
 0x1b5   :  { %v948_v37 = vrot.slane %v934_v24, %v9278_v5  ;;  %v949_v38 = vcombine.high %v941_v26, %v941_v26  ;;  %v1089_v39 = vpack.c.bf16 %v941_v26, %v941_v26  ;;  %v1096_v41 = vpack.c.bf16 %v967_v29, %v967_v29 }
 0x1b6   :  { %v9482_v28 = vunpack.c.l.b16 %v1094_v30  ;;  %v9484_v43 = vunpack.c.l.b16 %v1095_v33  ;;  %v1184_v44 = vrot.slane %v9478_v34, 6  ;;  %v1250_v45 = vrot.slane %v9478_v34, 7 }
 0x1b7   :  { %v950_v50 = vcombine.high %v948_v37, %v948_v37  ;;  %v1090_v8 = vpack.c.bf16 %v949_v38, %v949_v38  ;;  %v1091_v51 = vpack.c.bf16 %v948_v37, %v948_v37  ;;  %v9488_v52 = vunpack.c.l.b16 %v1089_v39 }
 0x1b8   :  { %v8945_v53 = vpop.eup %8944  ;;  %v9490_v54 = vunpack.c.l.b16 %v1096_v41  ;;  %v1204_v55 = vrot.slane %v9482_v28, 6  ;;  %v1264_v56 = vrot.slane %v9482_v28, 7  ;;  %v904_v57 = vadd.f32 %v9446_v31, %v860_v35 }
 0x1b9   :  { %v1092_v58 = vpack.c.bf16 %v950_v50, %v950_v50  ;;  %v1154_v11 = vunpack.c.l.b16 %v1090_v8  ;;  %v9495_v59 = vunpack.c.l.b16 %v1091_v51  ;;  %v1181_v61 = vrot.slane %v9488_v52, 7 }
 0x1ba   :  { %v8947_v62 = vpop.eup %8946  ;;  %v968_v63 = vcombine.high %v904_v57, %v904_v57  ;;  %v975_v4 = vrot.slane %v904_v57, %v9278_v5  ;;  %v783_v6 = vrot.slane %v8941_v36, %v9329_v60  ;;  %v790_v7 = vrot.slane %v8943_v42, %v9329_v60 }
 0x1bb   :  { %v9501_v9 = vunpack.c.l.b16 %v1092_v58  ;;  %v1202_v12 = vrot.slane %v1154_v11, 7  ;;  %v1216_v15 = vrot.slane %v9495_v59, 7  ;;  %v797_v16 = vrot.slane %v8945_v53, %v9329_v60 }
 0x1bc   :  { %v982_v17 = vrot.slane %v968_v63, %v9278_v5  ;;  %v983_v19 = vcombine.high %v975_v4, %v975_v4  ;;  %v1097_v23 = vpack.c.bf16 %v975_v4, %v975_v4  ;;  %v817_v24 = vmul.f32 %v783_v6, %v9359_v40 }
 0x1bd   :  { %v1230_v26 = vrot.slane %v9501_v9, 7  ;;  %v818_v29 = vmul.f32 %v790_v7, %v9371_v2  ;;  %v819_v30 = vmul.f32 %v797_v16, %v9374_v10  ;;  %v804_v33 = vrot.slane %v8947_v62, %v9329_v60 }
 0x1be   :  { %v984_v35 = vcombine.high %v982_v17, %v982_v17  ;;  %v1098_v36 = vpack.c.bf16 %v983_v19, %v983_v19  ;;  %v1099_v37 = vpack.c.bf16 %v982_v17, %v982_v17  ;;  %v9511_v38 = vunpack.c.l.b16 %v1097_v23 }
 0x1bf   :  { %v861_v39 = vmul.f32 %v9443_v27, %v817_v24  ;;  %v862_v41 = vmul.f32 %v9443_v27, %v818_v29  ;;  %v863_v42 = vmul.f32 %v9443_v27, %v819_v30  ;;  %v820_v40 = vmul.f32 %v804_v33, %v9386_v25 }
 0x1c0   :  { %v1100_v50 = vpack.c.bf16 %v984_v35, %v984_v35  ;;  %v1162_v8 = vunpack.c.l.b16 %v1098_v36  ;;  %v9517_v2 = vunpack.c.l.b16 %v1099_v37  ;;  %v1203_v60 = vsel %vm1182_vm1, %v1202_v12, %v9464_v13 }
 0x1c1   :  { %v905_v10 = vadd.f32 %v9446_v31, %v861_v39  ;;  %v906_v51 = vadd.f32 %v9446_v31, %v862_v41  ;;  %v9524_v53 = vadd.f32 %v9446_v31, %v863_v42  ;;  %v864_v57 = vmul.f32 %v9443_v27, %v820_v40 }
 0x1c2   :  { %v9527_v58 = vunpack.c.l.b16 %v1100_v50  ;;  %v1205_v25 = vsel %vm1185_vm2, %v1204_v55, %v1203_v60  ;;  %v1206_v62 = vrot.slane %v1162_v8, 5  ;;  %v1263_v63 = vsel %vm1182_vm1, %v1154_v11, %v1262_v21 }
 0x1c3   :  { %v985_v4 = vcombine.high %v905_v10, %v905_v10  ;;  %v992_v6 = vrot.slane %v905_v10, %v9278_v5  ;;  %v1002_v7 = vcombine.high %v906_v51, %v906_v51  ;;  %v1009_v12 = vrot.slane %v906_v51, %v9278_v5 }
 0x1c4   :  { %v1019_v16 = vcombine.high %v9524_v53, %v9524_v53  ;;  %v1026_v27 = vrot.slane %v9524_v53, %v9278_v5  ;;  %v9540_v17 = vadd.f32 %v9446_v31, %v864_v57  ;;  %v1207_v13 = vsel %vm1188_vm3, %v1206_v62, %v1205_v25 }
 0x1c5   :  { %v9544_v21 = vrot.slane %v985_v4, %v9278_v5  ;;  %v1000_v55 = vcombine.high %v992_v6, %v992_v6  ;;  %v1101_v11 = vpack.c.bf16 %v992_v6, %v992_v6  ;;  %v9547_v19 = vrot.slane %v1002_v7, %v9278_v5 }
 0x1c6   :  { %v1036_v23 = vcombine.high %v9540_v17, %v9540_v17  ;;  %v1017_v24 = vcombine.high %v1009_v12, %v1009_v12  ;;  %v1034_v29 = vcombine.high %v1026_v27, %v1026_v27  ;;  %v1043_v31 = vrot.slane %v9540_v17, %v9278_v5 }
 0x1c7   :  { %v1102_v30 = vpack.c.bf16 %v1000_v55, %v1000_v55  ;;  %v1165_v33 = vunpack.c.l.b16 %v1101_v11  ;;  %v1265_v35 = vsel %vm1185_vm2, %v1264_v56, %v1263_v63  ;;  %v1266_v36 = vrot.slane %v1162_v8, 6 }
 0x1c8   :  { %v1051_v37 = vcombine.high %v1043_v31, %v1043_v31  ;;  %v1106_v39 = vpack.c.bf16 %v1017_v24, %v1017_v24  ;;  %v1110_v41 = vpack.c.bf16 %v1034_v29, %v1034_v29  ;;  %v1105_v42 = vpack.c.bf16 %v1009_v12, %v1009_v12 }
 0x1c9   :  { %v1166_v40 = vunpack.c.l.b16 %v1102_v30  ;;  %v1267_v50 = vsel %vm1188_vm3, %v1266_v36, %v1265_v35  ;;  %v1109_v60 = vpack.c.bf16 %v1026_v27, %v1026_v27  ;;  %v1113_v10 = vpack.c.bf16 %v1043_v31, %v1043_v31 }
 0x1ca   :  { %v1114_v51 = vpack.c.bf16 %v1051_v37, %v1051_v37  ;;  %v1170_v57 = vunpack.c.l.b16 %v1106_v39  ;;  %v1174_v25 = vunpack.c.l.b16 %v1110_v41  ;;  %v1169_v62 = vunpack.c.l.b16 %v1105_v42 }
 0x1cb   :  { %v1208_v4 = vrot.slane %v1166_v40, 4  ;;  %v1268_v6 = vrot.slane %v1166_v40, 5  ;;  %v1173_v28 = vunpack.c.l.b16 %v1109_v60  ;;  %v1177_v7 = vunpack.c.l.b16 %v1113_v10 }
 0x1cc   :  { %v1178_v56 = vunpack.c.l.b16 %v1114_v51  ;;  %v1210_v8 = vrot.slane %v1170_v57, 3  ;;  %v1212_v63 = vrot.slane %v1174_v25, 2  ;;  %v1270_v55 = vrot.slane %v1170_v57, 4 }
 0x1cd   :  { %v1209_v12 = vsel %vm1191_vm4, %v1208_v4, %v1207_v13  ;;  %v1269_v11 = vsel %vm1191_vm4, %v1268_v6, %v1267_v50  ;;  %v1272_v24 = vrot.slane %v1174_v25, 3  ;;  %v1183_v27 = vsel %vm1182_vm1, %v1181_v61, %v9459_v1 }
 0x1ce   :  { %v1211_v29 = vsel %vm1194_vm5, %v1210_v8, %v1209_v12  ;;  %v1214_v31 = vrot.slane %v1178_v56, 1  ;;  %v1271_v30 = vsel %vm1194_vm5, %v1270_v55, %v1269_v11  ;;  %v1274_v35 = vrot.slane %v1178_v56, 2 }
 0x1cf   :  { %v1213_v36 = vsel %vm1197_vm6, %v1212_v63, %v1211_v29  ;;  %v1273_v37 = vsel %vm1197_vm6, %v1272_v24, %v1271_v30  ;;  %v1186_v13 = vsel %vm1185_vm2, %v1184_v44, %v1183_v27  ;;  %v1187_v39 = vrot.slane %v9511_v38, 5 }
 0x1d0   :  { %v1215_v41 = vsel %vm1200_vm7, %v1214_v31, %v1213_v36  ;;  %v1275_v61 = vsel %vm1200_vm7, %v1274_v35, %v1273_v37  ;;  %v1190_v42 = vrot.slane %v1165_v33, 4  ;;  %v1193_v40 = vrot.slane %v1169_v62, 3 }
 0x1d1   :  { %v1245_v50 = vpack.c.b16 %v1215_v41, %v1215_v41  ;;  %v1305_v60 = vpack.c.b16 %v1275_v61, %v1275_v61  ;;  %v1189_v10 = vsel %vm1188_vm3, %v1187_v39, %v1186_v13  ;;  %v1196_v51 = vrot.slane %v1173_v28, 2  ;;  %v8268_v41 = vld [vmem:[#allocation8 + $0x24c] ss:$48 sps:$4 sm:$0xff]  }
 0x1d2   :  { %v1192_v57 = vsel %vm1191_vm4, %v1190_v42, %v1189_v10  ;;  %v1199_v25 = vrot.slane %v1177_v7, 1  ;;  %v1249_v44 = vsel %vm1182_vm1, %v9488_v52, %v1248_v14  ;;  %v1252_v4 = vrot.slane %v9511_v38, 6 }
 0x1d3   :  { %v9581_v6 = vsel %vm1308_vm8, %v1245_v50, %v1305_v60  ;;  %v1195_v56 = vsel %vm1194_vm5, %v1193_v40, %v1192_v57  ;;  %v1251_v8 = vsel %vm1185_vm2, %v1250_v45, %v1249_v44  ;;  %v1254_v63 = vrot.slane %v1165_v33, 5  ;;  %v8266_v44 = vld [vmem:[#allocation8 + $0x248] ss:$48 sps:$4 sm:$0xff]  }
 0x1d4   :  { %3725 = vmatprep.mubr.bf16.mxu0 %v9581_v6  ;;  %v1198_v55 = vsel %vm1197_vm6, %v1196_v51, %v1195_v56  ;;  %v1253_v1 = vsel %vm1188_vm3, %v1252_v4, %v1251_v8  ;;  %v1256_v12 = vrot.slane %v1169_v62, 4  ;;  %v1258_v14 = vrot.slane %v1173_v28, 3 }
 0x1d5   :  { %v1201_v52 = vsel %vm1200_vm7, %v1199_v25, %v1198_v55  ;;  %v1255_v38 = vsel %vm1191_vm4, %v1254_v63, %v1253_v1  ;;  %v1260_v11 = vrot.slane %v1177_v7, 2  ;;  %v1001_v24 = vcombine.high %v9544_v21, %v9544_v21  ;;  %v8274_v55 = vld [vmem:[#allocation8 + $0x1ec] ss:$48 sps:$4 sm:$0xff]  }
 0x1d6   :  { %v1244_v34 = vpack.c.b16 %v1201_v52, %v1201_v52  ;;  %v1257_v45 = vsel %vm1194_vm5, %v1256_v12, %v1255_v38  ;;  %v1018_v33 = vcombine.high %v9547_v19, %v9547_v19  ;;  %v1033_v62 = vrot.slane %v1019_v16, %v9278_v5  ;;  %v8260_v16 = vld [vmem:[#allocation8 + $0x2a8] ss:$48 sps:$4 sm:$0xff]  }
 0x1d7   :  { %v1259_v28 = vsel %vm1197_vm6, %v1258_v14, %v1257_v45  ;;  %v1050_v7 = vrot.slane %v1036_v23, %v9278_v5  ;;  %v1104_v27 = vpack.c.bf16 %v1001_v24, %v1001_v24  ;;  %v1231_v29 = vsel %vm1182_vm1, %v1230_v26, %v9471_v20 }
 0x1d8   :  { %v1261_v31 = vsel %vm1200_vm7, %v1260_v11, %v1259_v28  ;;  %v1035_v30 = vcombine.high %v1033_v62, %v1033_v62  ;;  %v1108_v35 = vpack.c.bf16 %v1018_v33, %v1018_v33  ;;  %v1232_v53 = vrot.slane %v9490_v54, 6  ;;  %v8272_v28 = vld [vmem:[#allocation8 + $0x1e8] ss:$48 sps:$4 sm:$0xff]  }
 0x1d9   :  { %v1304_v36 = vpack.c.b16 %v1261_v31, %v1261_v31  ;;  %v1052_v37 = vcombine.high %v1050_v7, %v1050_v7  ;;  %v1168_v13 = vunpack.c.l.b16 %v1104_v27  ;;  %v1234_v39 = vrot.slane %v9527_v58, 5 }
 0x1da   :  { %v1112_v17 = vpack.c.bf16 %v1035_v30, %v1035_v30  ;;  %v1172_v5 = vunpack.c.l.b16 %v1108_v35  ;;  %v1233_v23 = vsel %vm1185_vm2, %v1232_v53, %v1231_v29  ;;  %v1291_v26 = vsel %vm1182_vm1, %v9501_v9, %v1290_v32  ;;  %v8280_v30 = vld [vmem:[#allocation8 + $0x18c] ss:$48 sps:$4 sm:$0xff]  }
 0x1db   :  { %v9619_v61 = vsel %vm1308_vm8, %v1244_v34, %v1304_v36  ;;  %v1116_v42 = vpack.c.bf16 %v1052_v37, %v1052_v37  ;;  %v1235_v40 = vsel %vm1188_vm3, %v1234_v39, %v1233_v23  ;;  %v1236_v50 = vrot.slane %v1168_v13, 4  ;;  %v8278_v23 = vld [vmem:[#allocation8 + $0x188] ss:$48 sps:$4 sm:$0xff]  }
 0x1dc   :  { %3726 = vmatmul.mubr.bf16.vlgmr.msra.gmra.mxu0 %v9619_v61  ;;  %v1176_v60 = vunpack.c.l.b16 %v1112_v17  ;;  %v1238_v10 = vrot.slane %v1172_v5, 3  ;;  %v1292_v51 = vrot.slane %v9490_v54, 7  ;;  %v1294_v57 = vrot.slane %v9527_v58, 6 }
 0x1dd   :  { %3780 = vmatpush1.bf16.msra.mxu0 %v8260_v16  ;;  %v1180_v20 = vunpack.c.l.b16 %v1116_v42  ;;  %v1237_v32 = vsel %vm1191_vm4, %v1236_v50, %v1235_v40  ;;  %v1296_v9 = vrot.slane %v1168_v13, 5  ;;  %v1298_v25 = vrot.slane %v1172_v5, 4  ;;  %3811 = vmatprep.mubr.bf16.mxu0 %v9581_v6  ;;  %v8286_v40 = vld [vmem:[#allocation8 + $0x12c] ss:$48 sps:$4 sm:$0xff]  }
 0x1de   :  { %v1239_v4 = vsel %vm1194_vm5, %v1238_v10, %v1237_v32  ;;  %v1240_v56 = vrot.slane %v1176_v60, 2  ;;  %v1293_v8 = vsel %vm1185_vm2, %v1292_v51, %v1291_v26  ;;  %v1300_v63 = vrot.slane %v1176_v60, 3  ;;  %3781 = vmatprep.subr.bf16.mxu0 %v8268_v41 }
 0x1df   :  { %v1242_v54 = vrot.slane %v1180_v20, 1  ;;  %v1295_v58 = vsel %vm1188_vm3, %v1294_v57, %v1293_v8  ;;  %v1302_v1 = vrot.slane %v1180_v20, 2  ;;  %v1103_v12 = vpack.c.bf16 %v9544_v21, %v9544_v21  ;;  %v8290_v8 = vld [vmem:[#allocation8 + $0xc8] ss:$48 sps:$4 sm:$0xff]  }
 0x1e0   :  { %v1241_v14 = vsel %vm1197_vm6, %v1240_v56, %v1239_v4  ;;  %v1297_v52 = vsel %vm1191_vm4, %v1296_v9, %v1295_v58  ;;  %v1107_v38 = vpack.c.bf16 %v9547_v19, %v9547_v19  ;;  %v1111_v11 = vpack.c.bf16 %v1033_v62, %v1033_v62  ;;  %v8292_v9 = vld [vmem:[#allocation8 + $0xcc] ss:$48 sps:$4 sm:$0xff]  }
 0x1e1   :  { %v1243_v24 = vsel %vm1200_vm7, %v1242_v54, %v1241_v14  ;;  %v1299_v34 = vsel %vm1194_vm5, %v1298_v25, %v1297_v52  ;;  %v1115_v45 = vpack.c.bf16 %v1050_v7, %v1050_v7  ;;  %v1167_v33 = vunpack.c.l.b16 %v1103_v12  ;;  %3782 = vmatpush1.bf16.msra.mxu0 %v8266_v44  ;;  %v8271_v54 = vld [vmem:[#allocation8 + $0x84c] ss:$48 sps:$4 sm:$0xff]   ;;  %v8296_v12 = vld [vmem:[#allocation8 + $0x68] ss:$48 sps:$4 sm:$0xff]  }
 0x1e2   :  { %v1247_v27 = vpack.c.b16 %v1243_v24, %v1243_v24  ;;  %v1301_v29 = vsel %vm1197_vm6, %v1300_v63, %v1299_v34  ;;  %v1171_v21 = vunpack.c.l.b16 %v1107_v38  ;;  %v1175_v31 = vunpack.c.l.b16 %v1111_v11  ;;  %3783 = vmatprep.subr.bf16.mxu0 %v8274_v55  ;;  %v8263_v63 = vld [vmem:[#allocation8 + $0x8a8] ss:$48 sps:$4 sm:$0xff]   ;;  %v8298_v58 = vld [vmem:[#allocation8 + $0x6c] ss:$48 sps:$4 sm:$0xff]  }
 0x1e3   :  { %v1303_v35 = vsel %vm1200_vm7, %v1302_v1, %v1301_v29  ;;  %v1179_v53 = vunpack.c.l.b16 %v1115_v45  ;;  %v1217_v19 = vsel %vm1182_vm1, %v1216_v15, %v9466_v18  ;;  %v1218_v62 = vrot.slane %v9484_v43, 6  ;;  %v8269_v14 = vld [vmem:[#allocation8 + $0x848] ss:$48 sps:$4 sm:$0xff]   ;;  %v8304_v52 = vld [vmem:[#allocation8 + $0xc] ss:$48 sps:$4 sm:$0xff]  }
 0x1e4   :  { %v1307_v7 = vpack.c.b16 %v1303_v35, %v1303_v35  ;;  %v1220_v16 = vrot.slane %v9517_v2, 5  ;;  %v1222_v36 = vrot.slane %v1167_v33, 4  ;;  %v1224_v37 = vrot.slane %v1171_v21, 3  ;;  %v8277_v38 = vld [vmem:[#allocation8 + $0x7ec] ss:$48 sps:$4 sm:$0xff]  }
 0x1e5   :  { %v1219_v13 = vsel %vm1185_vm2, %v1218_v62, %v1217_v19  ;;  %v1226_v39 = vrot.slane %v1175_v31, 2  ;;  %v1228_v17 = vrot.slane %v1179_v53, 1  ;;  %v1277_v5 = vsel %vm1182_vm1, %v9495_v59, %v1276_v22  ;;  %3784 = vmatpush1.bf16.msra.mxu0 %v8272_v28  ;;  %v8302_v11 = vld [vmem:[#allocation8 + $0x8] ss:$48 sps:$4 sm:$0xff]   ;;  %v8310_v34 = vld [vmem:[#allocation8 + $0x5ac] ss:$48 sps:$4 sm:$0xff]  }
 0x1e6   :  { %v9652_v15 = vsel %vm1308_vm8, %v1247_v27, %v1307_v7  ;;  %v1221_v26 = vsel %vm1188_vm3, %v1220_v16, %v1219_v13  ;;  %v1278_v41 = vrot.slane %v9484_v43, 7  ;;  %v1280_v42 = vrot.slane %v9517_v2, 6  ;;  %3785 = vmatprep.subr.bf16.mxu0 %v8280_v30  ;;  %v8284_v2 = vld [vmem:[#allocation8 + $0x128] ss:$48 sps:$4 sm:$0xff]   ;;  %v8283_v45 = vld [vmem:[#allocation8 + $0x78c] ss:$48 sps:$4 sm:$0xff]  }
 0x1e7   :  { %3768 = vmatprep.mubr.bf16.mxu1 %v9652_v15  ;;  %v1223_v18 = vsel %vm1191_vm4, %v1222_v36, %v1221_v26  ;;  %v1282_v50 = vrot.slane %v1167_v33, 5  ;;  %v1284_v60 = vrot.slane %v1171_v21, 4  ;;  %v1286_v10 = vrot.slane %v1175_v31, 3  ;;  %v8275_v24 = vld [vmem:[#allocation8 + $0x7e8] ss:$48 sps:$4 sm:$0xff]  }
 0x1e8   :  { %v1225_v22 = vsel %vm1194_vm5, %v1224_v37, %v1223_v18  ;;  %v1279_v59 = vsel %vm1185_vm2, %v1278_v41, %v1277_v5  ;;  %v1288_v43 = vrot.slane %v1179_v53, 2  ;;  %v8308_v33 = vld [vmem:[#allocation8 + $0x5a8] ss:$48 sps:$4 sm:$0xff]   ;;  %v8316_v27 = vld [vmem:[#allocation8 + $0x54c] ss:$48 sps:$4 sm:$0xff]  }
 0x1e9   :  { %v1227_v51 = vsel %vm1197_vm6, %v1226_v39, %v1225_v22  ;;  %v1281_v57 = vsel %vm1188_vm3, %v1280_v42, %v1279_v59  ;;  %3786 = vmatpush1.bf16.msra.mxu0 %v8278_v23  ;;  %v8281_v28 = vld [vmem:[#allocation8 + $0x788] ss:$48 sps:$4 sm:$0xff]   ;;  %v8289_v29 = vld [vmem:[#allocation8 + $0x72c] ss:$48 sps:$4 sm:$0xff]  }
 0x1ea   :  { %v1229_v20 = vsel %vm1200_vm7, %v1228_v17, %v1227_v51  ;;  %v1283_v32 = vsel %vm1191_vm4, %v1282_v50, %v1281_v57  ;;  %3787 = vmatprep.subr.bf16.mxu0 %v8286_v40  ;;  %v8314_v21 = vld [vmem:[#allocation8 + $0x548] ss:$48 sps:$4 sm:$0xff]   ;;  %v8322_v30 = vld [vmem:[#allocation8 + $0x4ec] ss:$48 sps:$4 sm:$0xff]   ;;  %v8358_v51 = vld [vmem:[#allocation8 + $0x2b4] ss:$48 sps:$4 sm:$0xff]  }
 0x1eb   :  { %v1285_v25 = vsel %vm1194_vm5, %v1284_v60, %v1283_v32  ;;  %v1246_v44 = vpack.c.b16 %v1229_v20, %v1229_v20  ;;  %v8287_v31 = vld [vmem:[#allocation8 + $0x728] ss:$48 sps:$4 sm:$0xff]   ;;  %v8295_v35 = vld [vmem:[#allocation8 + $0x6cc] ss:$48 sps:$4 sm:$0xff]   ;;  %v8364_v20 = vld [vmem:[#allocation8 + $0x254] ss:$48 sps:$4 sm:$0xff]  }
 0x1ec   :  { %v1287_v4 = vsel %vm1197_vm6, %v1286_v10, %v1285_v25  ;;  %v8320_v53 = vld [vmem:[#allocation8 + $0x4e8] ss:$48 sps:$4 sm:$0xff]   ;;  %v8328_v62 = vld [vmem:[#allocation8 + $0x48c] ss:$48 sps:$4 sm:$0xff]  }
 0x1ed   :  { %v1289_v56 = vsel %vm1200_vm7, %v1288_v43, %v1287_v4  ;;  %3788 = vmatpush1.bf16.msra.mxu0 %v8284_v2  ;;  %v8293_v19 = vld [vmem:[#allocation8 + $0x6c8] ss:$48 sps:$4 sm:$0xff]   ;;  %v8301_v7 = vld [vmem:[#allocation8 + $0x66c] ss:$48 sps:$4 sm:$0xff]   ;;  %v8356_v43 = vld [vmem:[#allocation8 + $0x2b0] ss:$48 sps:$4 sm:$0xff]  }
 0x1ee   :  { %v1306_v55 = vpack.c.b16 %v1289_v56, %v1289_v56  ;;  %3789 = vmatprep.subr.bf16.mxu0 %v8292_v9  ;;  %v8326_v16 = vld [vmem:[#allocation8 + $0x488] ss:$48 sps:$4 sm:$0xff]   ;;  %v8334_v37 = vld [vmem:[#allocation8 + $0x42c] ss:$48 sps:$4 sm:$0xff]   ;;  %v8362_v9 = vld [vmem:[#allocation8 + $0x250] ss:$48 sps:$4 sm:$0xff]  }
 0x1ef   :  { %v8299_v36 = vld [vmem:[#allocation8 + $0x668] ss:$48 sps:$4 sm:$0xff]   ;;  %v8307_v13 = vld [vmem:[#allocation8 + $0x60c] ss:$48 sps:$4 sm:$0xff]   ;;  %v8368_v56 = vld [vmem:[#allocation8 + $0x1f0] ss:$48 sps:$4 sm:$0xff]  }
 0x1f0   :  { %v9669_v1 = vsel %vm1308_vm8, %v1246_v44, %v1306_v55  ;;  %v8332_v39 = vld [vmem:[#allocation8 + $0x428] ss:$48 sps:$4 sm:$0xff]   ;;  %v8340_v5 = vld [vmem:[#allocation8 + $0x3cc] ss:$48 sps:$4 sm:$0xff]   ;;  %v8370_v44 = vld [vmem:[#allocation8 + $0x1f4] ss:$48 sps:$4 sm:$0xff]  }
 0x1f1   :  { %3769 = vmatmul.mubr.bf16.vlgmr.msra.gmra.mxu1 %v9669_v1  ;;  %3790 = vmatpush1.bf16.msra.mxu0 %v8290_v8  ;;  %v8305_v17 = vld [vmem:[#allocation8 + $0x608] ss:$48 sps:$4 sm:$0xff]   ;;  %v8313_v23 = vld [vmem:[#allocation8 + $0xbac] ss:$48 sps:$4 sm:$0xff]  }
 0x1f2   :  { %3823 = vmatpush1.bf16.msra.mxu1 %v8263_v63  ;;  %3854 = vmatprep.mubr.bf16.mxu1 %v9652_v15  ;;  %v8338_v26 = vld [vmem:[#allocation8 + $0x3c8] ss:$48 sps:$4 sm:$0xff]   ;;  %v8346_v42 = vld [vmem:[#allocation8 + $0x36c] ss:$48 sps:$4 sm:$0xff]   ;;  %v8376_v63 = vld [vmem:[#allocation8 + $0x194] ss:$48 sps:$4 sm:$0xff]  }
 0x1f3   :  { %3824 = vmatprep.subr.bf16.mxu1 %v8271_v54  ;;  %3791 = vmatprep.subr.bf16.mxu0 %v8298_v58  ;;  %v8311_v41 = vld [vmem:[#allocation8 + $0xba8] ss:$48 sps:$4 sm:$0xff]   ;;  %v8319_v40 = vld [vmem:[#allocation8 + $0xb4c] ss:$48 sps:$4 sm:$0xff]   ;;  %v8374_v54 = vld [vmem:[#allocation8 + $0x190] ss:$48 sps:$4 sm:$0xff]  }
 0x1f4   :  { %v8344_v18 = vld [vmem:[#allocation8 + $0x368] ss:$48 sps:$4 sm:$0xff]   ;;  %v8352_v60 = vld [vmem:[#allocation8 + $0x30c] ss:$48 sps:$4 sm:$0xff]  }
 0x1f5   :  { %3792 = vmatpush1.bf16.msra.mxu0 %v8296_v12  ;;  %v8317_v50 = vld [vmem:[#allocation8 + $0xb48] ss:$48 sps:$4 sm:$0xff]   ;;  %v8325_v22 = vld [vmem:[#allocation8 + $0xaec] ss:$48 sps:$4 sm:$0xff]   ;;  %v8382_v12 = vld [vmem:[#allocation8 + $0x134] ss:$48 sps:$4 sm:$0xff]  }
 0x1f6   :  { %3825 = vmatpush1.bf16.msra.mxu1 %v8269_v14  ;;  %3793 = vmatprep.subr.bf16.mxu0 %v8304_v52  ;;  %v8350_v59 = vld [vmem:[#allocation8 + $0x308] ss:$48 sps:$4 sm:$0xff]   ;;  %v8331_v57 = vld [vmem:[#allocation8 + $0xa8c] ss:$48 sps:$4 sm:$0xff]   ;;  %v8380_v52 = vld [vmem:[#allocation8 + $0x130] ss:$48 sps:$4 sm:$0xff]  }
 0x1f7   :  { %3826 = vmatprep.subr.bf16.mxu1 %v8277_v38  ;;  %v8323_v10 = vld [vmem:[#allocation8 + $0xae8] ss:$48 sps:$4 sm:$0xff]   ;;  %v8337_v32 = vld [vmem:[#allocation8 + $0xa2c] ss:$48 sps:$4 sm:$0xff]  }
 0x1f8   :  { %v8329_v2 = vld [vmem:[#allocation8 + $0xa88] ss:$48 sps:$4 sm:$0xff]   ;;  %v8343_v4 = vld [vmem:[#allocation8 + $0x9cc] ss:$48 sps:$4 sm:$0xff]  }
 0x1f9   :  { %3794 = vmatpush1.bf16.msra.mxu0 %v8302_v11  ;;  %v8335_v25 = vld [vmem:[#allocation8 + $0xa28] ss:$48 sps:$4 sm:$0xff]   ;;  %v8349_v55 = vld [vmem:[#allocation8 + $0x96c] ss:$48 sps:$4 sm:$0xff]   ;;  %v8388_v11 = vld [vmem:[#allocation8 + $0xd4] ss:$48 sps:$4 sm:$0xff]  }
 0x1fa   :  { %3827 = vmatpush1.bf16.msra.mxu1 %v8275_v24  ;;  %3795 = vmatprep.subr.bf16.mxu0 %v8310_v34  ;;  %v8341_v8 = vld [vmem:[#allocation8 + $0x9c8] ss:$48 sps:$4 sm:$0xff]   ;;  %v8355_v14 = vld [vmem:[#allocation8 + $0x90c] ss:$48 sps:$4 sm:$0xff]   ;;  %v8361_v24 = vld [vmem:[#allocation8 + $0x8b4] ss:$48 sps:$4 sm:$0xff]  }
 0x1fb   :  { %3828 = vmatprep.subr.bf16.mxu1 %v8283_v45  ;;  %v8347_v58 = vld [vmem:[#allocation8 + $0x968] ss:$48 sps:$4 sm:$0xff]   ;;  %v8386_v34 = vld [vmem:[#allocation8 + $0xd0] ss:$48 sps:$4 sm:$0xff]  }
 0x1fc   :  { %v8353_v38 = vld [vmem:[#allocation8 + $0x908] ss:$48 sps:$4 sm:$0xff]   ;;  %v8359_v45 = vld [vmem:[#allocation8 + $0x8b0] ss:$48 sps:$4 sm:$0xff]  }
 0x1fd   :  { %3796 = vmatpush2.bf16.msra.mxu0 %v8308_v33  ;;  %v8367_v33 = vld [vmem:[#allocation8 + $0x854] ss:$48 sps:$4 sm:$0xff]  }
 0x1fe   :  { %3829 = vmatpush1.bf16.msra.mxu1 %v8281_v28  ;;  %3797 = vmatprep.subr.bf16.mxu0 %v8316_v27  ;;  %v8394_v28 = vld [vmem:[#allocation8 + $0x74] ss:$48 sps:$4 sm:$0xff]   ;;  %v8392_v27 = vld [vmem:[#allocation8 + $0x70] ss:$48 sps:$4 sm:$0xff]  }
 0x1ff   :  { %3830 = vmatprep.subr.bf16.mxu1 %v8289_v29  ;;  %v8365_v29 = vld [vmem:[#allocation8 + $0x850] ss:$48 sps:$4 sm:$0xff]  }
 0x201   :  { %3798 = vmatpush2.bf16.msra.mxu0 %v8314_v21  ;;  %v8400_v21 = vld [vmem:[#allocation8 + $0x14] ss:$48 sps:$4 sm:$0xff]  }
 0x202   :  { %3831 = vmatpush1.bf16.msra.mxu1 %v8287_v31  ;;  %3799 = vmatprep.subr.bf16.mxu0 %v8322_v30  ;;  %v8373_v31 = vld [vmem:[#allocation8 + $0x7f4] ss:$48 sps:$4 sm:$0xff]   ;;  %v8398_v30 = vld [vmem:[#allocation8 + $0x10] ss:$48 sps:$4 sm:$0xff]  }
 0x203   :  { %3832 = vmatprep.subr.bf16.mxu1 %v8295_v35  ;;  %v8371_v35 = vld [vmem:[#allocation8 + $0x7f0] ss:$48 sps:$4 sm:$0xff]  }
 0x205   :  { %3800 = vmatpush2.bf16.msra.mxu0 %v8320_v53  ;;  %v8406_v53 = vld [vmem:[#allocation8 + $0x5b4] ss:$48 sps:$4 sm:$0xff]  }
 0x206   :  { %3833 = vmatpush1.bf16.msra.mxu1 %v8293_v19  ;;  %3801 = vmatprep.subr.bf16.mxu0 %v8328_v62  ;;  %v8379_v19 = vld [vmem:[#allocation8 + $0x794] ss:$48 sps:$4 sm:$0xff]   ;;  %v8404_v62 = vld [vmem:[#allocation8 + $0x5b0] ss:$48 sps:$4 sm:$0xff]  }
 0x207   :  { %3834 = vmatprep.subr.bf16.mxu1 %v8301_v7  ;;  %v8377_v7 = vld [vmem:[#allocation8 + $0x790] ss:$48 sps:$4 sm:$0xff]  }
 0x209   :  { %3802 = vmatpush2.bf16.msra.mxu0 %v8326_v16  ;;  %v8412_v16 = vld [vmem:[#allocation8 + $0x554] ss:$48 sps:$4 sm:$0xff]  }
 0x20a   :  { %3835 = vmatpush1.bf16.msra.mxu1 %v8299_v36  ;;  %3803 = vmatprep.subr.bf16.mxu0 %v8334_v37  ;;  %v8385_v36 = vld [vmem:[#allocation8 + $0x734] ss:$48 sps:$4 sm:$0xff]   ;;  %v8410_v37 = vld [vmem:[#allocation8 + $0x550] ss:$48 sps:$4 sm:$0xff]  }
 0x20b   :  { %3836 = vmatprep.subr.bf16.mxu1 %v8307_v13  ;;  %v8383_v13 = vld [vmem:[#allocation8 + $0x730] ss:$48 sps:$4 sm:$0xff]  }
 0x20d   :  { %3804 = vmatpush2.bf16.msra.mxu0 %v8332_v39  ;;  %v8418_v39 = vld [vmem:[#allocation8 + $0x4f4] ss:$48 sps:$4 sm:$0xff]  }
 0x20e   :  { %3837 = vmatpush1.bf16.msra.mxu1 %v8305_v17  ;;  %3805 = vmatprep.subr.bf16.mxu0 %v8340_v5  ;;  %v8391_v17 = vld [vmem:[#allocation8 + $0x6d4] ss:$48 sps:$4 sm:$0xff]   ;;  %v8416_v5 = vld [vmem:[#allocation8 + $0x4f0] ss:$48 sps:$4 sm:$0xff]  }
 0x20f   :  { %3838 = vmatprep.subr.bf16.mxu1 %v8313_v23  ;;  %v8389_v23 = vld [vmem:[#allocation8 + $0x6d0] ss:$48 sps:$4 sm:$0xff]  }
 0x211   :  { %3806 = vmatpush2.bf16.msra.mxu0 %v8338_v26  ;;  %v8424_v26 = vld [vmem:[#allocation8 + $0x494] ss:$48 sps:$4 sm:$0xff]  }
 0x212   :  { %3839 = vmatpush2.bf16.msra.mxu1 %v8311_v41  ;;  %3807 = vmatprep.subr.bf16.mxu0 %v8346_v42  ;;  %v8397_v41 = vld [vmem:[#allocation8 + $0x674] ss:$48 sps:$4 sm:$0xff]   ;;  %v8422_v42 = vld [vmem:[#allocation8 + $0x490] ss:$48 sps:$4 sm:$0xff]  }
 0x213   :  { %3840 = vmatprep.subr.bf16.mxu1 %v8319_v40  ;;  %v8395_v40 = vld [vmem:[#allocation8 + $0x670] ss:$48 sps:$4 sm:$0xff]  }
 0x215   :  { %3808 = vmatpush2.bf16.msra.mxu0 %v8344_v18  ;;  %v8430_v18 = vld [vmem:[#allocation8 + $0x434] ss:$48 sps:$4 sm:$0xff]  }
 0x216   :  { %3841 = vmatpush2.bf16.msra.mxu1 %v8317_v50  ;;  %3809 = vmatprep.subr.bf16.mxu0 %v8352_v60  ;;  %v8403_v50 = vld [vmem:[#allocation8 + $0x614] ss:$48 sps:$4 sm:$0xff]   ;;  %v8428_v60 = vld [vmem:[#allocation8 + $0x430] ss:$48 sps:$4 sm:$0xff]  }
 0x217   :  { %3842 = vmatprep.subr.bf16.mxu1 %v8325_v22  ;;  %v8401_v22 = vld [vmem:[#allocation8 + $0x610] ss:$48 sps:$4 sm:$0xff]  }
 0x219   :  { %3810 = vmatpush2.bf16.msra.mxu0 %v8350_v59  ;;  %v8436_v59 = vld [vmem:[#allocation8 + $0x3d4] ss:$48 sps:$4 sm:$0xff]  }
 0x21a   :  { %3843 = vmatpush2.bf16.msra.mxu1 %v8323_v10  ;;  %3865 = vmatprep.subr.bf16.mxu0 %v8358_v51  ;;  %v8409_v10 = vld [vmem:[#allocation8 + $0xbb4] ss:$48 sps:$4 sm:$0xff]   ;;  %v8434_v51 = vld [vmem:[#allocation8 + $0x3d0] ss:$48 sps:$4 sm:$0xff]  }
 0x21b   :  { %3844 = vmatprep.subr.bf16.mxu1 %v8331_v57  ;;  %v8407_v57 = vld [vmem:[#allocation8 + $0xbb0] ss:$48 sps:$4 sm:$0xff]  }
 0x21c   :  { %3812 = vmatmul.mubr.bf16.vlgmr.msra.gmra.mxu0 %v9619_v61 }
 0x21d   :  { %3866 = vmatpush1.bf16.msra.mxu0 %v8356_v43  ;;  %3897 = vmatprep.mubr.bf16.mxu0 %v9581_v6  ;;  %v8442_v43 = vld [vmem:[#allocation8 + $0x374] ss:$48 sps:$4 sm:$0xff]  }
 0x21e   :  { %3845 = vmatpush2.bf16.msra.mxu1 %v8329_v2  ;;  %3867 = vmatprep.subr.bf16.mxu0 %v8364_v20  ;;  %v8415_v2 = vld [vmem:[#allocation8 + $0xb54] ss:$48 sps:$4 sm:$0xff]   ;;  %v8440_v20 = vld [vmem:[#allocation8 + $0x370] ss:$48 sps:$4 sm:$0xff]  }
 0x21f   :  { %3846 = vmatprep.subr.bf16.mxu1 %v8337_v32  ;;  %v8413_v32 = vld [vmem:[#allocation8 + $0xb50] ss:$48 sps:$4 sm:$0xff]  }
 0x221   :  { %3868 = vmatpush1.bf16.msra.mxu0 %v8362_v9  ;;  %v8448_v9 = vld [vmem:[#allocation8 + $0x314] ss:$48 sps:$4 sm:$0xff]  }
 0x222   :  { %3847 = vmatpush2.bf16.msra.mxu1 %v8335_v25  ;;  %3869 = vmatprep.subr.bf16.mxu0 %v8370_v44  ;;  %v8421_v25 = vld [vmem:[#allocation8 + $0xaf4] ss:$48 sps:$4 sm:$0xff]   ;;  %v8446_v44 = vld [vmem:[#allocation8 + $0x310] ss:$48 sps:$4 sm:$0xff]  }
 0x223   :  { %3848 = vmatprep.subr.bf16.mxu1 %v8343_v4  ;;  %v8419_v4 = vld [vmem:[#allocation8 + $0xaf0] ss:$48 sps:$4 sm:$0xff]  }
 0x225   :  { %3870 = vmatpush1.bf16.msra.mxu0 %v8368_v56  ;;  %v8454_v56 = vld [vmem:[#allocation8 + $0x2bc] ss:$48 sps:$4 sm:$0xff]  }
 0x226   :  { %3849 = vmatpush2.bf16.msra.mxu1 %v8341_v8  ;;  %3871 = vmatprep.subr.bf16.mxu0 %v8376_v63  ;;  %v8427_v8 = vld [vmem:[#allocation8 + $0xa94] ss:$48 sps:$4 sm:$0xff]   ;;  %v8452_v63 = vld [vmem:[#allocation8 + $0x2b8] ss:$48 sps:$4 sm:$0xff]  }
 0x227   :  { %3850 = vmatprep.subr.bf16.mxu1 %v8349_v55  ;;  %v8425_v55 = vld [vmem:[#allocation8 + $0xa90] ss:$48 sps:$4 sm:$0xff]  }
 0x229   :  { %3872 = vmatpush1.bf16.msra.mxu0 %v8374_v54  ;;  %v8460_v54 = vld [vmem:[#allocation8 + $0x25c] ss:$48 sps:$4 sm:$0xff]  }
 0x22a   :  { %3851 = vmatpush2.bf16.msra.mxu1 %v8347_v58  ;;  %3873 = vmatprep.subr.bf16.mxu0 %v8382_v12  ;;  %v8433_v58 = vld [vmem:[#allocation8 + $0xa34] ss:$48 sps:$4 sm:$0xff]   ;;  %v8458_v12 = vld [vmem:[#allocation8 + $0x258] ss:$48 sps:$4 sm:$0xff]  }
 0x22b   :  { %3852 = vmatprep.subr.bf16.mxu1 %v8355_v14  ;;  %v8431_v14 = vld [vmem:[#allocation8 + $0xa30] ss:$48 sps:$4 sm:$0xff]  }
 0x22d   :  { %3874 = vmatpush1.bf16.msra.mxu0 %v8380_v52  ;;  %v8466_v52 = vld [vmem:[#allocation8 + $0x1fc] ss:$48 sps:$4 sm:$0xff]  }
 0x22e   :  { %3853 = vmatpush2.bf16.msra.mxu1 %v8353_v38  ;;  %3875 = vmatprep.subr.bf16.mxu0 %v8388_v11  ;;  %v8439_v38 = vld [vmem:[#allocation8 + $0x9d4] ss:$48 sps:$4 sm:$0xff]   ;;  %v8464_v11 = vld [vmem:[#allocation8 + $0x1f8] ss:$48 sps:$4 sm:$0xff]  }
 0x22f   :  { %3908 = vmatprep.subr.bf16.mxu1 %v8361_v24  ;;  %v8437_v24 = vld [vmem:[#allocation8 + $0x9d0] ss:$48 sps:$4 sm:$0xff]  }
 0x231   :  { %3855 = vmatmul.mubr.bf16.vlgmr.msra.gmra.mxu1 %v9669_v1  ;;  %3876 = vmatpush1.bf16.msra.mxu0 %v8386_v34  ;;  %v8472_v34 = vld [vmem:[#allocation8 + $0x19c] ss:$48 sps:$4 sm:$0xff]  }
 0x232   :  { %3909 = vmatpush1.bf16.msra.mxu1 %v8359_v45  ;;  %3940 = vmatprep.mubr.bf16.mxu1 %v9652_v15  ;;  %v8445_v45 = vld [vmem:[#allocation8 + $0x974] ss:$48 sps:$4 sm:$0xff]  }
 0x233   :  { %3910 = vmatprep.subr.bf16.mxu1 %v8367_v33  ;;  %3877 = vmatprep.subr.bf16.mxu0 %v8394_v28  ;;  %v8470_v33 = vld [vmem:[#allocation8 + $0x198] ss:$48 sps:$4 sm:$0xff]   ;;  %v8443_v28 = vld [vmem:[#allocation8 + $0x970] ss:$48 sps:$4 sm:$0xff]  }
 0x235   :  { %3878 = vmatpush1.bf16.msra.mxu0 %v8392_v27  ;;  %v8478_v27 = vld [vmem:[#allocation8 + $0x13c] ss:$48 sps:$4 sm:$0xff]  }
 0x236   :  { %3911 = vmatpush1.bf16.msra.mxu1 %v8365_v29  ;;  %3879 = vmatprep.subr.bf16.mxu0 %v8400_v21  ;;  %v8451_v29 = vld [vmem:[#allocation8 + $0x914] ss:$48 sps:$4 sm:$0xff]   ;;  %v8476_v21 = vld [vmem:[#allocation8 + $0x138] ss:$48 sps:$4 sm:$0xff]  }
 0x237   :  { %3912 = vmatprep.subr.bf16.mxu1 %v8373_v31  ;;  %v8449_v31 = vld [vmem:[#allocation8 + $0x910] ss:$48 sps:$4 sm:$0xff]  }
 0x239   :  { %3880 = vmatpush1.bf16.msra.mxu0 %v8398_v30  ;;  %v8484_v30 = vld [vmem:[#allocation8 + $0xdc] ss:$48 sps:$4 sm:$0xff]  }
 0x23a   :  { %3913 = vmatpush1.bf16.msra.mxu1 %v8371_v35  ;;  %3881 = vmatprep.subr.bf16.mxu0 %v8406_v53  ;;  %v8457_v35 = vld [vmem:[#allocation8 + $0x8bc] ss:$48 sps:$4 sm:$0xff]   ;;  %v8482_v53 = vld [vmem:[#allocation8 + $0xd8] ss:$48 sps:$4 sm:$0xff]  }
 0x23b   :  { %3914 = vmatprep.subr.bf16.mxu1 %v8379_v19  ;;  %v8455_v19 = vld [vmem:[#allocation8 + $0x8b8] ss:$48 sps:$4 sm:$0xff]  }
 0x23d   :  { %3882 = vmatpush2.bf16.msra.mxu0 %v8404_v62  ;;  %v8463_v62 = vld [vmem:[#allocation8 + $0x85c] ss:$48 sps:$4 sm:$0xff]  }
 0x23e   :  { %3915 = vmatpush1.bf16.msra.mxu1 %v8377_v7  ;;  %3883 = vmatprep.subr.bf16.mxu0 %v8412_v16  ;;  %v8490_v7 = vld [vmem:[#allocation8 + $0x7c] ss:$48 sps:$4 sm:$0xff]   ;;  %v8488_v16 = vld [vmem:[#allocation8 + $0x78] ss:$48 sps:$4 sm:$0xff]  }
 0x23f   :  { %3916 = vmatprep.subr.bf16.mxu1 %v8385_v36  ;;  %v8461_v36 = vld [vmem:[#allocation8 + $0x858] ss:$48 sps:$4 sm:$0xff]  }
 0x241   :  { %3884 = vmatpush2.bf16.msra.mxu0 %v8410_v37  ;;  %v8496_v37 = vld [vmem:[#allocation8 + $0x1c] ss:$48 sps:$4 sm:$0xff]  }
 0x242   :  { %3917 = vmatpush1.bf16.msra.mxu1 %v8383_v13  ;;  %3885 = vmatprep.subr.bf16.mxu0 %v8418_v39  ;;  %v8469_v13 = vld [vmem:[#allocation8 + $0x7fc] ss:$48 sps:$4 sm:$0xff]   ;;  %v8494_v39 = vld [vmem:[#allocation8 + $0x18] ss:$48 sps:$4 sm:$0xff]  }
 0x243   :  { %3918 = vmatprep.subr.bf16.mxu1 %v8391_v17  ;;  %v8467_v17 = vld [vmem:[#allocation8 + $0x7f8] ss:$48 sps:$4 sm:$0xff]  }
 0x245   :  { %3886 = vmatpush2.bf16.msra.mxu0 %v8416_v5  ;;  %v8502_v5 = vld [vmem:[#allocation8 + $0x5bc] ss:$48 sps:$4 sm:$0xff]  }
 0x246   :  { %3919 = vmatpush1.bf16.msra.mxu1 %v8389_v23  ;;  %3887 = vmatprep.subr.bf16.mxu0 %v8424_v26  ;;  %v8475_v23 = vld [vmem:[#allocation8 + $0x79c] ss:$48 sps:$4 sm:$0xff]   ;;  %v8500_v26 = vld [vmem:[#allocation8 + $0x5b8] ss:$48 sps:$4 sm:$0xff]  }
 0x247   :  { %3920 = vmatprep.subr.bf16.mxu1 %v8397_v41  ;;  %v8473_v41 = vld [vmem:[#allocation8 + $0x798] ss:$48 sps:$4 sm:$0xff]  }
 0x249   :  { %3888 = vmatpush2.bf16.msra.mxu0 %v8422_v42  ;;  %v8508_v42 = vld [vmem:[#allocation8 + $0x55c] ss:$48 sps:$4 sm:$0xff]  }
 0x24a   :  { %3921 = vmatpush1.bf16.msra.mxu1 %v8395_v40  ;;  %3889 = vmatprep.subr.bf16.mxu0 %v8430_v18  ;;  %v8481_v40 = vld [vmem:[#allocation8 + $0x73c] ss:$48 sps:$4 sm:$0xff]   ;;  %v8506_v18 = vld [vmem:[#allocation8 + $0x558] ss:$48 sps:$4 sm:$0xff]  }
 0x24b   :  { %3922 = vmatprep.subr.bf16.mxu1 %v8403_v50  ;;  %v8479_v50 = vld [vmem:[#allocation8 + $0x738] ss:$48 sps:$4 sm:$0xff]  }
 0x24d   :  { %3890 = vmatpush2.bf16.msra.mxu0 %v8428_v60  ;;  %v8514_v60 = vld [vmem:[#allocation8 + $0x4fc] ss:$48 sps:$4 sm:$0xff]  }
 0x24e   :  { %3923 = vmatpush1.bf16.msra.mxu1 %v8401_v22  ;;  %3891 = vmatprep.subr.bf16.mxu0 %v8436_v59  ;;  %v8487_v22 = vld [vmem:[#allocation8 + $0x6dc] ss:$48 sps:$4 sm:$0xff]   ;;  %v8512_v59 = vld [vmem:[#allocation8 + $0x4f8] ss:$48 sps:$4 sm:$0xff]  }
 0x24f   :  { %3924 = vmatprep.subr.bf16.mxu1 %v8409_v10  ;;  %v8485_v10 = vld [vmem:[#allocation8 + $0x6d8] ss:$48 sps:$4 sm:$0xff]  }
 0x251   :  { %3892 = vmatpush2.bf16.msra.mxu0 %v8434_v51  ;;  %v8520_v51 = vld [vmem:[#allocation8 + $0x49c] ss:$48 sps:$4 sm:$0xff]  }
 0x252   :  { %3925 = vmatpush2.bf16.msra.mxu1 %v8407_v57  ;;  %3893 = vmatprep.subr.bf16.mxu0 %v8442_v43  ;;  %v8493_v57 = vld [vmem:[#allocation8 + $0x67c] ss:$48 sps:$4 sm:$0xff]   ;;  %v8518_v43 = vld [vmem:[#allocation8 + $0x498] ss:$48 sps:$4 sm:$0xff]  }
 0x253   :  { %3926 = vmatprep.subr.bf16.mxu1 %v8415_v2  ;;  %v8491_v2 = vld [vmem:[#allocation8 + $0x678] ss:$48 sps:$4 sm:$0xff]  }
 0x255   :  { %3894 = vmatpush2.bf16.msra.mxu0 %v8440_v20  ;;  %v8526_v20 = vld [vmem:[#allocation8 + $0x43c] ss:$48 sps:$4 sm:$0xff]  }
 0x256   :  { %3927 = vmatpush2.bf16.msra.mxu1 %v8413_v32  ;;  %3895 = vmatprep.subr.bf16.mxu0 %v8448_v9  ;;  %v8499_v32 = vld [vmem:[#allocation8 + $0x61c] ss:$48 sps:$4 sm:$0xff]   ;;  %v8524_v9 = vld [vmem:[#allocation8 + $0x438] ss:$48 sps:$4 sm:$0xff]  }
 0x257   :  { %3928 = vmatprep.subr.bf16.mxu1 %v8421_v25  ;;  %v8497_v25 = vld [vmem:[#allocation8 + $0x618] ss:$48 sps:$4 sm:$0xff]  }
 0x259   :  { %3896 = vmatpush2.bf16.msra.mxu0 %v8446_v44  ;;  %v8532_v44 = vld [vmem:[#allocation8 + $0x3dc] ss:$48 sps:$4 sm:$0xff]  }
 0x25a   :  { %3929 = vmatpush2.bf16.msra.mxu1 %v8419_v4  ;;  %3951 = vmatprep.subr.bf16.mxu0 %v8454_v56  ;;  %v8505_v4 = vld [vmem:[#allocation8 + $0xbbc] ss:$48 sps:$4 sm:$0xff]   ;;  %v8530_v56 = vld [vmem:[#allocation8 + $0x3d8] ss:$48 sps:$4 sm:$0xff]  }
 0x25b   :  { %3930 = vmatprep.subr.bf16.mxu1 %v8427_v8  ;;  %v8503_v8 = vld [vmem:[#allocation8 + $0xbb8] ss:$48 sps:$4 sm:$0xff]  }
 0x25c   :  { %3898 = vmatmul.mubr.bf16.vlgmr.msra.gmra.mxu0 %v9619_v61 }
 0x25d   :  { %3952 = vmatpush1.bf16.msra.mxu0 %v8452_v63  ;;  %3983 = vmatprep.mubr.bf16.mxu0 %v9581_v6  ;;  %v8538_v63 = vld [vmem:[#allocation8 + $0x37c] ss:$48 sps:$4 sm:$0xff]  }
 0x25e   :  { %3931 = vmatpush2.bf16.msra.mxu1 %v8425_v55  ;;  %3953 = vmatprep.subr.bf16.mxu0 %v8460_v54  ;;  %v8511_v55 = vld [vmem:[#allocation8 + $0xb5c] ss:$48 sps:$4 sm:$0xff]   ;;  %v8536_v54 = vld [vmem:[#allocation8 + $0x378] ss:$48 sps:$4 sm:$0xff]  }
 0x25f   :  { %3932 = vmatprep.subr.bf16.mxu1 %v8433_v58  ;;  %v8509_v58 = vld [vmem:[#allocation8 + $0xb58] ss:$48 sps:$4 sm:$0xff]  }
 0x261   :  { %3954 = vmatpush1.bf16.msra.mxu0 %v8458_v12  ;;  %v8544_v12 = vld [vmem:[#allocation8 + $0x31c] ss:$48 sps:$4 sm:$0xff]  }
 0x262   :  { %3933 = vmatpush2.bf16.msra.mxu1 %v8431_v14  ;;  %3955 = vmatprep.subr.bf16.mxu0 %v8466_v52  ;;  %v8517_v14 = vld [vmem:[#allocation8 + $0xafc] ss:$48 sps:$4 sm:$0xff]   ;;  %v8542_v52 = vld [vmem:[#allocation8 + $0x318] ss:$48 sps:$4 sm:$0xff]  }
 0x263   :  { %3934 = vmatprep.subr.bf16.mxu1 %v8439_v38  ;;  %v8515_v38 = vld [vmem:[#allocation8 + $0xaf8] ss:$48 sps:$4 sm:$0xff]  }
 0x265   :  { %3956 = vmatpush1.bf16.msra.mxu0 %v8464_v11  ;;  %v8550_v11 = vld [vmem:[#allocation8 + $0x2c4] ss:$48 sps:$4 sm:$0xff]  }
 0x266   :  { %3935 = vmatpush2.bf16.msra.mxu1 %v8437_v24  ;;  %3957 = vmatprep.subr.bf16.mxu0 %v8472_v34  ;;  %v8523_v24 = vld [vmem:[#allocation8 + $0xa9c] ss:$48 sps:$4 sm:$0xff]   ;;  %v8548_v34 = vld [vmem:[#allocation8 + $0x2c0] ss:$48 sps:$4 sm:$0xff]  }
 0x267   :  { %3936 = vmatprep.subr.bf16.mxu1 %v8445_v45  ;;  %v8521_v45 = vld [vmem:[#allocation8 + $0xa98] ss:$48 sps:$4 sm:$0xff]  }
 0x269   :  { %3958 = vmatpush1.bf16.msra.mxu0 %v8470_v33  ;;  %v8556_v33 = vld [vmem:[#allocation8 + $0x264] ss:$48 sps:$4 sm:$0xff]  }
 0x26a   :  { %3937 = vmatpush2.bf16.msra.mxu1 %v8443_v28  ;;  %3959 = vmatprep.subr.bf16.mxu0 %v8478_v27  ;;  %v8529_v28 = vld [vmem:[#allocation8 + $0xa3c] ss:$48 sps:$4 sm:$0xff]   ;;  %v8554_v27 = vld [vmem:[#allocation8 + $0x260] ss:$48 sps:$4 sm:$0xff]  }
 0x26b   :  { %3938 = vmatprep.subr.bf16.mxu1 %v8451_v29  ;;  %v8527_v29 = vld [vmem:[#allocation8 + $0xa38] ss:$48 sps:$4 sm:$0xff]  }
 0x26d   :  { %3960 = vmatpush1.bf16.msra.mxu0 %v8476_v21  ;;  %v8562_v21 = vld [vmem:[#allocation8 + $0x204] ss:$48 sps:$4 sm:$0xff]  }
 0x26e   :  { %3939 = vmatpush2.bf16.msra.mxu1 %v8449_v31  ;;  %3961 = vmatprep.subr.bf16.mxu0 %v8484_v30  ;;  %v8535_v31 = vld [vmem:[#allocation8 + $0x9dc] ss:$48 sps:$4 sm:$0xff]   ;;  %v8560_v30 = vld [vmem:[#allocation8 + $0x200] ss:$48 sps:$4 sm:$0xff]  }
 0x26f   :  { %3994 = vmatprep.subr.bf16.mxu1 %v8457_v35  ;;  %v8533_v35 = vld [vmem:[#allocation8 + $0x9d8] ss:$48 sps:$4 sm:$0xff]  }
 0x271   :  { %3941 = vmatmul.mubr.bf16.vlgmr.msra.gmra.mxu1 %v9669_v1  ;;  %3962 = vmatpush1.bf16.msra.mxu0 %v8482_v53  ;;  %v8568_v53 = vld [vmem:[#allocation8 + $0x1a4] ss:$48 sps:$4 sm:$0xff]  }
 0x272   :  { %3995 = vmatpush1.bf16.msra.mxu1 %v8455_v19  ;;  %4026 = vmatprep.mubr.bf16.mxu1 %v9652_v15  ;;  %v8541_v19 = vld [vmem:[#allocation8 + $0x97c] ss:$48 sps:$4 sm:$0xff]  }
 0x273   :  { %3996 = vmatprep.subr.bf16.mxu1 %v8463_v62  ;;  %3963 = vmatprep.subr.bf16.mxu0 %v8490_v7  ;;  %v8566_v62 = vld [vmem:[#allocation8 + $0x1a0] ss:$48 sps:$4 sm:$0xff]   ;;  %v8539_v7 = vld [vmem:[#allocation8 + $0x978] ss:$48 sps:$4 sm:$0xff]  }
 0x275   :  { %3964 = vmatpush1.bf16.msra.mxu0 %v8488_v16  ;;  %v8574_v16 = vld [vmem:[#allocation8 + $0x144] ss:$48 sps:$4 sm:$0xff]  }
 0x276   :  { %3997 = vmatpush1.bf16.msra.mxu1 %v8461_v36  ;;  %3965 = vmatprep.subr.bf16.mxu0 %v8496_v37  ;;  %v8547_v36 = vld [vmem:[#allocation8 + $0x91c] ss:$48 sps:$4 sm:$0xff]   ;;  %v8572_v37 = vld [vmem:[#allocation8 + $0x140] ss:$48 sps:$4 sm:$0xff]  }
 0x277   :  { %3998 = vmatprep.subr.bf16.mxu1 %v8469_v13  ;;  %v8545_v13 = vld [vmem:[#allocation8 + $0x918] ss:$48 sps:$4 sm:$0xff]  }
 0x279   :  { %3966 = vmatpush1.bf16.msra.mxu0 %v8494_v39  ;;  %v8580_v39 = vld [vmem:[#allocation8 + $0xe4] ss:$48 sps:$4 sm:$0xff]  }
 0x27a   :  { %3999 = vmatpush1.bf16.msra.mxu1 %v8467_v17  ;;  %3967 = vmatprep.subr.bf16.mxu0 %v8502_v5  ;;  %v8553_v17 = vld [vmem:[#allocation8 + $0x8c4] ss:$48 sps:$4 sm:$0xff]   ;;  %v8578_v5 = vld [vmem:[#allocation8 + $0xe0] ss:$48 sps:$4 sm:$0xff]  }
 0x27b   :  { %4000 = vmatprep.subr.bf16.mxu1 %v8475_v23  ;;  %v8551_v23 = vld [vmem:[#allocation8 + $0x8c0] ss:$48 sps:$4 sm:$0xff]  }
 0x27d   :  { %3968 = vmatpush2.bf16.msra.mxu0 %v8500_v26  ;;  %v8559_v26 = vld [vmem:[#allocation8 + $0x864] ss:$48 sps:$4 sm:$0xff]  }
 0x27e   :  { %4001 = vmatpush1.bf16.msra.mxu1 %v8473_v41  ;;  %3969 = vmatprep.subr.bf16.mxu0 %v8508_v42  ;;  %v8586_v41 = vld [vmem:[#allocation8 + $0x84] ss:$48 sps:$4 sm:$0xff]   ;;  %v8584_v42 = vld [vmem:[#allocation8 + $0x80] ss:$48 sps:$4 sm:$0xff]  }
 0x27f   :  { %4002 = vmatprep.subr.bf16.mxu1 %v8481_v40  ;;  %v8557_v40 = vld [vmem:[#allocation8 + $0x860] ss:$48 sps:$4 sm:$0xff]  }
 0x281   :  { %3970 = vmatpush2.bf16.msra.mxu0 %v8506_v18  ;;  %v8592_v18 = vld [vmem:[#allocation8 + $0x24] ss:$48 sps:$4 sm:$0xff]  }
 0x282   :  { %4003 = vmatpush1.bf16.msra.mxu1 %v8479_v50  ;;  %3971 = vmatprep.subr.bf16.mxu0 %v8514_v60  ;;  %v8565_v50 = vld [vmem:[#allocation8 + $0x804] ss:$48 sps:$4 sm:$0xff]   ;;  %v8590_v60 = vld [vmem:[#allocation8 + $0x20] ss:$48 sps:$4 sm:$0xff]  }
 0x283   :  { %4004 = vmatprep.subr.bf16.mxu1 %v8487_v22  ;;  %v8563_v22 = vld [vmem:[#allocation8 + $0x800] ss:$48 sps:$4 sm:$0xff]  }
 0x285   :  { %3972 = vmatpush2.bf16.msra.mxu0 %v8512_v59  ;;  %v8598_v59 = vld [vmem:[#allocation8 + $0x5c4] ss:$48 sps:$4 sm:$0xff]  }
 0x286   :  { %4005 = vmatpush1.bf16.msra.mxu1 %v8485_v10  ;;  %3973 = vmatprep.subr.bf16.mxu0 %v8520_v51  ;;  %v8571_v10 = vld [vmem:[#allocation8 + $0x7a4] ss:$48 sps:$4 sm:$0xff]   ;;  %v8596_v51 = vld [vmem:[#allocation8 + $0x5c0] ss:$48 sps:$4 sm:$0xff]  }
 0x287   :  { %4006 = vmatprep.subr.bf16.mxu1 %v8493_v57  ;;  %v8569_v57 = vld [vmem:[#allocation8 + $0x7a0] ss:$48 sps:$4 sm:$0xff]  }
 0x289   :  { %3974 = vmatpush2.bf16.msra.mxu0 %v8518_v43  ;;  %v8604_v43 = vld [vmem:[#allocation8 + $0x564] ss:$48 sps:$4 sm:$0xff]  }
 0x28a   :  { %4007 = vmatpush1.bf16.msra.mxu1 %v8491_v2  ;;  %3975 = vmatprep.subr.bf16.mxu0 %v8526_v20  ;;  %v8577_v2 = vld [vmem:[#allocation8 + $0x744] ss:$48 sps:$4 sm:$0xff]   ;;  %v8602_v20 = vld [vmem:[#allocation8 + $0x560] ss:$48 sps:$4 sm:$0xff]  }
 0x28b   :  { %4008 = vmatprep.subr.bf16.mxu1 %v8499_v32  ;;  %v8575_v32 = vld [vmem:[#allocation8 + $0x740] ss:$48 sps:$4 sm:$0xff]  }
 0x28d   :  { %3976 = vmatpush2.bf16.msra.mxu0 %v8524_v9  ;;  %v8610_v9 = vld [vmem:[#allocation8 + $0x504] ss:$48 sps:$4 sm:$0xff]  }
 0x28e   :  { %4009 = vmatpush1.bf16.msra.mxu1 %v8497_v25  ;;  %3977 = vmatprep.subr.bf16.mxu0 %v8532_v44  ;;  %v8583_v25 = vld [vmem:[#allocation8 + $0x6e4] ss:$48 sps:$4 sm:$0xff]   ;;  %v8608_v44 = vld [vmem:[#allocation8 + $0x500] ss:$48 sps:$4 sm:$0xff]  }
 0x28f   :  { %4010 = vmatprep.subr.bf16.mxu1 %v8505_v4  ;;  %v8581_v4 = vld [vmem:[#allocation8 + $0x6e0] ss:$48 sps:$4 sm:$0xff]  }
 0x291   :  { %3978 = vmatpush2.bf16.msra.mxu0 %v8530_v56  ;;  %v8616_v56 = vld [vmem:[#allocation8 + $0x4a4] ss:$48 sps:$4 sm:$0xff]  }
 0x292   :  { %4011 = vmatpush2.bf16.msra.mxu1 %v8503_v8  ;;  %3979 = vmatprep.subr.bf16.mxu0 %v8538_v63  ;;  %v8589_v8 = vld [vmem:[#allocation8 + $0x684] ss:$48 sps:$4 sm:$0xff]   ;;  %v8614_v63 = vld [vmem:[#allocation8 + $0x4a0] ss:$48 sps:$4 sm:$0xff]  }
 0x293   :  { %4012 = vmatprep.subr.bf16.mxu1 %v8511_v55  ;;  %v8587_v55 = vld [vmem:[#allocation8 + $0x680] ss:$48 sps:$4 sm:$0xff]  }
 0x295   :  { %3980 = vmatpush2.bf16.msra.mxu0 %v8536_v54  ;;  %v8622_v54 = vld [vmem:[#allocation8 + $0x444] ss:$48 sps:$4 sm:$0xff]  }
 0x296   :  { %4013 = vmatpush2.bf16.msra.mxu1 %v8509_v58  ;;  %3981 = vmatprep.subr.bf16.mxu0 %v8544_v12  ;;  %v8595_v58 = vld [vmem:[#allocation8 + $0x624] ss:$48 sps:$4 sm:$0xff]   ;;  %v8620_v12 = vld [vmem:[#allocation8 + $0x440] ss:$48 sps:$4 sm:$0xff]  }
 0x297   :  { %4014 = vmatprep.subr.bf16.mxu1 %v8517_v14  ;;  %v8593_v14 = vld [vmem:[#allocation8 + $0x620] ss:$48 sps:$4 sm:$0xff]  }
 0x299   :  { %3982 = vmatpush2.bf16.msra.mxu0 %v8542_v52  ;;  %v8628_v52 = vld [vmem:[#allocation8 + $0x3e4] ss:$48 sps:$4 sm:$0xff]  }
 0x29a   :  { %4015 = vmatpush2.bf16.msra.mxu1 %v8515_v38  ;;  %4037 = vmatprep.subr.bf16.mxu0 %v8550_v11  ;;  %v8601_v38 = vld [vmem:[#allocation8 + $0xbc4] ss:$48 sps:$4 sm:$0xff]   ;;  %v8626_v11 = vld [vmem:[#allocation8 + $0x3e0] ss:$48 sps:$4 sm:$0xff]  }
 0x29b   :  { %4016 = vmatprep.subr.bf16.mxu1 %v8523_v24  ;;  %v8599_v24 = vld [vmem:[#allocation8 + $0xbc0] ss:$48 sps:$4 sm:$0xff]  }
 0x29c   :  { %3984 = vmatmul.mubr.bf16.vlgmr.msra.gmra.mxu0 %v9619_v61 }
 0x29d   :  { %4038 = vmatpush1.bf16.msra.mxu0 %v8548_v34  ;;  %4069 = vmatprep.mubr.bf16.mxu0 %v9581_v6  ;;  %v8634_v34 = vld [vmem:[#allocation8 + $0x384] ss:$48 sps:$4 sm:$0xff]  }
 0x29e   :  { %4017 = vmatpush2.bf16.msra.mxu1 %v8521_v45  ;;  %4039 = vmatprep.subr.bf16.mxu0 %v8556_v33  ;;  %v8607_v45 = vld [vmem:[#allocation8 + $0xb64] ss:$48 sps:$4 sm:$0xff]   ;;  %v8632_v33 = vld [vmem:[#allocation8 + $0x380] ss:$48 sps:$4 sm:$0xff]  }
 0x29f   :  { %4018 = vmatprep.subr.bf16.mxu1 %v8529_v28  ;;  %v8605_v28 = vld [vmem:[#allocation8 + $0xb60] ss:$48 sps:$4 sm:$0xff]  }
 0x2a1   :  { %4040 = vmatpush1.bf16.msra.mxu0 %v8554_v27  ;;  %v8640_v27 = vld [vmem:[#allocation8 + $0x324] ss:$48 sps:$4 sm:$0xff]  }
 0x2a2   :  { %4019 = vmatpush2.bf16.msra.mxu1 %v8527_v29  ;;  %4041 = vmatprep.subr.bf16.mxu0 %v8562_v21  ;;  %v8613_v29 = vld [vmem:[#allocation8 + $0xb04] ss:$48 sps:$4 sm:$0xff]   ;;  %v8638_v21 = vld [vmem:[#allocation8 + $0x320] ss:$48 sps:$4 sm:$0xff]  }
 0x2a3   :  { %4020 = vmatprep.subr.bf16.mxu1 %v8535_v31  ;;  %v8611_v31 = vld [vmem:[#allocation8 + $0xb00] ss:$48 sps:$4 sm:$0xff]  }
 0x2a5   :  { %4042 = vmatpush1.bf16.msra.mxu0 %v8560_v30  ;;  %v8646_v30 = vld [vmem:[#allocation8 + $0x2cc] ss:$48 sps:$4 sm:$0xff]  }
 0x2a6   :  { %4021 = vmatpush2.bf16.msra.mxu1 %v8533_v35  ;;  %4043 = vmatprep.subr.bf16.mxu0 %v8568_v53  ;;  %v9685_v35 = vpop.f32.mrf.mxu0  ;;  %v8619_v53 = vld [vmem:[#allocation8 + $0xaa4] ss:$48 sps:$4 sm:$0xff]  }
 0x2a7   :  { %4022 = vmatprep.subr.bf16.mxu1 %v8541_v19  ;;  %v8644_v19 = vld [vmem:[#allocation8 + $0x2c8] ss:$48 sps:$4 sm:$0xff]  }
 0x2a9   :  { %4044 = vmatpush1.bf16.msra.mxu0 %v8566_v62  ;;  %v8617_v62 = vld [vmem:[#allocation8 + $0xaa0] ss:$48 sps:$4 sm:$0xff]  }
 0x2aa   :  { %4023 = vmatpush2.bf16.msra.mxu1 %v8539_v7  ;;  %4045 = vmatprep.subr.bf16.mxu0 %v8574_v16  ;;  %v8652_v7 = vld [vmem:[#allocation8 + $0x26c] ss:$48 sps:$4 sm:$0xff]   ;;  %v9687_v16 = vpop.f32.mrf.mxu0 }
 0x2ab   :  { %4024 = vmatprep.subr.bf16.mxu1 %v8547_v36  ;;  %v8625_v36 = vld [vmem:[#allocation8 + $0xa44] ss:$48 sps:$4 sm:$0xff]  }
 0x2ad   :  { %4046 = vmatpush1.bf16.msra.mxu0 %v8572_v37  ;;  %v8650_v37 = vld [vmem:[#allocation8 + $0x268] ss:$48 sps:$4 sm:$0xff]  }
 0x2ae   :  { %4025 = vmatpush2.bf16.msra.mxu1 %v8545_v13  ;;  %4047 = vmatprep.subr.bf16.mxu0 %v8580_v39  ;;  %v8623_v13 = vld [vmem:[#allocation8 + $0xa40] ss:$48 sps:$4 sm:$0xff]   ;;  %v8658_v39 = vld [vmem:[#allocation8 + $0x20c] ss:$48 sps:$4 sm:$0xff]  }
 0x2af   :  { %4080 = vmatprep.subr.bf16.mxu1 %v8553_v17  ;;  %v9691_v17 = vpop.f32.mrf.mxu0 }
 0x2b1   :  { %4027 = vmatmul.mubr.bf16.vlgmr.msra.gmra.mxu1 %v9669_v1  ;;  %4048 = vmatpush1.bf16.msra.mxu0 %v8578_v5  ;;  %v8631_v5 = vld [vmem:[#allocation8 + $0x9e4] ss:$48 sps:$4 sm:$0xff]  }
 0x2b2   :  { %4081 = vmatpush1.bf16.msra.mxu1 %v8551_v23  ;;  %4112 = vmatprep.mubr.bf16.mxu1 %v9652_v15  ;;  %v8656_v23 = vld [vmem:[#allocation8 + $0x208] ss:$48 sps:$4 sm:$0xff]  }
 0x2b3   :  { %4082 = vmatprep.subr.bf16.mxu1 %v8559_v26  ;;  %4049 = vmatprep.subr.bf16.mxu0 %v8586_v41  ;;  %v8629_v26 = vld [vmem:[#allocation8 + $0x9e0] ss:$48 sps:$4 sm:$0xff]   ;;  %v8664_v41 = vld [vmem:[#allocation8 + $0x1ac] ss:$48 sps:$4 sm:$0xff]  }
 0x2b5   :  { %4050 = vmatpush1.bf16.msra.mxu0 %v8584_v42  ;;  %v9693_v42 = vpop.f32.mrf.mxu1 }
 0x2b6   :  { %4083 = vmatpush1.bf16.msra.mxu1 %v8557_v40  ;;  %4051 = vmatprep.subr.bf16.mxu0 %v8592_v18  ;;  %v9695_v40 = vpop.f32.mrf.mxu0 }
 0x2b7   :  { %4084 = vmatprep.subr.bf16.mxu1 %v8565_v50  ;;  %v8662_v50 = vld [vmem:[#allocation8 + $0x1a8] ss:$48 sps:$4 sm:$0xff]  }
 0x2b9   :  { %4052 = vmatpush1.bf16.msra.mxu0 %v8590_v60  ;;  %v8635_v60 = vld [vmem:[#allocation8 + $0x980] ss:$48 sps:$4 sm:$0xff]  }
 0x2ba   :  { %4085 = vmatpush1.bf16.msra.mxu1 %v8563_v22  ;;  %4053 = vmatprep.subr.bf16.mxu0 %v8598_v59  ;;  %v8670_v22 = vld [vmem:[#allocation8 + $0x14c] ss:$48 sps:$4 sm:$0xff]   ;;  %v9697_v59 = vpop.f32.mrf.mxu1 }
 0x2bb   :  { %4086 = vmatprep.subr.bf16.mxu1 %v8571_v10  ;;  %v8643_v10 = vld [vmem:[#allocation8 + $0x924] ss:$48 sps:$4 sm:$0xff]  }
 0x2bd   :  { %4054 = vmatpush2.bf16.msra.mxu0 %v8596_v51  ;;  %v9699_v51 = vld [vmem:[#allocation10] sm:$0xff] }
 0x2be   :  { %4087 = vmatpush1.bf16.msra.mxu1 %v8569_v57  ;;  %4055 = vmatprep.subr.bf16.mxu0 %v8604_v43  ;;  %v8668_v43 = vld [vmem:[#allocation8 + $0x148] ss:$48 sps:$4 sm:$0xff]  }
 0x2bf   :  { %4088 = vmatprep.subr.bf16.mxu1 %v8577_v2  ;;  %v8641_v2 = vld [vmem:[#allocation8 + $0x920] ss:$48 sps:$4 sm:$0xff]  }
 0x2c1   :  { %4056 = vmatpush2.bf16.msra.mxu0 %v8602_v20  ;;  %v1724_v20 = vrot.slane %v9699_v51, %v9426_v48 }
 0x2c2   :  { %4089 = vmatpush1.bf16.msra.mxu1 %v8575_v32  ;;  %4057 = vmatprep.subr.bf16.mxu0 %v8610_v9  ;;  %v8676_v32 = vld [vmem:[#allocation8 + $0xec] ss:$48 sps:$4 sm:$0xff]   ;;  %v9703_v9 = vpop.f32.mrf.mxu1 }
 0x2c3   :  { %4090 = vmatprep.subr.bf16.mxu1 %v8583_v25  ;;  %v8649_v25 = vld [vmem:[#allocation8 + $0x8cc] ss:$48 sps:$4 sm:$0xff]  }
 0x2c5   :  { %4058 = vmatpush2.bf16.msra.mxu0 %v8608_v44  ;;  %v1728_v44 = vrot.slane %v9699_v51, %v9429_v49 }
 0x2c6   :  { %4091 = vmatpush1.bf16.msra.mxu1 %v8581_v4  ;;  %4059 = vmatprep.subr.bf16.mxu0 %v8616_v56  ;;  %v8674_v56 = vld [vmem:[#allocation8 + $0xe8] ss:$48 sps:$4 sm:$0xff]  }
 0x2c7   :  { %4092 = vmatprep.subr.bf16.mxu1 %v8589_v8 }
 0x2c9   :  { %4060 = vmatpush2.bf16.msra.mxu0 %v8614_v63  ;;  %v8647_v63 = vld [vmem:[#allocation8 + $0x8c8] ss:$48 sps:$4 sm:$0xff]  }
 0x2ca   :  { %4093 = vmatpush1.bf16.msra.mxu1 %v8587_v55  ;;  %4061 = vmatprep.subr.bf16.mxu0 %v8622_v54  ;;  %v9707_v55 = vpop.f32.mrf.mxu1  ;;  %v8655_v54 = vld [vmem:[#allocation8 + $0x86c] ss:$48 sps:$4 sm:$0xff]  }
 0x2cb   :  { %4094 = vmatprep.subr.bf16.mxu1 %v8595_v58  ;;  %v8682_v58 = vld [vmem:[#allocation8 + $0x8c] ss:$48 sps:$4 sm:$0xff]  }
 0x2cd   :  { %4062 = vmatpush2.bf16.msra.mxu0 %v8620_v12 }
 0x2ce   :  { %4095 = vmatpush1.bf16.msra.mxu1 %v8593_v14  ;;  %4063 = vmatprep.subr.bf16.mxu0 %v8628_v52 }
 0x2cf   :  { %4096 = vmatprep.subr.bf16.mxu1 %v8601_v38  ;;  %v8680_v38 = vld [vmem:[#allocation8 + $0x88] ss:$48 sps:$4 sm:$0xff]  }
 0x2d1   :  { %4064 = vmatpush2.bf16.msra.mxu0 %v8626_v11 }
 0x2d2   :  { %4097 = vmatpush2.bf16.msra.mxu1 %v8599_v24  ;;  %4065 = vmatprep.subr.bf16.mxu0 %v8634_v34  ;;  %v8653_v34 = vld [vmem:[#allocation8 + $0x868] ss:$48 sps:$4 sm:$0xff]  }
 0x2d3   :  { %4098 = vmatprep.subr.bf16.mxu1 %v8607_v45  ;;  %v8688_v45 = vld [vmem:[#allocation8 + $0x2c] ss:$48 sps:$4 sm:$0xff]  }
 0x2d5   :  { %4066 = vmatpush2.bf16.msra.mxu0 %v8632_v33 }
 0x2d6   :  { %4099 = vmatpush2.bf16.msra.mxu1 %v8605_v28  ;;  %4067 = vmatprep.subr.bf16.mxu0 %v8640_v27  ;;  %v8661_v28 = vld [vmem:[#allocation8 + $0x80c] ss:$48 sps:$4 sm:$0xff]  }
 0x2d7   :  { %4100 = vmatprep.subr.bf16.mxu1 %v8613_v29 }
 0x2d9   :  { %4068 = vmatpush2.bf16.msra.mxu0 %v8638_v21 }
 0x2da   :  { %4101 = vmatpush2.bf16.msra.mxu1 %v8611_v31  ;;  %4123 = vmatprep.subr.bf16.mxu0 %v8646_v30  ;;  %v8686_v31 = vld [vmem:[#allocation8 + $0x28] ss:$48 sps:$4 sm:$0xff]  }
 0x2db   :  { %4102 = vmatprep.subr.bf16.mxu1 %v8619_v53 }
 0x2dc   :  { %4070 = vmatmul.mubr.bf16.vlgmr.msra.gmra.mxu0 %v9619_v61  ;;  %v3813_v18 = vpop.f32.mrf.mxu0 }
 0x2dd   :  { %4124 = vmatpush1.bf16.msra.mxu0 %v8644_v19  ;;  %4155 = vmatprep.mubr.bf16.mxu0 %v9581_v6  ;;  %v8637_v6 = vld [vmem:[#allocation8 + $0x984] ss:$48 sps:$4 sm:$0xff]   ;;  %v3814_v8 = vadd.f32 %v3813_v18, %v1724_v20  ;;  %v8659_v19 = vld [vmem:[#allocation8 + $0x808] ss:$48 sps:$4 sm:$0xff]   ;;  %v8679_v18 = vld [vmem:[#allocation8 + $0x6ec] ss:$48 sps:$4 sm:$0xff]  }
 0x2de   :  { %4103 = vmatpush2.bf16.msra.mxu1 %v8617_v62  ;;  %4125 = vmatprep.subr.bf16.mxu0 %v8652_v7  ;;  %v3815_v57 = vpop.f32.mrf.mxu0  ;;  %v8667_v7 = vld [vmem:[#allocation8 + $0x7ac] ss:$48 sps:$4 sm:$0xff]  }
 0x2df   :  { %4104 = vmatprep.subr.bf16.mxu1 %v8625_v36  ;;  %v3816_v12 = vadd.f32 %v3815_v57, %v1728_v44  ;;  %v8710_v57 = vld [vmem:[#allocation8 + $0x4a8] ss:$48 sps:$4 sm:$0xff]  }
 0x2e0   :  { %v3817_v4 = vpop.f32.mrf.mxu0 }
 0x2e1   :  { %4126 = vmatpush1.bf16.msra.mxu0 %v8650_v37  ;;  %v3818_v24 = vadd.f32 %v3817_v4, %v1724_v20  ;;  %v8692_v37 = vld [vmem:[#allocation8 + $0x5c8] ss:$48 sps:$4 sm:$0xff]   ;;  %v8691_v20 = vld [vmem:[#allocation8 + $0x62c] ss:$48 sps:$4 sm:$0xff]  }
 0x2e2   :  { %4105 = vmatpush2.bf16.msra.mxu1 %v8623_v13  ;;  %4127 = vmatprep.subr.bf16.mxu0 %v8658_v39  ;;  %v3819_v52 = vpop.f32.mrf.mxu0  ;;  %v8665_v39 = vld [vmem:[#allocation8 + $0x7a8] ss:$48 sps:$4 sm:$0xff]   ;;  %v8697_v4 = vld [vmem:[#allocation8 + $0xbcc] ss:$48 sps:$4 sm:$0xff]  }
 0x2e3   :  { %4106 = vmatprep.subr.bf16.mxu1 %v8631_v5  ;;  %v3820_v29 = vadd.f32 %v3819_v52, %v1728_v44  ;;  %v8700_v5 = vld [vmem:[#allocation8 + $0x56c] ss:$48 sps:$4 sm:$0xff]  }
 0x2e4   :  { %v8724_v44 = vld [vmem:[#allocation8 + $0x3ec] ss:$48 sps:$4 sm:$0xff]  }
 0x2e5   :  { %4128 = vmatpush1.bf16.msra.mxu0 %v8656_v23  ;;  %v8673_v23 = vld [vmem:[#allocation8 + $0x74c] ss:$48 sps:$4 sm:$0xff]  }
 0x2e6   :  { %4107 = vmatpush2.bf16.msra.mxu1 %v8629_v26  ;;  %4129 = vmatprep.subr.bf16.mxu0 %v8664_v41  ;;  %v8698_v26 = vld [vmem:[#allocation8 + $0x568] ss:$48 sps:$4 sm:$0xff]   ;;  %v8709_v52 = vld [vmem:[#allocation8 + $0xb0c] ss:$48 sps:$4 sm:$0xff]  }
 0x2e7   :  { %4108 = vmatprep.subr.bf16.mxu1 %v8637_v6  ;;  %v8671_v41 = vld [vmem:[#allocation8 + $0x748] ss:$48 sps:$4 sm:$0xff]   ;;  %v8706_v6 = vld [vmem:[#allocation8 + $0x50c] ss:$48 sps:$4 sm:$0xff]  }
 0x2e9   :  { %4130 = vmatpush1.bf16.msra.mxu0 %v8662_v50  ;;  %v8704_v50 = vld [vmem:[#allocation8 + $0x508] ss:$48 sps:$4 sm:$0xff]  }
 0x2ea   :  { %4109 = vmatpush2.bf16.msra.mxu1 %v8635_v60  ;;  %4131 = vmatprep.subr.bf16.mxu0 %v8670_v22  ;;  %v8677_v60 = vld [vmem:[#allocation8 + $0x6e8] ss:$48 sps:$4 sm:$0xff]   ;;  %v8712_v22 = vld [vmem:[#allocation8 + $0x4ac] ss:$48 sps:$4 sm:$0xff]  }
 0x2eb   :  { %4110 = vmatprep.subr.bf16.mxu1 %v8643_v10  ;;  %v8685_v10 = vld [vmem:[#allocation8 + $0x68c] ss:$48 sps:$4 sm:$0xff]  }
 0x2ed   :  { %4132 = vmatpush1.bf16.msra.mxu0 %v8668_v43  ;;  %v8683_v43 = vld [vmem:[#allocation8 + $0x688] ss:$48 sps:$4 sm:$0xff]  }
 0x2ee   :  { %4111 = vmatpush2.bf16.msra.mxu1 %v8641_v2  ;;  %4133 = vmatprep.subr.bf16.mxu0 %v8676_v32  ;;  %v8718_v2 = vld [vmem:[#allocation8 + $0x44c] ss:$48 sps:$4 sm:$0xff]   ;;  %v8716_v32 = vld [vmem:[#allocation8 + $0x448] ss:$48 sps:$4 sm:$0xff]  }
 0x2ef   :  { %4166 = vmatprep.subr.bf16.mxu1 %v8649_v25  ;;  %v8689_v25 = vld [vmem:[#allocation8 + $0x628] ss:$48 sps:$4 sm:$0xff]  }
 0x2f1   :  { %v3856_v14 = vpop.f32.mrf.mxu1  ;;  %4113 = vmatmul.mubr.bf16.vlgmr.msra.gmra.mxu1 %v9669_v1  ;;  %4134 = vmatpush1.bf16.msra.mxu0 %v8674_v56  ;;  %v8722_v56 = vld [vmem:[#allocation8 + $0x3e8] ss:$48 sps:$4 sm:$0xff]  }
 0x2f2   :  { %v9710_v11 = vadd.f32 %v3856_v14, %v3814_v8  ;;  %4167 = vmatpush1.bf16.msra.mxu1 %v8647_v63  ;;  %4198 = vmatprep.mubr.bf16.mxu1 %v9652_v15  ;;  %v8694_v15 = vld [vmem:[#allocation8 + $0x5cc] ss:$48 sps:$4 sm:$0xff]   ;;  %v8695_v8 = vld [vmem:[#allocation8 + $0xbc8] ss:$48 sps:$4 sm:$0xff]  }
 0x2f3   :  { %v3858_v33 = vpop.f32.mrf.mxu1  ;;  %4168 = vmatprep.subr.bf16.mxu1 %v8655_v54  ;;  %4135 = vmatprep.subr.bf16.mxu0 %v8682_v58  ;;  %v8730_v63 = vld [vmem:[#allocation8 + $0x38c] ss:$48 sps:$4 sm:$0xff]   ;;  %v8728_v58 = vld [vmem:[#allocation8 + $0x388] ss:$48 sps:$4 sm:$0xff]  }
 0x2f4   :  { %v3859_v27 = vadd.f32 %v3858_v33, %v3816_v12  ;;  %v8703_v54 = vld [vmem:[#allocation8 + $0xb6c] ss:$48 sps:$4 sm:$0xff]   ;;  %v8701_v12 = vld [vmem:[#allocation8 + $0xb68] ss:$48 sps:$4 sm:$0xff]   ;;  %v9205_v33 = vmov 0.0  }
 0x2f5   :  { %v3860_v21 = vpop.f32.mrf.mxu1  ;;  %4136 = vmatpush1.bf16.msra.mxu0 %v8680_v38  ;;  %v8736_v14 = vld [vmem:[#allocation8 + $0x32c] ss:$48 sps:$4 sm:$0xff]   ;;  %v8734_v38 = vld [vmem:[#allocation8 + $0x328] ss:$48 sps:$4 sm:$0xff]  }
 0x2f6   :  { %v9714_v30 = vpack.c.bf16 %v3859_v27, %v9710_v11  ;;  %v9716_v53 = vadd.f32 %v3860_v21, %v3818_v24  ;;  %4169 = vmatpush1.bf16.msra.mxu1 %v8653_v34  ;;  %4137 = vmatprep.subr.bf16.mxu0 %v8688_v45  ;;  %v8707_v24 = vld [vmem:[#allocation8 + $0xb08] ss:$48 sps:$4 sm:$0xff]   ;;  %v8715_v34 = vld [vmem:[#allocation8 + $0xaac] ss:$48 sps:$4 sm:$0xff]  }
 0x2f7   :  { %v3862_v62 = vpop.f32.mrf.mxu1  ;;  %4170 = vmatprep.subr.bf16.mxu1 %v8661_v28  ;;  %v8713_v45 = vld [vmem:[#allocation8 + $0xaa8] ss:$48 sps:$4 sm:$0xff]   ;;  %v8721_v28 = vld [vmem:[#allocation8 + $0xa4c] ss:$48 sps:$4 sm:$0xff]  }
 0x2f8   :  { %v3863_v36 = vadd.f32 %v3862_v62, %v3820_v29  ;;  %v8719_v27 = vld [vmem:[#allocation8 + $0xa48] ss:$48 sps:$4 sm:$0xff]   ;;  %v8727_v29 = vld [vmem:[#allocation8 + $0x9ec] ss:$48 sps:$4 sm:$0xff]  }
 0x2f9   :  { %4138 = vmatpush1.bf16.msra.mxu0 %v8686_v31  ;;  %v8725_v21 = vld [vmem:[#allocation8 + $0x9e8] ss:$48 sps:$4 sm:$0xff]   ;;  %v8733_v31 = vld [vmem:[#allocation8 + $0x98c] ss:$48 sps:$4 sm:$0xff]  }
 0x2fa   :  { %v9719_v13 = vpack.c.bf16 %v3863_v36, %v9716_v53  ;;  %4171 = vmatpush1.bf16.msra.mxu1 %v8659_v19  ;;  %4139 = vmatprep.subr.bf16.mxu0 %v8694_v15  ;;  %v8731_v15 = vld [vmem:[#allocation8 + $0x988] ss:$48 sps:$4 sm:$0xff]   ;;  %v8739_v62 = vld [vmem:[#allocation8 + $0x92c] ss:$48 sps:$4 sm:$0xff]  }
 0x2fb   :  { %4172 = vmatprep.subr.bf16.mxu1 %v8667_v7  ;;  %v1731_v7 = vsub.s32 4, %v9275_v3 }
 0x2fd   :  { %4140 = vmatpush2.bf16.msra.mxu0 %v8692_v37  ;;  %v8737_v37 = vld [vmem:[#allocation8 + $0x928] ss:$48 sps:$4 sm:$0xff]  }
 0x2fe   :  { %4173 = vmatpush1.bf16.msra.mxu1 %v8665_v39  ;;  %4141 = vmatprep.subr.bf16.mxu0 %v8700_v5  ;;  %v1732_v39 = vrot.slane %v9699_v51, %v1731_v7 }
 0x2ff   :  { %4174 = vmatprep.subr.bf16.mxu1 %v8673_v23 }
 0x301   :  { %4142 = vmatpush2.bf16.msra.mxu0 %v8698_v26 }
 0x302   :  { %4175 = vmatpush1.bf16.msra.mxu1 %v8671_v41  ;;  %4143 = vmatprep.subr.bf16.mxu0 %v8706_v6 }
 0x303   :  { %4176 = vmatprep.subr.bf16.mxu1 %v8679_v18 }
 0x305   :  { %4144 = vmatpush2.bf16.msra.mxu0 %v8704_v50  ;;  %v1720_v50 = vrot.slane %v9699_v51, %v9423_v47 }
 0x306   :  { %4177 = vmatpush1.bf16.msra.mxu1 %v8677_v60  ;;  %4145 = vmatprep.subr.bf16.mxu0 %v8712_v22  ;;  %v1716_v60 = vrot.slane %v9699_v51, %v9420_v46 }
 0x307   :  { %4178 = vmatprep.subr.bf16.mxu1 %v8685_v10 }
 0x309   :  { %4146 = vmatpush2.bf16.msra.mxu0 %v8710_v57 }
 0x30a   :  { %4179 = vmatpush1.bf16.msra.mxu1 %v8683_v43  ;;  %4147 = vmatprep.subr.bf16.mxu0 %v8718_v2 }
 0x30b   :  { %4180 = vmatprep.subr.bf16.mxu1 %v8691_v20 }
 0x30d   :  { %4148 = vmatpush2.bf16.msra.mxu0 %v8716_v32 }
 0x30e   :  { %4181 = vmatpush1.bf16.msra.mxu1 %v8689_v25  ;;  %4149 = vmatprep.subr.bf16.mxu0 %v8724_v44  ;;  %v3728_v44 = vadd.f32 %v9685_v35, %v1716_v60  ;;  %v3732_v35 = vadd.f32 %v9691_v17, %v1716_v60 }
 0x30f   :  { %4182 = vmatprep.subr.bf16.mxu1 %v8697_v4 }
 0x311   :  { %4150 = vmatpush2.bf16.msra.mxu0 %v8722_v56 }
 0x312   :  { %4183 = vmatpush2.bf16.msra.mxu1 %v8695_v8  ;;  %4151 = vmatprep.subr.bf16.mxu0 %v8730_v63 }
 0x313   :  { %4184 = vmatprep.subr.bf16.mxu1 %v8703_v54  ;;  %v3734_v54 = vadd.f32 %v9695_v40, %v1720_v50  ;;  %v9766_v40 = vadd.f32 %v9703_v9, %v3732_v35  ;;  %v1743_v9 = vsub.s32 7, %v9275_v3 }
 0x315   :  { %4152 = vmatpush2.bf16.msra.mxu0 %v8728_v58 }
 0x316   :  { %4185 = vmatpush2.bf16.msra.mxu1 %v8701_v12  ;;  %4153 = vmatprep.subr.bf16.mxu0 %v8736_v14 }
 0x317   :  { %4186 = vmatprep.subr.bf16.mxu1 %v8709_v52 }
 0x319   :  { %4154 = vmatpush2.bf16.msra.mxu0 %v8734_v38 }
 0x31a   :  { %4187 = vmatpush2.bf16.msra.mxu1 %v8707_v24  ;;  %7944 = vmatprep.subr.bf16.mxu0 %v9205_v33  ;;  %v1744_v24 = vrot.slane %v9699_v51, %v1743_v9 }
 0x31b   :  { %4188 = vmatprep.subr.bf16.mxu1 %v8715_v34 }
 0x31c   :  { %4156 = vmatmul.mubr.bf16.vlgmr.msra.gmra.mxu0 %v9619_v61  ;;  %v3899_v19 = vpop.f32.mrf.mxu0  ;;  %v1735_v61 = vsub.s32 5, %v9275_v3 }
 0x31d   :  { %7946 = vmatprep.mubr.msk.bf16.mxu0 %vm9206_vm9, %v9205_v33  ;;  %v3900_v26 = vadd.f32 %v3899_v19, %v1732_v39 }
 0x31e   :  { %4189 = vmatpush2.bf16.msra.mxu1 %v8713_v45  ;;  %v3901_v36 = vpop.f32.mrf.mxu0  ;;  %v1736_v5 = vrot.slane %v9699_v51, %v1735_v61 }
 0x31f   :  { %4190 = vmatprep.subr.bf16.mxu1 %v8721_v28 }
 0x320   :  { %v3903_v23 = vpop.f32.mrf.mxu0  ;;  %v3902_v41 = vadd.f32 %v3901_v36, %v1736_v5 }
 0x321   :  { %v3904_v57 = vadd.f32 %v3903_v23, %v1732_v39  ;;  %v1710_v23 = vld [vmem:[#allocation10 + $0x8] sm:$0xf] }
 0x322   :  { %4191 = vmatpush2.bf16.msra.mxu1 %v8719_v27  ;;  %v3905_v18 = vpop.f32.mrf.mxu0  ;;  %v1756_v9 = vrot.slane %v1710_v23, %v9426_v48 }
 0x323   :  { %4192 = vmatprep.subr.bf16.mxu1 %v8727_v29  ;;  %v3906_v2 = vadd.f32 %v3905_v18, %v1736_v5 }
 0x326   :  { %4193 = vmatpush2.bf16.msra.mxu1 %v8725_v21 }
 0x327   :  { %4194 = vmatprep.subr.bf16.mxu1 %v8733_v31 }
 0x32a   :  { %4195 = vmatpush2.bf16.msra.mxu1 %v8731_v15 }
 0x32b   :  { %4196 = vmatprep.subr.bf16.mxu1 %v8739_v62 }
 0x32e   :  { %4197 = vmatpush2.bf16.msra.mxu1 %v8737_v37 }
 0x32f   :  { %7950 = vmatprep.subr.bf16.mxu1 %v9205_v33 }
 0x331   :  { %v3942_v6 = vpop.f32.mrf.mxu1  ;;  %4199 = vmatmul.mubr.bf16.vlgmr.msra.gmra.mxu1 %v9669_v1  ;;  %v3730_v1 = vadd.f32 %v9687_v16, %v1720_v50  ;;  %v9755_v16 = vadd.f32 %v9693_v42, %v3728_v44 }
 0x332   :  { %7952 = vmatprep.mubr.msk.bf16.mxu1 %vm9206_vm9, %v9205_v33  ;;  %v9737_v10 = vadd.f32 %v3942_v6, %v3900_v26  ;;  %v1752_v6 = vrot.slane %v1710_v23, %v9423_v47 }
 0x333   :  { %v3944_v22 = vpop.f32.mrf.mxu1  ;;  %v3773_v63 = vadd.f32 %v9697_v59, %v3730_v1  ;;  %v3777_v59 = vadd.f32 %v9707_v55, %v3734_v54  ;;  %v1739_v55 = vsub.s32 6, %v9275_v3 }
 0x334   :  { %v3945_v43 = vadd.f32 %v3944_v22, %v3902_v41  ;;  %v1748_v41 = vrot.slane %v1710_v23, %v9420_v46 }
 0x335   :  { %v3946_v20 = vpop.f32.mrf.mxu1  ;;  %v9761_v14 = vpack.c.bf16 %v3773_v63, %v9755_v16  ;;  %v9773_v17 = vpack.c.bf16 %v3777_v59, %v9766_v40  ;;  %v1740_v38 = vrot.slane %v9699_v51, %v1739_v55 }
 0x336   :  { %v9741_v32 = vpack.c.bf16 %v3945_v43, %v9737_v10  ;;  %v9744_v4 = vadd.f32 %v3946_v20, %v3904_v57 }
 0x337   :  { %v3948_v25 = vpop.f32.mrf.mxu1 }
 0x338   :  { %v3949_v56 = vadd.f32 %v3948_v25, %v3906_v2  ;;  %v4274_v8 = vsel %vm4269_vm10, %v9741_v32, 0 }
 0x339   :  { %7945 = vmatpush3.bf16.xpose.msra.mxu0 %v4274_v8 }
 0x33a   :  { %v9751_v58 = vpack.c.bf16 %v3949_v56, %v9744_v4  ;;  %7956 = vmatprep.subr.bf16.mxu0 %v9205_v33 }
 0x33c   :  { %v4320_v12 = vsel %vm4269_vm10, %v9751_v58, 0 }
 0x33d   :  { %7951 = vmatpush3.bf16.xpose.msra.mxu1 %v4320_v12 }
 0x33e   :  { %7962 = vmatprep.subr.bf16.mxu1 %v9205_v33 }
 0x340   :  { %7947 = vmatmul.mubr.msk.bf16.vlgmr.msra.gmra.mxu0 %vm4269_vm10, %v9761_v14 }
 0x341   :  { %7958 = vmatprep.mubr.msk.bf16.mxu0 %vm9206_vm9, %v9205_v33 }
 0x344   :  { %7953 = vmatmul.mubr.msk.bf16.vlgmr.msra.gmra.mxu1 %vm4269_vm10, %v9773_v17 }
 0x345   :  { %7964 = vmatprep.mubr.msk.bf16.mxu1 %vm9206_vm9, %v9205_v33 }
 0x35c   :  { %v3985_v42 = vpop.f32.mrf.mxu0 }
 0x35d   :  { %v3986_v45 = vadd.f32 %v3985_v42, %v1740_v38 }
 0x35e   :  { %v3987_v52 = vpop.f32.mrf.mxu0 }
 0x35f   :  { %v3988_v28 = vadd.f32 %v3987_v52, %v1744_v24  ;;  %v1760_v52 = vrot.slane %v1710_v23, %v9429_v49 }
 0x360   :  { %v3989_v34 = vpop.f32.mrf.mxu0 }
 0x361   :  { %v3990_v31 = vadd.f32 %v3989_v34, %v1740_v38 }
 0x362   :  { %v3991_v29 = vpop.f32.mrf.mxu0 }
 0x363   :  { %v3992_v62 = vadd.f32 %v3991_v29, %v1744_v24 }
 0x371   :  { %v4028_v27 = vpop.f32.mrf.mxu1 }
 0x372   :  { %v9783_v21 = vadd.f32 %v4028_v27, %v3986_v45 }
 0x373   :  { %v4030_v19 = vpop.f32.mrf.mxu1 }
 0x374   :  { %v4031_v15 = vadd.f32 %v4030_v19, %v3988_v28 }
 0x375   :  { %v4032_v7 = vpop.f32.mrf.mxu1 }
 0x376   :  { %v9786_v61 = vpack.c.bf16 %v4031_v15, %v9783_v21  ;;  %v9788_v36 = vadd.f32 %v4032_v7, %v3990_v31 }
 0x377   :  { %v4034_v37 = vpop.f32.mrf.mxu1 }
 0x378   :  { %v4035_v39 = vadd.f32 %v4034_v37, %v3992_v62 }
 0x37a   :  { %v9791_v51 = vpack.c.bf16 %v4035_v39, %v9788_v36 }
 0x39c   :  { %v4071_v5 = vpop.f32.mrf.mxu0 }
 0x39d   :  { %v4072_v50 = vadd.f32 %v4071_v5, %v1748_v41 }
 0x39e   :  { %v4073_v26 = vpop.f32.mrf.mxu0 }
 0x39f   :  { %v4074_v60 = vadd.f32 %v4073_v26, %v1752_v6 }
 0x3a0   :  { %v4075_v18 = vpop.f32.mrf.mxu0 }
 0x3a1   :  { %v4076_v20 = vadd.f32 %v4075_v18, %v1748_v41 }
 0x3a2   :  { %v4077_v57 = vpop.f32.mrf.mxu0 }
 0x3a3   :  { %v4078_v25 = vadd.f32 %v4077_v57, %v1752_v6 }
 0x3b1   :  { %v4114_v22 = vpop.f32.mrf.mxu1 }
 0x3b2   :  { %v9795_v2 = vadd.f32 %v4114_v22, %v4072_v50 }
 0x3b3   :  { %v4116_v43 = vpop.f32.mrf.mxu1 }
 0x3b4   :  { %v4117_v1 = vadd.f32 %v4116_v43, %v4074_v60 }
 0x3b5   :  { %v4118_v44 = vpop.f32.mrf.mxu1 }
 0x3b6   :  { %v9798_v56 = vpack.c.bf16 %v4117_v1, %v9795_v2  ;;  %v9800_v63 = vadd.f32 %v4118_v44, %v4076_v20  ;;  %v7871_v1 = vpack.c.bf16 %v9744_v4, %v9744_v4  ;;  %v7868_v4 = vpack.c.bf16 %v9755_v16, %v9755_v16 }
 0x3b7   :  { %v4120_v8 = vpop.f32.mrf.mxu1 }
 0x3b8   :  { %v4121_v54 = vadd.f32 %v4120_v8, %v4078_v25  ;;  %v4391_v35 = vsel %vm1308_vm8, %v9798_v56, 0 }
 0x3b9   :  { %7957 = vmatpush3.bf16.msra.mxu0 %v4391_v35 }
 0x3ba   :  { %v9805_v12 = vpack.c.bf16 %v4121_v54, %v9800_v63  ;;  %7968 = vmatprep.subr.bf16.mxu0 %v9205_v33 }
 0x3bc   :  { %v4437_v59 = vsel %vm1308_vm8, %v9805_v12, 0 }
 0x3bd   :  { %7963 = vmatpush3.bf16.msra.mxu1 %v4437_v59 }
 0x3be   :  { %7974 = vmatprep.subr.bf16.mxu1 %v9205_v33 }
 0x3dc   :  { %v4157_v42 = vpop.f32.mrf.mxu0 }
 0x3dd   :  { %v4158_v24 = vadd.f32 %v4157_v42, %v1756_v9 }
 0x3de   :  { %v4159_v55 = vpop.f32.mrf.mxu0 }
 0x3df   :  { %v4160_v34 = vadd.f32 %v4159_v55, %v1760_v52 }
 0x3e0   :  { %v4161_v38 = vpop.f32.mrf.mxu0 }
 0x3e1   :  { %v4162_v29 = vadd.f32 %v4161_v38, %v1756_v9  ;;  %v7869_v38 = vpack.c.bf16 %v9737_v10, %v9737_v10 }
 0x3e2   :  { %v4163_v28 = vpop.f32.mrf.mxu0 }
 0x3e3   :  { %v4164_v15 = vadd.f32 %v4163_v28, %v1760_v52 }
 0x3f1   :  { %v4200_v45 = vpop.f32.mrf.mxu1 }
 0x3f2   :  { %v9813_v27 = vadd.f32 %v4200_v45, %v4158_v24  ;;  %v7870_v24 = vpack.c.bf16 %v9766_v40, %v9766_v40 }
 0x3f3   :  { %v4202_v31 = vpop.f32.mrf.mxu1 }
 0x3f4   :  { %v4203_v19 = vadd.f32 %v4202_v31, %v4160_v34 }
 0x3f5   :  { %v4204_v62 = vpop.f32.mrf.mxu1 }
 0x3f6   :  { %v9816_v7 = vpack.c.bf16 %v4203_v19, %v9813_v27  ;;  %v9818_v37 = vadd.f32 %v4204_v62, %v4162_v29 }
 0x3f7   :  { %v4206_v39 = vpop.f32.mrf.mxu1 }
 0x3f8   :  { %v4207_v5 = vadd.f32 %v4206_v39, %v4164_v15 }
 0x3fa   :  { %v9821_v23 = vpack.c.bf16 %v4207_v5, %v9818_v37 }
 0x400   :  { %v4310_v26 = vpop.f32.mrf.mxu0 }
 0x401   :  { %v4363_v41 = vsel %vm4362_vm11, %v4310_v26, -inf }
 0x402   :  { %4364 = vmax.xlane.f32.xlu0 %v4363_v41  ;;  %v7948_v6 = vpop.f32.mrf.mxu0 }
 0x404   :  { %v4313_v18 = vpop.f32.mrf.mxu0  ;;  %v4356_v50 = vpop.f32.mrf.mxu1 }
 0x405   :  { %v4366_v60 = vsel %vm4362_vm11, %v4356_v50, -inf }
 0x406   :  { %4367 = vmax.xlane.f32.xlu1 %v4366_v60  ;;  %v7949_v22 = vpop.f32.mrf.mxu0  ;;  %v7954_v57 = vpop.f32.mrf.mxu1 }
 0x408   :  { %v4359_v43 = vpop.f32.mrf.mxu1 }
 0x40a   :  { %v7955_v20 = vpop.f32.mrf.mxu1 }
 0x417   :  { %4537 = vrot.lane.b32.xlu1 %v7871_v1, %s9207_s4 }
 0x48b   :  { %v4365_v25 = vpop.xlane.xlu0 %4364 }
 0x48c   :  { %v4369_v44 = vsub.f32 %v4310_v26, %v4365_v25 }
 0x48e   :  { %v4371_v8 = vmul.f32 1.442695, %v4369_v44 }
 0x48f   :  { %v4368_v54 = vpop.xlane.xlu1 %4367 }
 0x490   :  { %8948 = vpow2.f32 %v4371_v8  ;;  %v4370_v35 = vsub.f32 %v4356_v50, %v4368_v54 }
 0x492   :  { %v4373_v59 = vmul.f32 1.442695, %v4370_v35 }
 0x493   :  { %v4538_v34 = vpop.permute.xlu1 %4537 }
 0x494   :  { %8950 = vpow2.f32 %v4373_v59  ;;  %v4543_v39 = vsel %vm4269_vm10, %v4538_v34, 0 }
 0x49d   :  { %v8949_v42 = vpop.eup %8948 }
 0x49e   :  { %v4375_v55 = vsel %vm4362_vm11, %v8949_v42, 0.0 }
 0x49f   :  { %4376 = vadd.xlane.f32.xlu0 %v4375_v55 }
 0x4a1   :  { %v8951_v9 = vpop.eup %8950 }
 0x4a2   :  { %v4378_v52 = vsel %vm4362_vm11, %v8951_v9, 0.0 }
 0x4a3   :  { %4379 = vadd.xlane.f32.xlu1 %v4378_v52 }
 0x4b4   :  { %4482 = vrot.lane.b32.xlu1 %v7868_v4, %s9207_s4 }
 0x4b5   :  { %4485 = vrot.lane.b32.xlu0 %v7869_v38, %s9207_s4 }
 0x4b8   :  { %4534 = vrot.lane.b32.xlu1 %v7870_v24, %s9207_s4 }
 0x528   :  { %v4377_v45 = vpop.xlane.xlu0 %4376 }
 0x529   :  { %8952 = vrcp.f32 %v4377_v45 }
 0x52c   :  { %v4380_v28 = vpop.xlane.xlu1 %4379  ;;  %v4486_v16 = vpop.permute.xlu0 %4485 }
 0x52d   :  { %8954 = vrcp.f32 %v4380_v28  ;;  %v4491_v10 = vsel %vm4269_vm10, %v4486_v16, 0 }
 0x530   :  { %v4483_v5 = vpop.permute.xlu1 %4482 }
 0x534   :  { %v4535_v26 = vpop.permute.xlu1 %4534 }
 0x536   :  { %v8953_v29 = vpop.eup %8952 }
 0x537   :  { %v4383_v31 = vmul.f32 %v8953_v29, %v8949_v42 }
 0x539   :  { %v4385_v19 = vpack.c.bf16 %v4383_v31, %v4383_v31 }
 0x53a   :  { %v8955_v15 = vpop.eup %8954 }
 0x53b   :  { %7959 = vmatmul.mubr.msk.bf16.vlgmr.msra.gmra.mxu0 %vm4362_vm11, %v4385_v19  ;;  %v4384_v62 = vmul.f32 %v8955_v15, %v8951_v9  ;;  %v7873_v9 = vpack.c.bf16 %v9800_v63, %v9800_v63  ;;  %v7872_v15 = vpack.c.bf16 %v9795_v2, %v9795_v2 }
 0x53c   :  { %7969 = vmatpush3.bf16.xpose.msra.mxu0 %v4491_v10  ;;  %7970 = vmatprep.mubr.msk.bf16.mxu0 %vm9206_vm9, %v9205_v33 }
 0x53d   :  { %v4386_v40 = vpack.c.bf16 %v4384_v62, %v4384_v62  ;;  %7980 = vmatprep.subr.bf16.mxu0 %v9205_v33 }
 0x53f   :  { %7965 = vmatmul.mubr.msk.bf16.vlgmr.msra.gmra.mxu1 %vm4362_vm11, %v4386_v40 }
 0x540   :  { %7975 = vmatpush3.bf16.xpose.msra.mxu1 %v4543_v39  ;;  %7976 = vmatprep.mubr.msk.bf16.mxu1 %vm9206_vm9, %v9205_v33 }
 0x541   :  { %7986 = vmatprep.subr.bf16.mxu1 %v9205_v33 }
 0x543   :  { %7971 = vmatmul.mubr.msk.bf16.vlgmr.msra.gmra.mxu0 %vm4269_vm10, %v4483_v5 }
 0x544   :  { %7982 = vmatprep.mubr.msk.bf16.mxu0 %vm9206_vm9, %v9205_v33 }
 0x547   :  { %7977 = vmatmul.mubr.msk.bf16.vlgmr.msra.gmra.mxu1 %vm4269_vm10, %v4535_v26 }
 0x548   :  { %7988 = vmatprep.mubr.msk.bf16.mxu1 %vm9206_vm9, %v9205_v33 }
 0x5fb   :  { %v9855_v41 = vpop.f32.mrf.mxu0 }
 0x5fd   :  { %v7960_v6 = vpop.f32.mrf.mxu0 }
 0x5fe   :  { %v4710_v6 = vrot.slane %v9741_v32, 4 }
 0x5ff   :  { %v4430_v18 = vpop.f32.mrf.mxu0  ;;  %v9857_v50 = vpop.f32.mrf.mxu1 }
 0x600   :  { %v4715_v2 = vsel %vm4269_vm10, %v4710_v6, 0 }
 0x601   :  { %v7961_v60 = vpop.f32.mrf.mxu0  ;;  %v7966_v22 = vpop.f32.mrf.mxu1 }
 0x603   :  { %v4476_v57 = vpop.f32.mrf.mxu1  ;;  %v4527_v43 = vpop.f32.mrf.mxu0 }
 0x604   :  { %v4585_v20 = vsel %vm4362_vm11, %v4527_v43, -inf  ;;  %v4758_v57 = vrot.slane %v9751_v58, 4 }
 0x605   :  { %v7967_v1 = vpop.f32.mrf.mxu1  ;;  %4586 = vmax.xlane.f32.xlu0 %v4585_v20  ;;  %v7972_v25 = vpop.f32.mrf.mxu0 }
 0x606   :  { %v4763_v20 = vsel %vm4269_vm10, %v4758_v57, 0  ;;  %v4829_v1 = vrot.slane %v9798_v56, 4  ;;  %v4709_v25 = vrot.slane %v9761_v14, 4 }
 0x607   :  { %v4530_v44 = vpop.f32.mrf.mxu0  ;;  %v4579_v8 = vpop.f32.mrf.mxu1 }
 0x608   :  { %v4588_v54 = vsel %vm4362_vm11, %v4579_v8, -inf  ;;  %v4834_v44 = vsel %vm1308_vm8, %v4829_v1, 0 }
 0x609   :  { %4589 = vmax.xlane.f32.xlu1 %v4588_v54  ;;  %v7973_v35 = vpop.f32.mrf.mxu0  ;;  %v7978_v59 = vpop.f32.mrf.mxu1  ;;  %v4757_v54 = vrot.slane %v9773_v17, 4 }
 0x60b   :  { %v4582_v42 = vpop.f32.mrf.mxu1 }
 0x60d   :  { %v7979_v55 = vpop.f32.mrf.mxu1 }
 0x61a   :  { %4659 = vrot.lane.b32.xlu1 %v7873_v9, %s9207_s4 }
 0x68e   :  { %v4587_v52 = vpop.xlane.xlu0 %4586 }
 0x68f   :  { %v4591_v4 = vsub.f32 %v4527_v43, %v4587_v52 }
 0x691   :  { %v4593_v38 = vmul.f32 1.442695, %v4591_v4 }
 0x692   :  { %v4590_v24 = vpop.xlane.xlu1 %4589 }
 0x693   :  { %8956 = vpow2.f32 %v4593_v38  ;;  %v4592_v34 = vsub.f32 %v4579_v8, %v4590_v24  ;;  %v4876_v8 = vrot.slane %v9805_v12, 4 }
 0x695   :  { %v4595_v45 = vmul.f32 1.442695, %v4592_v34  ;;  %v4881_v35 = vsel %vm1308_vm8, %v4876_v8, 0 }
 0x696   :  { %v4660_v28 = vpop.permute.xlu1 %4659 }
 0x697   :  { %8958 = vpow2.f32 %v4595_v45  ;;  %v4665_v29 = vsel %vm1308_vm8, %v4660_v28, 0 }
 0x698   :  { %7987 = vmatpush3.bf16.msra.mxu1 %v4665_v29 }
 0x699   :  { %7998 = vmatprep.subr.bf16.mxu1 %v9205_v33 }
 0x6a0   :  { %v8957_v31 = vpop.eup %8956 }
 0x6a1   :  { %v4597_v16 = vsel %vm4362_vm11, %v8957_v31, 0.0 }
 0x6a2   :  { %4598 = vadd.xlane.f32.xlu0 %v4597_v16 }
 0x6a4   :  { %v8959_v63 = vpop.eup %8958 }
 0x6a5   :  { %v4600_v19 = vsel %vm4362_vm11, %v8959_v63, 0.0 }
 0x6a6   :  { %4601 = vadd.xlane.f32.xlu0 %v4600_v19 }
 0x6bc   :  { %4610 = vrot.lane.b32.xlu0 %v7872_v15, %s9207_s4 }
 0x72b   :  { %v4599_v10 = vpop.xlane.xlu0 %4598 }
 0x72c   :  { %8960 = vrcp.f32 %v4599_v10 }
 0x72f   :  { %v4602_v62 = vpop.xlane.xlu0 %4601 }
 0x730   :  { %8962 = vrcp.f32 %v4602_v62 }
 0x733   :  { %v4611_v40 = vpop.permute.xlu0 %4610 }
 0x734   :  { %v4616_v39 = vsel %vm1308_vm8, %v4611_v40, 0 }
 0x735   :  { %7981 = vmatpush3.bf16.msra.mxu0 %v4616_v39 }
 0x736   :  { %7992 = vmatprep.subr.bf16.mxu0 %v9205_v33 }
 0x739   :  { %v8961_v5 = vpop.eup %8960 }
 0x73a   :  { %v4605_v26 = vmul.f32 %v8961_v5, %v8957_v31 }
 0x73c   :  { %v4607_v18 = vpack.c.bf16 %v4605_v26, %v4605_v26 }
 0x73d   :  { %v8963_v60 = vpop.eup %8962 }
 0x73e   :  { %7983 = vmatmul.mubr.msk.bf16.vlgmr.msra.gmra.mxu0 %vm4362_vm11, %v4607_v18  ;;  %v4606_v22 = vmul.f32 %v8963_v60, %v8959_v63 }
 0x73f   :  { %7993 = vmatpush3.bf16.xpose.msra.mxu0 %v4715_v2  ;;  %7994 = vmatprep.mubr.msk.bf16.mxu0 %vm9206_vm9, %v9205_v33 }
 0x740   :  { %v4608_v43 = vpack.c.bf16 %v4606_v22, %v4606_v22  ;;  %8004 = vmatprep.subr.bf16.mxu0 %v9205_v33 }
 0x742   :  { %7989 = vmatmul.mubr.msk.bf16.vlgmr.msra.gmra.mxu1 %vm4362_vm11, %v4608_v43 }
 0x743   :  { %7999 = vmatpush3.bf16.xpose.msra.mxu1 %v4763_v20  ;;  %8000 = vmatprep.mubr.msk.bf16.mxu1 %vm9206_vm9, %v9205_v33 }
 0x744   :  { %8010 = vmatprep.subr.bf16.mxu1 %v9205_v33 }
 0x746   :  { %7995 = vmatmul.mubr.msk.bf16.vlgmr.msra.gmra.mxu0 %vm4269_vm10, %v4709_v25 }
 0x747   :  { %8005 = vmatpush3.bf16.msra.mxu0 %v4834_v44  ;;  %8006 = vmatprep.mubr.msk.bf16.mxu0 %vm9206_vm9, %v9205_v33 }
 0x748   :  { %8016 = vmatprep.subr.bf16.mxu0 %v9205_v33 }
 0x74a   :  { %8001 = vmatmul.mubr.msk.bf16.vlgmr.msra.gmra.mxu1 %vm4269_vm10, %v4757_v54 }
 0x74b   :  { %8011 = vmatpush3.bf16.msra.mxu1 %v4881_v35  ;;  %8012 = vmatprep.mubr.msk.bf16.mxu1 %vm9206_vm9, %v9205_v33 }
 0x74c   :  { %8022 = vmatprep.subr.bf16.mxu1 %v9205_v33 }
 0x7fe   :  { %v9899_v59 = vpop.f32.mrf.mxu0 }
 0x800   :  { %v7984_v42 = vpop.f32.mrf.mxu0 }
 0x802   :  { %v4655_v55 = vpop.f32.mrf.mxu0  ;;  %v9901_v9 = vpop.f32.mrf.mxu1 }
 0x804   :  { %v7985_v52 = vpop.f32.mrf.mxu0  ;;  %v7990_v4 = vpop.f32.mrf.mxu1 }
 0x806   :  { %v4704_v38 = vpop.f32.mrf.mxu1  ;;  %v4751_v24 = vpop.f32.mrf.mxu0 }
 0x807   :  { %v4805_v34 = vsel %vm4362_vm11, %v4751_v24, -inf }
 0x808   :  { %v7991_v45 = vpop.f32.mrf.mxu1  ;;  %4806 = vmax.xlane.f32.xlu1 %v4805_v34  ;;  %v7996_v28 = vpop.f32.mrf.mxu0 }
 0x80a   :  { %v4754_v29 = vpop.f32.mrf.mxu0  ;;  %v4799_v31 = vpop.f32.mrf.mxu1 }
 0x80b   :  { %v4808_v16 = vsel %vm4362_vm11, %v4799_v31, -inf }
 0x80c   :  { %4809 = vmax.xlane.f32.xlu0 %v4808_v16  ;;  %v7997_v63 = vpop.f32.mrf.mxu0  ;;  %v8002_v19 = vpop.f32.mrf.mxu1 }
 0x80e   :  { %v4802_v15 = vpop.f32.mrf.mxu1 }
 0x810   :  { %v8003_v10 = vpop.f32.mrf.mxu1 }
 0x819   :  { %4980 = vrot.lane.b32.xlu1 %v9751_v58, %s9207_s4 }
 0x81d   :  { %4925 = vrot.lane.b32.xlu1 %v9761_v14, %s9207_s4 }
 0x891   :  { %v4807_v62 = vpop.xlane.xlu1 %4806 }
 0x892   :  { %v4811_v40 = vsub.f32 %v4751_v24, %v4807_v62 }
 0x894   :  { %v4813_v39 = vmul.f32 1.442695, %v4811_v40 }
 0x895   :  { %v4810_v5 = vpop.xlane.xlu0 %4809  ;;  %v4981_v58 = vpop.permute.xlu1 %4980 }
 0x896   :  { %8964 = vpow2.f32 %v4813_v39  ;;  %v4812_v26 = vsub.f32 %v4799_v31, %v4810_v5  ;;  %v4982_v35 = vrot.slane %v4981_v58, 4 }
 0x898   :  { %v4815_v6 = vmul.f32 1.442695, %v4812_v26  ;;  %v4987_v55 = vsel %vm4269_vm10, %v4982_v35, 0 }
 0x899   :  { %v4926_v14 = vpop.permute.xlu1 %4925 }
 0x89a   :  { %8966 = vpow2.f32 %v4815_v6  ;;  %v4927_v52 = vrot.slane %v4926_v14, 4 }
 0x8a3   :  { %v8965_v18 = vpop.eup %8964 }
 0x8a4   :  { %v4817_v60 = vsel %vm4362_vm11, %v8965_v18, 0.0 }
 0x8a5   :  { %4818 = vadd.xlane.f32.xlu0 %v4817_v60 }
 0x8a7   :  { %v8967_v2 = vpop.eup %8966 }
 0x8a8   :  { %v4820_v22 = vsel %vm4362_vm11, %v8967_v2, 0.0 }
 0x8a9   :  { %4821 = vadd.xlane.f32.xlu1 %v4820_v22 }
 0x8ba   :  { %4977 = vrot.lane.b32.xlu1 %v9773_v17, %s9207_s4 }
 0x8bb   :  { %4928 = vrot.lane.b32.xlu0 %v9741_v32, %s9207_s4 }
 0x92e   :  { %v4819_v57 = vpop.xlane.xlu0 %4818 }
 0x92f   :  { %8968 = vrcp.f32 %v4819_v57 }
 0x932   :  { %v4822_v43 = vpop.xlane.xlu1 %4821  ;;  %v4929_v20 = vpop.permute.xlu0 %4928 }
 0x933   :  { %8970 = vrcp.f32 %v4822_v43  ;;  %v4930_v25 = vrot.slane %v4929_v20, 4 }
 0x935   :  { %v4935_v42 = vsel %vm4269_vm10, %v4930_v25, 0 }
 0x936   :  { %v4978_v4 = vpop.permute.xlu1 %4977 }
 0x937   :  { %v4979_v38 = vrot.slane %v4978_v4, 4 }
 0x93c   :  { %v8969_v1 = vpop.eup %8968 }
 0x93d   :  { %v4825_v44 = vmul.f32 %v8969_v1, %v8965_v18 }
 0x93f   :  { %v4827_v8 = vpack.c.bf16 %v4825_v44, %v4825_v44 }
 0x940   :  { %v8971_v54 = vpop.eup %8970 }
 0x941   :  { %8007 = vmatmul.mubr.msk.bf16.vlgmr.msra.gmra.mxu0 %vm4362_vm11, %v4827_v8  ;;  %v4826_v17 = vmul.f32 %v8971_v54, %v8967_v2 }
 0x942   :  { %8017 = vmatpush3.bf16.xpose.msra.mxu0 %v4935_v42  ;;  %8018 = vmatprep.mubr.msk.bf16.mxu0 %vm9206_vm9, %v9205_v33 }
 0x943   :  { %v4828_v32 = vpack.c.bf16 %v4826_v17, %v4826_v17  ;;  %8028 = vmatprep.subr.bf16.mxu0 %v9205_v33 }
 0x945   :  { %8013 = vmatmul.mubr.msk.bf16.vlgmr.msra.gmra.mxu1 %vm4362_vm11, %v4828_v32 }
 0x946   :  { %8023 = vmatpush3.bf16.xpose.msra.mxu1 %v4987_v55  ;;  %8024 = vmatprep.mubr.msk.bf16.mxu1 %vm9206_vm9, %v9205_v33 }
 0x947   :  { %8034 = vmatprep.subr.bf16.mxu1 %v9205_v33 }
 0x949   :  { %8019 = vmatmul.mubr.msk.bf16.vlgmr.msra.gmra.mxu0 %vm4269_vm10, %v4927_v52 }
 0x94a   :  { %8030 = vmatprep.mubr.msk.bf16.mxu0 %vm9206_vm9, %v9205_v33 }
 0x94d   :  { %8025 = vmatmul.mubr.msk.bf16.vlgmr.msra.gmra.mxu1 %vm4269_vm10, %v4979_v38 }
 0x94e   :  { %8036 = vmatprep.mubr.msk.bf16.mxu1 %vm9206_vm9, %v9205_v33 }
 0xa01   :  { %v9931_v24 = vpop.f32.mrf.mxu0 }
 0xa03   :  { %v8008_v34 = vpop.f32.mrf.mxu0 }
 0xa05   :  { %v4873_v45 = vpop.f32.mrf.mxu0  ;;  %v9933_v28 = vpop.f32.mrf.mxu1 }
 0xa07   :  { %v8009_v29 = vpop.f32.mrf.mxu0  ;;  %v8014_v31 = vpop.f32.mrf.mxu1 }
 0xa08   :  { %v5203_v29 = vsel %vm4269_vm10, %v9791_v51, 0  ;;  %v5273_v31 = vsel %vm1308_vm8, %v9816_v7, 0 }
 0xa09   :  { %v4920_v16 = vpop.f32.mrf.mxu1  ;;  %v4971_v63 = vpop.f32.mrf.mxu0 }
 0xa0a   :  { %v5029_v19 = vsel %vm4362_vm11, %v4971_v63, -inf  ;;  %v5319_v16 = vsel %vm1308_vm8, %v9821_v23, 0 }
 0xa0b   :  { %v8015_v15 = vpop.f32.mrf.mxu1  ;;  %5030 = vmax.xlane.f32.xlu0 %v5029_v19  ;;  %v8020_v10 = vpop.f32.mrf.mxu0 }
 0xa0d   :  { %v4974_v62 = vpop.f32.mrf.mxu0  ;;  %v5023_v40 = vpop.f32.mrf.mxu1 }
 0xa0e   :  { %v5032_v39 = vsel %vm4362_vm11, %v5023_v40, -inf }
 0xa0f   :  { %5033 = vmax.xlane.f32.xlu1 %v5032_v39  ;;  %v8021_v5 = vpop.f32.mrf.mxu0  ;;  %v8026_v26 = vpop.f32.mrf.mxu1 }
 0xa11   :  { %v5026_v6 = vpop.f32.mrf.mxu1 }
 0xa13   :  { %v8027_v18 = vpop.f32.mrf.mxu1 }
 0xa20   :  { %5102 = vrot.lane.b32.xlu1 %v9805_v12, %s9207_s4 }
 0xa94   :  { %v5031_v60 = vpop.xlane.xlu0 %5030 }
 0xa95   :  { %v5035_v2 = vsub.f32 %v4971_v63, %v5031_v60 }
 0xa97   :  { %v5037_v22 = vmul.f32 1.442695, %v5035_v2 }
 0xa98   :  { %v5034_v58 = vpop.xlane.xlu1 %5033 }
 0xa99   :  { %8972 = vpow2.f32 %v5037_v22  ;;  %v5036_v14 = vsub.f32 %v5023_v40, %v5034_v58 }
 0xa9b   :  { %v5039_v57 = vmul.f32 1.442695, %v5036_v14 }
 0xa9c   :  { %v5103_v43 = vpop.permute.xlu1 %5102 }
 0xa9d   :  { %8974 = vpow2.f32 %v5039_v57  ;;  %v5104_v20 = vrot.slane %v5103_v43, 4 }
 0xa9f   :  { %v5109_v1 = vsel %vm1308_vm8, %v5104_v20, 0  ;;  %v7877_v20 = vpack.c.bf16 %v9788_v36, %v9788_v36  ;;  %v7874_v36 = vpack.c.bf16 %v9710_v11, %v9710_v11 }
 0xaa0   :  { %8035 = vmatpush3.bf16.msra.mxu1 %v5109_v1 }
 0xaa1   :  { %8046 = vmatprep.subr.bf16.mxu1 %v9205_v33 }
 0xaa6   :  { %v8973_v25 = vpop.eup %8972 }
 0xaa7   :  { %v5041_v44 = vsel %vm4362_vm11, %v8973_v25, 0.0 }
 0xaa8   :  { %5042 = vadd.xlane.f32.xlu0 %v5041_v44 }
 0xaaa   :  { %v8975_v12 = vpop.eup %8974 }
 0xaab   :  { %v5044_v8 = vsel %vm4362_vm11, %v8975_v12, 0.0 }
 0xaac   :  { %5045 = vadd.xlane.f32.xlu0 %v5044_v8 }
 0xac2   :  { %5053 = vrot.lane.b32.xlu0 %v9798_v56, %s9207_s4  ;;  %v5157_v56 = vsel %vm4269_vm10, %v9786_v61, 0 }
 0xb31   :  { %v5043_v54 = vpop.xlane.xlu0 %5042 }
 0xb32   :  { %8976 = vrcp.f32 %v5043_v54 }
 0xb35   :  { %v5046_v35 = vpop.xlane.xlu0 %5045 }
 0xb36   :  { %8978 = vrcp.f32 %v5046_v35 }
 0xb39   :  { %v5054_v42 = vpop.permute.xlu0 %5053 }
 0xb3a   :  { %v5055_v17 = vrot.slane %v5054_v42, 4 }
 0xb3c   :  { %v5060_v32 = vsel %vm1308_vm8, %v5055_v17, 0 }
 0xb3d   :  { %8029 = vmatpush3.bf16.msra.mxu0 %v5060_v32 }
 0xb3e   :  { %8040 = vmatprep.subr.bf16.mxu0 %v9205_v33 }
 0xb3f   :  { %v8977_v55 = vpop.eup %8976 }
 0xb40   :  { %v5049_v52 = vmul.f32 %v8977_v55, %v8973_v25  ;;  %v7875_v55 = vpack.c.bf16 %v9783_v21, %v9783_v21 }
 0xb42   :  { %v5051_v4 = vpack.c.bf16 %v5049_v52, %v5049_v52  ;;  %v7876_v52 = vpack.c.bf16 %v9716_v53, %v9716_v53 }
 0xb43   :  { %v8979_v38 = vpop.eup %8978 }
 0xb44   :  { %8031 = vmatmul.mubr.msk.bf16.vlgmr.msra.gmra.mxu0 %vm4362_vm11, %v5051_v4  ;;  %v5050_v34 = vmul.f32 %v8979_v38, %v8975_v12 }
 0xb45   :  { %8041 = vmatpush3.bf16.xpose.msra.mxu0 %v5157_v56  ;;  %8042 = vmatprep.mubr.msk.bf16.mxu0 %vm9206_vm9, %v9205_v33 }
 0xb46   :  { %v5052_v45 = vpack.c.bf16 %v5050_v34, %v5050_v34  ;;  %8052 = vmatprep.subr.bf16.mxu0 %v9205_v33 }
 0xb48   :  { %8037 = vmatmul.mubr.msk.bf16.vlgmr.msra.gmra.mxu1 %vm4362_vm11, %v5052_v45 }
 0xb49   :  { %8047 = vmatpush3.bf16.xpose.msra.mxu1 %v5203_v29  ;;  %8048 = vmatprep.mubr.msk.bf16.mxu1 %vm9206_vm9, %v9205_v33 }
 0xb4a   :  { %8058 = vmatprep.subr.bf16.mxu1 %v9205_v33 }
 0xb4c   :  { %8043 = vmatmul.mubr.msk.bf16.vlgmr.msra.gmra.mxu0 %vm4269_vm10, %v9714_v30 }
 0xb4d   :  { %8053 = vmatpush3.bf16.msra.mxu0 %v5273_v31  ;;  %8054 = vmatprep.mubr.msk.bf16.mxu0 %vm9206_vm9, %v9205_v33 }
 0xb4e   :  { %8064 = vmatprep.subr.bf16.mxu0 %v9205_v33 }
 0xb50   :  { %8049 = vmatmul.mubr.msk.bf16.vlgmr.msra.gmra.mxu1 %vm4269_vm10, %v9719_v13 }
 0xb51   :  { %8059 = vmatpush3.bf16.msra.mxu1 %v5319_v16  ;;  %8060 = vmatprep.mubr.msk.bf16.mxu1 %vm9206_vm9, %v9205_v33 }
 0xb52   :  { %8070 = vmatprep.subr.bf16.mxu1 %v9205_v33 }
 0xc04   :  { %v9973_v63 = vpop.f32.mrf.mxu0 }
 0xc06   :  { %v8032_v19 = vpop.f32.mrf.mxu0 }
 0xc08   :  { %v5099_v15 = vpop.f32.mrf.mxu0  ;;  %v9975_v10 = vpop.f32.mrf.mxu1 }
 0xc0a   :  { %v8033_v62 = vpop.f32.mrf.mxu0  ;;  %v8038_v40 = vpop.f32.mrf.mxu1 }
 0xc0c   :  { %v5148_v39 = vpop.f32.mrf.mxu1  ;;  %v5193_v5 = vpop.f32.mrf.mxu0 }
 0xc0d   :  { %v5245_v26 = vsel %vm4362_vm11, %v5193_v5, -inf }
 0xc0e   :  { %v8039_v6 = vpop.f32.mrf.mxu1  ;;  %5246 = vmax.xlane.f32.xlu1 %v5245_v26  ;;  %v8044_v18 = vpop.f32.mrf.mxu0 }
 0xc10   :  { %v5196_v60 = vpop.f32.mrf.mxu0  ;;  %v5239_v2 = vpop.f32.mrf.mxu1 }
 0xc11   :  { %v5248_v22 = vsel %vm4362_vm11, %v5239_v2, -inf }
 0xc12   :  { %5249 = vmax.xlane.f32.xlu0 %v5248_v22  ;;  %v8045_v58 = vpop.f32.mrf.mxu0  ;;  %v8050_v14 = vpop.f32.mrf.mxu1 }
 0xc14   :  { %v5242_v57 = vpop.f32.mrf.mxu1 }
 0xc16   :  { %v8051_v43 = vpop.f32.mrf.mxu1 }
 0xc1f   :  { %5419 = vrot.lane.b32.xlu1 %v7877_v20, %s9207_s4 }
 0xc97   :  { %v5247_v1 = vpop.xlane.xlu1 %5246 }
 0xc98   :  { %v5251_v25 = vsub.f32 %v5193_v5, %v5247_v1 }
 0xc9a   :  { %v5253_v44 = vmul.f32 1.442695, %v5251_v25 }
 0xc9b   :  { %v5250_v12 = vpop.xlane.xlu0 %5249  ;;  %v5420_v4 = vpop.permute.xlu1 %5419 }
 0xc9c   :  { %8980 = vpow2.f32 %v5253_v44  ;;  %v5252_v8 = vsub.f32 %v5239_v2, %v5250_v12  ;;  %v5425_v19 = vsel %vm4269_vm10, %v5420_v4, 0 }
 0xc9e   :  { %v5255_v54 = vmul.f32 1.442695, %v5252_v8  ;;  %v7879_v8 = vpack.c.bf16 %v9818_v37, %v9818_v37 }
 0xca0   :  { %8982 = vpow2.f32 %v5255_v54 }
 0xca9   :  { %v8981_v35 = vpop.eup %8980 }
 0xcaa   :  { %v5257_v42 = vsel %vm4362_vm11, %v8981_v35, 0.0 }
 0xcab   :  { %5258 = vadd.xlane.f32.xlu0 %v5257_v42 }
 0xcad   :  { %v8983_v17 = vpop.eup %8982 }
 0xcae   :  { %v5260_v32 = vsel %vm4362_vm11, %v8983_v17, 0.0 }
 0xcaf   :  { %5261 = vadd.xlane.f32.xlu1 %v5260_v32 }
 0xcc0   :  { %5364 = vrot.lane.b32.xlu1 %v7874_v36, %s9207_s4 }
 0xcc1   :  { %5367 = vrot.lane.b32.xlu0 %v7875_v55, %s9207_s4 }
 0xcc4   :  { %5416 = vrot.lane.b32.xlu1 %v7876_v52, %s9207_s4 }
 0xd34   :  { %v5259_v38 = vpop.xlane.xlu0 %5258 }
 0xd35   :  { %8984 = vrcp.f32 %v5259_v38 }
 0xd38   :  { %v5262_v56 = vpop.xlane.xlu1 %5261  ;;  %v5368_v11 = vpop.permute.xlu0 %5367 }
 0xd39   :  { %8986 = vrcp.f32 %v5262_v56  ;;  %v5373_v21 = vsel %vm4269_vm10, %v5368_v11, 0 }
 0xd3c   :  { %v5365_v15 = vpop.permute.xlu1 %5364 }
 0xd40   :  { %v5417_v62 = vpop.permute.xlu1 %5416 }
 0xd42   :  { %v8985_v34 = vpop.eup %8984 }
 0xd43   :  { %v5265_v45 = vmul.f32 %v8985_v34, %v8981_v35  ;;  %v7878_v34 = vpack.c.bf16 %v9813_v27, %v9813_v27 }
 0xd45   :  { %v5267_v29 = vpack.c.bf16 %v5265_v45, %v5265_v45 }
 0xd46   :  { %v8987_v31 = vpop.eup %8986 }
 0xd47   :  { %8055 = vmatmul.mubr.msk.bf16.vlgmr.msra.gmra.mxu0 %vm4362_vm11, %v5267_v29  ;;  %v5266_v16 = vmul.f32 %v8987_v31, %v8983_v17 }
 0xd48   :  { %8065 = vmatpush3.bf16.xpose.msra.mxu0 %v5373_v21  ;;  %8066 = vmatprep.mubr.msk.bf16.mxu0 %vm9206_vm9, %v9205_v33 }
 0xd49   :  { %v5268_v53 = vpack.c.bf16 %v5266_v16, %v5266_v16  ;;  %8076 = vmatprep.subr.bf16.mxu0 %v9205_v33 }
 0xd4b   :  { %8061 = vmatmul.mubr.msk.bf16.vlgmr.msra.gmra.mxu1 %vm4362_vm11, %v5268_v53  ;;  %v5592_v53 = vrot.slane %v9786_v61, 4 }
 0xd4c   :  { %8071 = vmatpush3.bf16.xpose.msra.mxu1 %v5425_v19  ;;  %8072 = vmatprep.mubr.msk.bf16.mxu1 %vm9206_vm9, %v9205_v33 }
 0xd4d   :  { %8082 = vmatprep.subr.bf16.mxu1 %v9205_v33  ;;  %v5597_v27 = vsel %vm4269_vm10, %v5592_v53, 0 }
 0xd4f   :  { %8067 = vmatmul.mubr.msk.bf16.vlgmr.msra.gmra.mxu0 %vm4269_vm10, %v5365_v15 }
 0xd50   :  { %8078 = vmatprep.mubr.msk.bf16.mxu0 %vm9206_vm9, %v9205_v33 }
 0xd53   :  { %8073 = vmatmul.mubr.msk.bf16.vlgmr.msra.gmra.mxu1 %vm4269_vm10, %v5417_v62 }
 0xd54   :  { %8084 = vmatprep.mubr.msk.bf16.mxu1 %vm9206_vm9, %v9205_v33 }
 0xe07   :  { %v10009_v40 = vpop.f32.mrf.mxu0 }
 0xe09   :  { %v8056_v39 = vpop.f32.mrf.mxu0 }
 0xe0a   :  { %v5640_v39 = vrot.slane %v9791_v51, 4 }
 0xe0b   :  { %v5312_v5 = vpop.f32.mrf.mxu0  ;;  %v10011_v26 = vpop.f32.mrf.mxu1 }
 0xe0d   :  { %v8057_v6 = vpop.f32.mrf.mxu0  ;;  %v8062_v18 = vpop.f32.mrf.mxu1 }
 0xe0e   :  { %v5645_v6 = vsel %vm4269_vm10, %v5640_v39, 0  ;;  %v5711_v18 = vrot.slane %v9816_v7, 4 }
 0xe0f   :  { %v5358_v60 = vpop.f32.mrf.mxu1  ;;  %v5409_v2 = vpop.f32.mrf.mxu0 }
 0xe10   :  { %v5467_v22 = vsel %vm4362_vm11, %v5409_v2, -inf  ;;  %v5591_v60 = vrot.slane %v9714_v30, 4 }
 0xe11   :  { %v8063_v58 = vpop.f32.mrf.mxu1  ;;  %5468 = vmax.xlane.f32.xlu0 %v5467_v22  ;;  %v8068_v14 = vpop.f32.mrf.mxu0  ;;  %v5758_v22 = vrot.slane %v9821_v23, 4 }
 0xe12   :  { %v5639_v58 = vrot.slane %v9719_v13, 4 }
 0xe13   :  { %v5412_v57 = vpop.f32.mrf.mxu0  ;;  %v5461_v43 = vpop.f32.mrf.mxu1  ;;  %v5763_v14 = vsel %vm1308_vm8, %v5758_v22, 0 }
 0xe14   :  { %v5470_v20 = vsel %vm4362_vm11, %v5461_v43, -inf }
 0xe15   :  { %5471 = vmax.xlane.f32.xlu1 %v5470_v20  ;;  %v8069_v1 = vpop.f32.mrf.mxu0  ;;  %v8074_v25 = vpop.f32.mrf.mxu1 }
 0xe17   :  { %v5464_v44 = vpop.f32.mrf.mxu1 }
 0xe19   :  { %v8075_v12 = vpop.f32.mrf.mxu1 }
 0xe26   :  { %5541 = vrot.lane.b32.xlu1 %v7879_v8, %s9207_s4 }
 0xe9a   :  { %v5469_v54 = vpop.xlane.xlu0 %5468 }
 0xe9b   :  { %v5473_v35 = vsub.f32 %v5409_v2, %v5469_v54  ;;  %v5716_v2 = vsel %vm1308_vm8, %v5711_v18, 0 }
 0xe9d   :  { %v5475_v42 = vmul.f32 1.442695, %v5473_v35 }
 0xe9e   :  { %v5472_v17 = vpop.xlane.xlu1 %5471 }
 0xe9f   :  { %8988 = vpow2.f32 %v5475_v42  ;;  %v5474_v32 = vsub.f32 %v5461_v43, %v5472_v17 }
 0xea1   :  { %v5477_v36 = vmul.f32 1.442695, %v5474_v32 }
 0xea2   :  { %v5542_v55 = vpop.permute.xlu1 %5541 }
 0xea3   :  { %8990 = vpow2.f32 %v5477_v36  ;;  %v5547_v52 = vsel %vm1308_vm8, %v5542_v55, 0 }
 0xea4   :  { %8083 = vmatpush3.bf16.msra.mxu1 %v5547_v52 }
 0xea5   :  { %8094 = vmatprep.subr.bf16.mxu1 %v9205_v33 }
 0xeac   :  { %v8989_v4 = vpop.eup %8988 }
 0xead   :  { %v5479_v38 = vsel %vm4362_vm11, %v8989_v4, 0.0 }
 0xeae   :  { %5480 = vadd.xlane.f32.xlu0 %v5479_v38 }
 0xeb0   :  { %v8991_v37 = vpop.eup %8990 }
 0xeb1   :  { %v5482_v56 = vsel %vm4362_vm11, %v8991_v37, 0.0 }
 0xeb2   :  { %5483 = vadd.xlane.f32.xlu0 %v5482_v56 }
 0xec8   :  { %5492 = vrot.lane.b32.xlu0 %v7878_v34, %s9207_s4 }
 0xf37   :  { %v5481_v45 = vpop.xlane.xlu0 %5480 }
 0xf38   :  { %8992 = vrcp.f32 %v5481_v45 }
 0xf3b   :  { %v5484_v11 = vpop.xlane.xlu0 %5483 }
 0xf3c   :  { %8994 = vrcp.f32 %v5484_v11 }
 0xf3f   :  { %v5493_v29 = vpop.permute.xlu0 %5492 }
 0xf40   :  { %v5498_v31 = vsel %vm1308_vm8, %v5493_v29, 0 }
 0xf41   :  { %8077 = vmatpush3.bf16.msra.mxu0 %v5498_v31 }
 0xf42   :  { %8088 = vmatprep.subr.bf16.mxu0 %v9205_v33 }
 0xf45   :  { %v8993_v21 = vpop.eup %8992 }
 0xf46   :  { %v5487_v16 = vmul.f32 %v8993_v21, %v8989_v4 }
 0xf48   :  { %v5489_v19 = vpack.c.bf16 %v5487_v16, %v5487_v16 }
 0xf49   :  { %v8995_v15 = vpop.eup %8994 }
 0xf4a   :  { %8079 = vmatmul.mubr.msk.bf16.vlgmr.msra.gmra.mxu0 %vm4362_vm11, %v5489_v19  ;;  %v5488_v62 = vmul.f32 %v8995_v15, %v8991_v37 }
 0xf4b   :  { %8089 = vmatpush3.bf16.xpose.msra.mxu0 %v5597_v27  ;;  %8090 = vmatprep.mubr.msk.bf16.mxu0 %vm9206_vm9, %v9205_v33 }
 0xf4c   :  { %v5490_v5 = vpack.c.bf16 %v5488_v62, %v5488_v62  ;;  %8100 = vmatprep.subr.bf16.mxu0 %v9205_v33 }
 0xf4e   :  { %8085 = vmatmul.mubr.msk.bf16.vlgmr.msra.gmra.mxu1 %vm4362_vm11, %v5490_v5 }
 0xf4f   :  { %8095 = vmatpush3.bf16.xpose.msra.mxu1 %v5645_v6  ;;  %8096 = vmatprep.mubr.msk.bf16.mxu1 %vm9206_vm9, %v9205_v33 }
 0xf50   :  { %8106 = vmatprep.subr.bf16.mxu1 %v9205_v33 }
 0xf52   :  { %8091 = vmatmul.mubr.msk.bf16.vlgmr.msra.gmra.mxu0 %vm4269_vm10, %v5591_v60 }
 0xf53   :  { %8101 = vmatpush3.bf16.msra.mxu0 %v5716_v2  ;;  %8102 = vmatprep.mubr.msk.bf16.mxu0 %vm9206_vm9, %v9205_v33 }
 0xf54   :  { %8112 = vmatprep.subr.bf16.mxu0 %v9205_v33 }
 0xf56   :  { %8097 = vmatmul.mubr.msk.bf16.vlgmr.msra.gmra.mxu1 %vm4269_vm10, %v5639_v58 }
 0xf57   :  { %8107 = vmatpush3.bf16.msra.mxu1 %v5763_v14  ;;  %8108 = vmatprep.mubr.msk.bf16.mxu1 %vm9206_vm9, %v9205_v33 }
 0xf58   :  { %8118 = vmatprep.subr.bf16.mxu1 %v9205_v33 }
0x100a   :  { %v10053_v57 = vpop.f32.mrf.mxu0 }
0x100c   :  { %v8080_v43 = vpop.f32.mrf.mxu0 }
0x100e   :  { %v5537_v20 = vpop.f32.mrf.mxu0  ;;  %v10055_v1 = vpop.f32.mrf.mxu1 }
0x1010   :  { %v8081_v25 = vpop.f32.mrf.mxu0  ;;  %v8086_v44 = vpop.f32.mrf.mxu1 }
0x1012   :  { %v5586_v12 = vpop.f32.mrf.mxu1  ;;  %v5633_v8 = vpop.f32.mrf.mxu0 }
0x1013   :  { %v5687_v54 = vsel %vm4362_vm11, %v5633_v8, -inf }
0x1014   :  { %v8087_v35 = vpop.f32.mrf.mxu1  ;;  %5688 = vmax.xlane.f32.xlu1 %v5687_v54  ;;  %v8092_v42 = vpop.f32.mrf.mxu0 }
0x1016   :  { %v5636_v17 = vpop.f32.mrf.mxu0  ;;  %v5681_v32 = vpop.f32.mrf.mxu1 }
0x1017   :  { %v5690_v36 = vsel %vm4362_vm11, %v5681_v32, -inf }
0x1018   :  { %5691 = vmax.xlane.f32.xlu0 %v5690_v36  ;;  %v8093_v55 = vpop.f32.mrf.mxu0  ;;  %v8098_v52 = vpop.f32.mrf.mxu1 }
0x101a   :  { %v5684_v4 = vpop.f32.mrf.mxu1 }
0x101c   :  { %v8099_v38 = vpop.f32.mrf.mxu1 }
0x1025   :  { %5862 = vrot.lane.b32.xlu1 %v9791_v51, %s9207_s4 }
0x1029   :  { %5807 = vrot.lane.b32.xlu1 %v9714_v30, %s9207_s4 }
0x109d   :  { %v5689_v37 = vpop.xlane.xlu1 %5688 }
0x109e   :  { %v5693_v56 = vsub.f32 %v5633_v8, %v5689_v37 }
0x10a0   :  { %v5695_v34 = vmul.f32 1.442695, %v5693_v56 }
0x10a1   :  { %v5692_v45 = vpop.xlane.xlu0 %5691  ;;  %v5863_v30 = vpop.permute.xlu1 %5862 }
0x10a2   :  { %8996 = vpow2.f32 %v5695_v34  ;;  %v5694_v11 = vsub.f32 %v5681_v32, %v5692_v45  ;;  %v5864_v60 = vrot.slane %v5863_v30, 4  ;;  %v5151_v34 = vpack.c.bf16 %v9973_v63, %v9973_v63 }
0x10a3   :  { %v5152_v45 = vpack.c.bf16 %v9975_v10, %v9975_v10 }
0x10a4   :  { %v5697_v29 = vmul.f32 1.442695, %v5694_v11  ;;  %v5869_v22 = vsel %vm4269_vm10, %v5864_v60, 0  ;;  %v4708_v11 = vpack.c.bf16 %v9901_v9, %v9901_v9  ;;  %v4924_v9 = vpack.c.bf16 %v9933_v28, %v9933_v28 }
0x10a5   :  { %v5808_v51 = vpop.permute.xlu1 %5807 }
0x10a6   :  { %8998 = vpow2.f32 %v5697_v29  ;;  %v5809_v58 = vrot.slane %v5808_v51, 4 }
0x10af   :  { %v8997_v31 = vpop.eup %8996 }
0x10b0   :  { %v5699_v21 = vsel %vm4362_vm11, %v8997_v31, 0.0 }
0x10b1   :  { %5700 = vadd.xlane.f32.xlu0 %v5699_v21 }
0x10b3   :  { %v8999_v16 = vpop.eup %8998 }
0x10b4   :  { %v5702_v53 = vsel %vm4362_vm11, %v8999_v16, 0.0 }
0x10b5   :  { %5703 = vadd.xlane.f32.xlu1 %v5702_v53 }
0x10c6   :  { %5859 = vrot.lane.b32.xlu1 %v9719_v13, %s9207_s4 }
0x10c7   :  { %5810 = vrot.lane.b32.xlu0 %v9786_v61, %s9207_s4 }
0x113a   :  { %v5701_v19 = vpop.xlane.xlu0 %5700 }
0x113b   :  { %9000 = vrcp.f32 %v5701_v19  ;;  %v4923_v19 = vpack.c.bf16 %v9931_v24, %v9931_v24  ;;  %v4707_v24 = vpack.c.bf16 %v9899_v59, %v9899_v59 }
0x113e   :  { %v5704_v15 = vpop.xlane.xlu1 %5703  ;;  %v5811_v27 = vpop.permute.xlu0 %5810 }
0x113f   :  { %9002 = vrcp.f32 %v5704_v15  ;;  %v5812_v39 = vrot.slane %v5811_v27, 4 }
0x1141   :  { %v5817_v2 = vsel %vm4269_vm10, %v5812_v39, 0 }
0x1142   :  { %v5860_v14 = vpop.permute.xlu1 %5859 }
0x1143   :  { %v5861_v43 = vrot.slane %v5860_v14, 4  ;;  %v4479_v14 = vpack.c.bf16 %v9855_v41, %v9855_v41 }
0x1148   :  { %v9001_v62 = vpop.eup %9000 }
0x1149   :  { %v5707_v5 = vmul.f32 %v9001_v62, %v8997_v31 }
0x114b   :  { %v5709_v6 = vpack.c.bf16 %v5707_v5, %v5707_v5 }
0x114c   :  { %v9003_v18 = vpop.eup %9002 }
0x114d   :  { %8103 = vmatmul.mubr.msk.bf16.vlgmr.msra.gmra.mxu0 %vm4362_vm11, %v5709_v6  ;;  %v5708_v13 = vmul.f32 %v9003_v18, %v8999_v16 }
0x114e   :  { %8113 = vmatpush3.bf16.xpose.msra.mxu0 %v5817_v2  ;;  %8114 = vmatprep.mubr.msk.bf16.mxu0 %vm9206_vm9, %v9205_v33 }
0x114f   :  { %v5710_v61 = vpack.c.bf16 %v5708_v13, %v5708_v13  ;;  %8124 = vmatprep.subr.bf16.mxu0 %v9205_v33 }
0x1151   :  { %8109 = vmatmul.mubr.msk.bf16.vlgmr.msra.gmra.mxu1 %vm4362_vm11, %v5710_v61 }
0x1152   :  { %8119 = vmatpush3.bf16.xpose.msra.mxu1 %v5869_v22  ;;  %8120 = vmatprep.mubr.msk.bf16.mxu1 %vm9206_vm9, %v9205_v33  ;;  %v8742_v22 = vld [vmem:[#allocation11 + $0xe4] ss:$16 sps:$4 sm:$0xff]  }
0x1153   :  { %8130 = vmatprep.subr.bf16.mxu1 %v9205_v33 }
0x1155   :  { %8115 = vmatmul.mubr.msk.bf16.vlgmr.msra.gmra.mxu0 %vm4269_vm10, %v5809_v58 }
0x1156   :  { %8126 = vmatprep.mubr.msk.bf16.mxu0 %vm9206_vm9, %v9205_v33 }
0x1159   :  { %8121 = vmatmul.mubr.msk.bf16.vlgmr.msra.gmra.mxu1 %vm4269_vm10, %v5861_v43  ;;  %v4480_v43 = vpack.c.bf16 %v9857_v50, %v9857_v50 }
0x115a   :  { %8132 = vmatprep.mubr.msk.bf16.mxu1 %vm9206_vm9, %v9205_v33 }
0x120d   :  { %v10085_v20 = vpop.f32.mrf.mxu0 }
0x120f   :  { %v8104_v25 = vpop.f32.mrf.mxu0 }
0x1211   :  { %v5755_v44 = vpop.f32.mrf.mxu0  ;;  %v10087_v12 = vpop.f32.mrf.mxu1 }
0x1213   :  { %v8105_v8 = vpop.f32.mrf.mxu0  ;;  %v8110_v54 = vpop.f32.mrf.mxu1 }
0x1215   :  { %v5802_v35 = vpop.f32.mrf.mxu1  ;;  %v5853_v42 = vpop.f32.mrf.mxu0 }
0x1216   :  { %v5911_v17 = vsel %vm4362_vm11, %v5853_v42, -inf }
0x1217   :  { %v8111_v32 = vpop.f32.mrf.mxu1  ;;  %5912 = vmax.xlane.f32.xlu0 %v5911_v17  ;;  %v8116_v36 = vpop.f32.mrf.mxu0 }
0x1218   :  { %v8745_v32 = vld [vmem:[#allocation11 + $0xc4] ss:$16 sps:$4 sm:$0xff]   ;;  %v8743_v36 = vld [vmem:[#allocation11 + $0xc0] ss:$16 sps:$4 sm:$0xff]  }
0x1219   :  { %v5856_v55 = vpop.f32.mrf.mxu0  ;;  %v5905_v52 = vpop.f32.mrf.mxu1 }
0x121a   :  { %v5914_v4 = vsel %vm4362_vm11, %v5905_v52, -inf }
0x121b   :  { %5915 = vmax.xlane.f32.xlu1 %v5914_v4  ;;  %v8117_v33 = vpop.f32.mrf.mxu0  ;;  %v8122_v38 = vpop.f32.mrf.mxu1  ;;  %v8746_v4 = vld [vmem:[#allocation11 + $0xa0] ss:$16 sps:$4 sm:$0xff]  }
0x121c   :  { %v8751_v33 = vld [vmem:[#allocation11 + $0x84] ss:$16 sps:$4 sm:$0xff]   ;;  %v8749_v38 = vld [vmem:[#allocation11 + $0x80] ss:$16 sps:$4 sm:$0xff]  }
0x121d   :  { %v5908_v37 = vpop.f32.mrf.mxu1 }
0x121e   :  { %v8754_v37 = vld [vmem:[#allocation11 + $0x64] ss:$16 sps:$4 sm:$0xff]  }
0x121f   :  { %v8123_v56 = vpop.f32.mrf.mxu1 }
0x1220   :  { %v8752_v56 = vld [vmem:[#allocation11 + $0x60] ss:$16 sps:$4 sm:$0xff]  }
0x122c   :  { %5984 = vrot.lane.b32.xlu1 %v9821_v23, %s9207_s4 }
0x1230   :  { %6043 = vrot.lane.b32.xlu1 %v5151_v34, %s9207_s4  ;;  %v8757_v34 = vld [vmem:[#allocation11 + $0x44] ss:$16 sps:$4 sm:$0xff]  }
0x1234   :  { %6045 = vrot.lane.b32.xlu1 %v5152_v45, %s9207_s4  ;;  %v8755_v45 = vld [vmem:[#allocation11 + $0x40] ss:$16 sps:$4 sm:$0xff]  }
0x1238   :  { %6039 = vrot.lane.b32.xlu1 %v4708_v11, %s9207_s4  ;;  %v8760_v11 = vld [vmem:[#allocation11 + $0x24] ss:$16 sps:$4 sm:$0xff]  }
0x12a0   :  { %v5913_v29 = vpop.xlane.xlu0 %5912 }
0x12a1   :  { %v5917_v31 = vsub.f32 %v5853_v42, %v5913_v29  ;;  %v8740_v42 = vld [vmem:[#allocation11 + $0xe0] ss:$16 sps:$4 sm:$0xff]  }
0x12a2   :  { %v8758_v29 = vld [vmem:[#allocation11 + $0x20] ss:$16 sps:$4 sm:$0xff]  }
0x12a3   :  { %v5919_v21 = vmul.f32 1.442695, %v5917_v31  ;;  %v8763_v31 = vld [vmem:[#allocation11 + $0x4] ss:$16 sps:$4 sm:$0xff]  }
0x12a4   :  { %v5916_v16 = vpop.xlane.xlu1 %5915 }
0x12a5   :  { %9004 = vpow2.f32 %v5919_v21  ;;  %v5918_v23 = vsub.f32 %v5905_v52, %v5916_v16  ;;  %v8748_v52 = vld [vmem:[#allocation11 + $0xa4] ss:$16 sps:$4 sm:$0xff]   ;;  %v8761_v21 = vld [vmem:[#allocation11] ss:$16 sps:$4 sm:$0xff]  }
0x12a6   :  { %v8766_v16 = vld [vmem:[#allocation11 + $0x1e4] ss:$16 sps:$4 sm:$0xff]  }
0x12a7   :  { %v5921_v53 = vmul.f32 1.442695, %v5918_v23  ;;  %v8764_v23 = vld [vmem:[#allocation11 + $0x1e0] ss:$16 sps:$4 sm:$0xff]  }
0x12a8   :  { %v5985_v63 = vpop.permute.xlu1 %5984 }
0x12a9   :  { %9006 = vpow2.f32 %v5921_v53  ;;  %v5986_v30 = vrot.slane %v5985_v63, 4  ;;  %v8769_v53 = vld [vmem:[#allocation11 + $0x1c4] ss:$16 sps:$4 sm:$0xff]   ;;  %v8767_v63 = vld [vmem:[#allocation11 + $0x1c0] ss:$16 sps:$4 sm:$0xff]  }
0x12ab   :  { %v5991_v51 = vsel %vm1308_vm8, %v5986_v30, 0  ;;  %v8772_v30 = vld [vmem:[#allocation11 + $0x1a4] ss:$16 sps:$4 sm:$0xff]  }
0x12ac   :  { %8131 = vmatpush3.bf16.msra.mxu1 %v5991_v51  ;;  %v6044_v10 = vpop.permute.xlu1 %6043  ;;  %v8770_v51 = vld [vmem:[#allocation11 + $0x1a0] ss:$16 sps:$4 sm:$0xff]  }
0x12ad   :  { %v6067_v27 = vsel %vm4269_vm10, %v4923_v19, %v6044_v10  ;;  %v8775_v10 = vld [vmem:[#allocation11 + $0x184] ss:$16 sps:$4 sm:$0xff]   ;;  %v8773_v19 = vld [vmem:[#allocation11 + $0x180] ss:$16 sps:$4 sm:$0xff]  }
0x12b0   :  { %v6046_v15 = vpop.permute.xlu1 %6045 }
0x12b1   :  { %v6070_v62 = vsel %vm4269_vm10, %v4924_v9, %v6046_v15  ;;  %v8778_v9 = vld [vmem:[#allocation11 + $0x164] ss:$16 sps:$4 sm:$0xff]   ;;  %v8776_v15 = vld [vmem:[#allocation11 + $0x160] ss:$16 sps:$4 sm:$0xff]  }
0x12b2   :  { %v9005_v39 = vpop.eup %9004  ;;  %v10109_v5 = vcombine.low %v6067_v27, %v6070_v62  ;;  %v8781_v27 = vld [vmem:[#allocation11 + $0x144] ss:$16 sps:$4 sm:$0xff]   ;;  %v8779_v62 = vld [vmem:[#allocation11 + $0x140] ss:$16 sps:$4 sm:$0xff]  }
0x12b3   :  { %v5923_v6 = vsel %vm4362_vm11, %v9005_v39, 0.0 }
0x12b4   :  { %5924 = vadd.xlane.f32.xlu0 %v5923_v6  ;;  %v6040_v58 = vpop.permute.xlu1 %6039  ;;  %v8782_v6 = vld [vmem:[#allocation11 + $0x120] ss:$16 sps:$4 sm:$0xff]  }
0x12b5   :  { %v6064_v25 = vsel %vm4269_vm10, %v4480_v43, %v6040_v58  ;;  %v8799_v58 = vld [vmem:[#allocation11 + $0x8c] ss:$16 sps:$4 sm:$0xff]  }
0x12b6   :  { %v9007_v18 = vpop.eup %9006  ;;  %v8802_v43 = vld [vmem:[#allocation11 + $0x6c] ss:$16 sps:$4 sm:$0xff]  }
0x12b7   :  { %v5926_v60 = vsel %vm4362_vm11, %v9007_v18, 0.0 }
0x12b8   :  { %5927 = vadd.xlane.f32.xlu0 %v5926_v60  ;;  %v8785_v60 = vld [vmem:[#allocation11 + $0x100] ss:$16 sps:$4 sm:$0xff]  }
0x12ce   :  { %5935 = vrot.lane.b32.xlu0 %v9816_v7, %s9207_s4 }
0x12d2   :  { %6037 = vrot.lane.b32.xlu0 %v4707_v24, %s9207_s4  ;;  %v8790_v24 = vld [vmem:[#allocation11 + $0xec] ss:$16 sps:$4 sm:$0xff]  }
0x133d   :  { %v5925_v28 = vpop.xlane.xlu0 %5924 }
0x133e   :  { %9008 = vrcp.f32 %v5925_v28  ;;  %v8788_v28 = vld [vmem:[#allocation11 + $0xe8] ss:$16 sps:$4 sm:$0xff]  }
0x1341   :  { %v5928_v2 = vpop.xlane.xlu0 %5927 }
0x1342   :  { %9010 = vrcp.f32 %v5928_v2  ;;  %v8793_v2 = vld [vmem:[#allocation11 + $0xcc] ss:$16 sps:$4 sm:$0xff]  }
0x1345   :  { %v5936_v13 = vpop.permute.xlu0 %5935 }
0x1346   :  { %v5937_v61 = vrot.slane %v5936_v13, 4  ;;  %v8791_v13 = vld [vmem:[#allocation11 + $0xc8] ss:$16 sps:$4 sm:$0xff]  }
0x1348   :  { %v5942_v7 = vsel %vm1308_vm8, %v5937_v61, 0  ;;  %v8796_v61 = vld [vmem:[#allocation11 + $0xac] ss:$16 sps:$4 sm:$0xff]  }
0x1349   :  { %8125 = vmatpush3.bf16.msra.mxu0 %v5942_v7  ;;  %v6038_v59 = vpop.permute.xlu0 %6037  ;;  %v8800_v7 = vld [vmem:[#allocation11 + $0x68] ss:$16 sps:$4 sm:$0xff]  }
0x134a   :  { %v6061_v44 = vsel %vm4269_vm10, %v4479_v14, %v6038_v59  ;;  %6897 = vmatprep.subr.bf16.mxu0 %v8742_v22  ;;  %v8794_v22 = vld [vmem:[#allocation11 + $0xa8] ss:$16 sps:$4 sm:$0xff]   ;;  %v8805_v59 = vld [vmem:[#allocation11 + $0x4c] ss:$16 sps:$4 sm:$0xff]  }
0x134b   :  { %v9009_v8 = vpop.eup %9008  ;;  %v10125_v54 = vcombine.low %v6061_v44, %v6064_v25  ;;  %v8797_v14 = vld [vmem:[#allocation11 + $0x88] ss:$16 sps:$4 sm:$0xff]   ;;  %v8808_v44 = vld [vmem:[#allocation11 + $0x2c] ss:$16 sps:$4 sm:$0xff]  }
0x134c   :  { %v5931_v35 = vmul.f32 %v9009_v8, %v9005_v39  ;;  %v8784_v39 = vld [vmem:[#allocation11 + $0x124] ss:$16 sps:$4 sm:$0xff]   ;;  %v8803_v25 = vld [vmem:[#allocation11 + $0x48] ss:$16 sps:$4 sm:$0xff]   ;;  %v8811_v8 = vld [vmem:[#allocation11 + $0xc] ss:$16 sps:$4 sm:$0xff]  }
0x134e   :  { %v5933_v17 = vpack.c.bf16 %v5931_v35, %v5931_v35  ;;  %v8809_v35 = vld [vmem:[#allocation11 + $0x8] ss:$16 sps:$4 sm:$0xff]  }
0x134f   :  { %v9011_v41 = vpop.eup %9010 }
0x1350   :  { %8127 = vmatmul.mubr.msk.bf16.vlgmr.msra.gmra.mxu0 %vm4362_vm11, %v5933_v17  ;;  %v5932_v50 = vmul.f32 %v9011_v41, %v9007_v18  ;;  %v8787_v18 = vld [vmem:[#allocation11 + $0x104] ss:$16 sps:$4 sm:$0xff]   ;;  %v8812_v17 = vld [vmem:[#allocation11 + $0x1e8] ss:$16 sps:$4 sm:$0xff]  }
0x1351   :  { %6898 = vmatpush1.bf16.msra.mxu0 %v8740_v42  ;;  %6929 = vmatprep.mubr.bf16.mxu0 %v10109_v5  ;;  %v8814_v42 = vld [vmem:[#allocation11 + $0x1ec] ss:$16 sps:$4 sm:$0xff]   ;;  %v8815_v41 = vld [vmem:[#allocation11 + $0x1c8] ss:$16 sps:$4 sm:$0xff]  }
0x1352   :  { %6899 = vmatprep.subr.bf16.mxu0 %v8745_v32  ;;  %v5934_v55 = vpack.c.bf16 %v5932_v50, %v5932_v50  ;;  %v8817_v32 = vld [vmem:[#allocation11 + $0x1cc] ss:$16 sps:$4 sm:$0xff]  }
0x1353   :  { %v8820_v50 = vld [vmem:[#allocation11 + $0x1ac] ss:$16 sps:$4 sm:$0xff]  }
0x1354   :  { %8133 = vmatmul.mubr.msk.bf16.vlgmr.msra.gmra.mxu1 %vm4362_vm11, %v5934_v55  ;;  %v8823_v55 = vld [vmem:[#allocation11 + $0x18c] ss:$16 sps:$4 sm:$0xff]  }
0x1355   :  { %6900 = vmatpush1.bf16.msra.mxu0 %v8743_v36  ;;  %v8818_v36 = vld [vmem:[#allocation11 + $0x1a8] ss:$16 sps:$4 sm:$0xff]  }
0x1356   :  { %6901 = vmatprep.subr.bf16.mxu0 %v8748_v52  ;;  %v8821_v52 = vld [vmem:[#allocation11 + $0x188] ss:$16 sps:$4 sm:$0xff]  }
0x1359   :  { %6902 = vmatpush1.bf16.msra.mxu0 %v8746_v4  ;;  %v8826_v4 = vld [vmem:[#allocation11 + $0x16c] ss:$16 sps:$4 sm:$0xff]  }
0x135a   :  { %6903 = vmatprep.subr.bf16.mxu0 %v8751_v33  ;;  %v8824_v33 = vld [vmem:[#allocation11 + $0x168] ss:$16 sps:$4 sm:$0xff]  }
0x135d   :  { %6904 = vmatpush1.bf16.msra.mxu0 %v8749_v38  ;;  %v8829_v38 = vld [vmem:[#allocation11 + $0x14c] ss:$16 sps:$4 sm:$0xff]  }
0x135e   :  { %6905 = vmatprep.subr.bf16.mxu0 %v8754_v37  ;;  %v8827_v37 = vld [vmem:[#allocation11 + $0x148] ss:$16 sps:$4 sm:$0xff]  }
0x1361   :  { %6906 = vmatpush1.bf16.msra.mxu0 %v8752_v56  ;;  %v8832_v56 = vld [vmem:[#allocation11 + $0x12c] ss:$16 sps:$4 sm:$0xff]  }
0x1362   :  { %6907 = vmatprep.subr.bf16.mxu0 %v8757_v34  ;;  %v8830_v34 = vld [vmem:[#allocation11 + $0x128] ss:$16 sps:$4 sm:$0xff]  }
0x1365   :  { %6908 = vmatpush1.bf16.msra.mxu0 %v8755_v45  ;;  %v8835_v45 = vld [vmem:[#allocation11 + $0x10c] ss:$16 sps:$4 sm:$0xff]  }
0x1366   :  { %6909 = vmatprep.subr.bf16.mxu0 %v8760_v11  ;;  %v8833_v11 = vld [vmem:[#allocation11 + $0x108] ss:$16 sps:$4 sm:$0xff]  }
0x1369   :  { %6910 = vmatpush1.bf16.msra.mxu0 %v8758_v29  ;;  %v8836_v29 = vld [vmem:[#allocation11 + $0x2e0] ss:$16 sps:$4 sm:$0xff]  }
0x136a   :  { %6911 = vmatprep.subr.bf16.mxu0 %v8763_v31  ;;  %v8838_v31 = vld [vmem:[#allocation11 + $0x2e4] ss:$16 sps:$4 sm:$0xff]  }
0x136b   :  { %6940 = vmatprep.subr.bf16.mxu1 %v8838_v31 }
0x136c   :  { %6941 = vmatpush1.bf16.msra.mxu1 %v8836_v29  ;;  %v5362_v29 = vpack.c.bf16 %v10011_v26, %v10011_v26  ;;  %v8895_v26 = vld [vmem:[#allocation11 + $0x28c] ss:$16 sps:$4 sm:$0xff]  }
0x136d   :  { %6912 = vmatpush1.bf16.msra.mxu0 %v8761_v21  ;;  %v8839_v21 = vld [vmem:[#allocation11 + $0x2c0] ss:$16 sps:$4 sm:$0xff]  }
0x136e   :  { %6913 = vmatprep.subr.bf16.mxu0 %v8766_v16  ;;  %v8841_v16 = vld [vmem:[#allocation11 + $0x2c4] ss:$16 sps:$4 sm:$0xff]  }
0x136f   :  { %6942 = vmatprep.subr.bf16.mxu1 %v8841_v16 }
0x1370   :  { %6943 = vmatpush1.bf16.msra.mxu1 %v8839_v21 }
0x1371   :  { %6914 = vmatpush2.bf16.msra.mxu0 %v8764_v23  ;;  %v8844_v23 = vld [vmem:[#allocation11 + $0x2a4] ss:$16 sps:$4 sm:$0xff]  }
0x1372   :  { %6915 = vmatprep.subr.bf16.mxu0 %v8769_v53  ;;  %v8842_v53 = vld [vmem:[#allocation11 + $0x2a0] ss:$16 sps:$4 sm:$0xff]   ;;  %6944 = vmatprep.subr.bf16.mxu1 %v8844_v23  ;;  %v8889_v23 = vld [vmem:[#allocation11 + $0x2cc] ss:$16 sps:$4 sm:$0xff]  }
0x1374   :  { %6945 = vmatpush1.bf16.msra.mxu1 %v8842_v53  ;;  %v8887_v53 = vld [vmem:[#allocation11 + $0x2c8] ss:$16 sps:$4 sm:$0xff]  }
0x1375   :  { %6916 = vmatpush2.bf16.msra.mxu0 %v8767_v63  ;;  %v8847_v63 = vld [vmem:[#allocation11 + $0x284] ss:$16 sps:$4 sm:$0xff]  }
0x1376   :  { %6917 = vmatprep.subr.bf16.mxu0 %v8772_v30  ;;  %v8845_v30 = vld [vmem:[#allocation11 + $0x280] ss:$16 sps:$4 sm:$0xff]   ;;  %6946 = vmatprep.subr.bf16.mxu1 %v8847_v63  ;;  %v8890_v63 = vld [vmem:[#allocation11 + $0x2a8] ss:$16 sps:$4 sm:$0xff]  }
0x1378   :  { %6947 = vmatpush1.bf16.msra.mxu1 %v8845_v30  ;;  %v8893_v30 = vld [vmem:[#allocation11 + $0x288] ss:$16 sps:$4 sm:$0xff]  }
0x1379   :  { %6918 = vmatpush2.bf16.msra.mxu0 %v8770_v51  ;;  %v8850_v51 = vld [vmem:[#allocation11 + $0x264] ss:$16 sps:$4 sm:$0xff]  }
0x137a   :  { %6919 = vmatprep.subr.bf16.mxu0 %v8775_v10  ;;  %v8848_v10 = vld [vmem:[#allocation11 + $0x260] ss:$16 sps:$4 sm:$0xff]   ;;  %6948 = vmatprep.subr.bf16.mxu1 %v8850_v51  ;;  %v8898_v51 = vld [vmem:[#allocation11 + $0x26c] ss:$16 sps:$4 sm:$0xff]  }
0x137c   :  { %6949 = vmatpush1.bf16.msra.mxu1 %v8848_v10  ;;  %v8896_v10 = vld [vmem:[#allocation11 + $0x268] ss:$16 sps:$4 sm:$0xff]  }
0x137d   :  { %6920 = vmatpush2.bf16.msra.mxu0 %v8773_v19  ;;  %v8851_v19 = vld [vmem:[#allocation11 + $0x240] ss:$16 sps:$4 sm:$0xff]  }
0x137e   :  { %6921 = vmatprep.subr.bf16.mxu0 %v8778_v9  ;;  %v8856_v9 = vld [vmem:[#allocation11 + $0x224] ss:$16 sps:$4 sm:$0xff]  }
0x1381   :  { %6922 = vmatpush2.bf16.msra.mxu0 %v8776_v15  ;;  %v8854_v15 = vld [vmem:[#allocation11 + $0x220] ss:$16 sps:$4 sm:$0xff]  }
0x1382   :  { %6923 = vmatprep.subr.bf16.mxu0 %v8781_v27  ;;  %v8859_v27 = vld [vmem:[#allocation11 + $0x204] ss:$16 sps:$4 sm:$0xff]  }
0x1385   :  { %6924 = vmatpush2.bf16.msra.mxu0 %v8779_v62  ;;  %v8857_v62 = vld [vmem:[#allocation11 + $0x200] ss:$16 sps:$4 sm:$0xff]  }
0x1386   :  { %6925 = vmatprep.subr.bf16.mxu0 %v8784_v39  ;;  %v8862_v39 = vld [vmem:[#allocation11 + $0x3e4] ss:$16 sps:$4 sm:$0xff]  }
0x1389   :  { %6926 = vmatpush2.bf16.msra.mxu0 %v8782_v6  ;;  %v8860_v6 = vld [vmem:[#allocation11 + $0x3e0] ss:$16 sps:$4 sm:$0xff]  }
0x138a   :  { %6927 = vmatprep.subr.bf16.mxu0 %v8787_v18  ;;  %v8865_v18 = vld [vmem:[#allocation11 + $0x3c4] ss:$16 sps:$4 sm:$0xff]  }
0x138d   :  { %6928 = vmatpush2.bf16.msra.mxu0 %v8785_v60  ;;  %v8863_v60 = vld [vmem:[#allocation11 + $0x3c0] ss:$16 sps:$4 sm:$0xff]  }
0x138e   :  { %6983 = vmatprep.subr.bf16.mxu0 %v8790_v24  ;;  %v8868_v24 = vld [vmem:[#allocation11 + $0x3a4] ss:$16 sps:$4 sm:$0xff]  }
0x1390   :  { %6930 = vmatmul.mubr.bf16.vlgmr.msra.gmra.mxu0 %v10125_v54 }
0x1391   :  { %6984 = vmatpush1.bf16.msra.mxu0 %v8788_v28  ;;  %7015 = vmatprep.mubr.bf16.mxu0 %v10109_v5  ;;  %v8806_v5 = vld [vmem:[#allocation11 + $0x28] ss:$16 sps:$4 sm:$0xff]   ;;  %v8866_v28 = vld [vmem:[#allocation11 + $0x3a0] ss:$16 sps:$4 sm:$0xff]  }
0x1392   :  { %6985 = vmatprep.subr.bf16.mxu0 %v8793_v2  ;;  %v8871_v2 = vld [vmem:[#allocation11 + $0x384] ss:$16 sps:$4 sm:$0xff]  }
0x1395   :  { %6986 = vmatpush1.bf16.msra.mxu0 %v8791_v13  ;;  %v8869_v13 = vld [vmem:[#allocation11 + $0x380] ss:$16 sps:$4 sm:$0xff]  }
0x1396   :  { %6987 = vmatprep.subr.bf16.mxu0 %v8796_v61  ;;  %v8874_v61 = vld [vmem:[#allocation11 + $0x364] ss:$16 sps:$4 sm:$0xff]  }
0x1399   :  { %6988 = vmatpush1.bf16.msra.mxu0 %v8794_v22  ;;  %v8872_v22 = vld [vmem:[#allocation11 + $0x360] ss:$16 sps:$4 sm:$0xff]  }
0x139a   :  { %6989 = vmatprep.subr.bf16.mxu0 %v8799_v58  ;;  %v8877_v58 = vld [vmem:[#allocation11 + $0x344] ss:$16 sps:$4 sm:$0xff]  }
0x139d   :  { %6990 = vmatpush1.bf16.msra.mxu0 %v8797_v14  ;;  %v8875_v14 = vld [vmem:[#allocation11 + $0x340] ss:$16 sps:$4 sm:$0xff]  }
0x139e   :  { %6991 = vmatprep.subr.bf16.mxu0 %v8802_v43  ;;  %v8880_v43 = vld [vmem:[#allocation11 + $0x324] ss:$16 sps:$4 sm:$0xff]  }
0x13a1   :  { %6992 = vmatpush1.bf16.msra.mxu0 %v8800_v7  ;;  %v8878_v7 = vld [vmem:[#allocation11 + $0x320] ss:$16 sps:$4 sm:$0xff]  }
0x13a2   :  { %6993 = vmatprep.subr.bf16.mxu0 %v8805_v59  ;;  %v8883_v59 = vld [vmem:[#allocation11 + $0x304] ss:$16 sps:$4 sm:$0xff]  }
0x13a5   :  { %6994 = vmatpush1.bf16.msra.mxu0 %v8803_v25  ;;  %v8881_v25 = vld [vmem:[#allocation11 + $0x300] ss:$16 sps:$4 sm:$0xff]  }
0x13a6   :  { %6995 = vmatprep.subr.bf16.mxu0 %v8808_v44 }
0x13a9   :  { %6996 = vmatpush1.bf16.msra.mxu0 %v8806_v5 }
0x13aa   :  { %6997 = vmatprep.subr.bf16.mxu0 %v8811_v8  ;;  %v8886_v8 = vld [vmem:[#allocation11 + $0x2ec] ss:$16 sps:$4 sm:$0xff]  }
0x13ad   :  { %6998 = vmatpush1.bf16.msra.mxu0 %v8809_v35 }
0x13ae   :  { %6999 = vmatprep.subr.bf16.mxu0 %v8814_v42 }
0x13b1   :  { %7000 = vmatpush2.bf16.msra.mxu0 %v8812_v17 }
0x13b2   :  { %7001 = vmatprep.subr.bf16.mxu0 %v8817_v32  ;;  %v5589_v32 = vpack.c.bf16 %v10053_v57, %v10053_v57  ;;  %v5806_v57 = vpack.c.bf16 %v10087_v12, %v10087_v12  ;;  %v8884_v12 = vld [vmem:[#allocation11 + $0x2e8] ss:$16 sps:$4 sm:$0xff]  }
0x13b5   :  { %7002 = vmatpush2.bf16.msra.mxu0 %v8815_v41 }
0x13b6   :  { %7003 = vmatprep.subr.bf16.mxu0 %v8820_v50 }
0x13b9   :  { %7004 = vmatpush2.bf16.msra.mxu0 %v8818_v36 }
0x13ba   :  { %7005 = vmatprep.subr.bf16.mxu0 %v8823_v55 }
0x13bd   :  { %7006 = vmatpush2.bf16.msra.mxu0 %v8821_v52  ;;  %v5590_v52 = vpack.c.bf16 %v10055_v1, %v10055_v1  ;;  %v5361_v1 = vpack.c.bf16 %v10009_v40, %v10009_v40  ;;  %v8892_v40 = vld [vmem:[#allocation11 + $0x2ac] ss:$16 sps:$4 sm:$0xff]  }
0x13be   :  { %7007 = vmatprep.subr.bf16.mxu0 %v8826_v4 }
0x13c1   :  { %7008 = vmatpush2.bf16.msra.mxu0 %v8824_v33 }
0x13c2   :  { %7009 = vmatprep.subr.bf16.mxu0 %v8829_v38  ;;  %v5805_v38 = vpack.c.bf16 %v10085_v20, %v10085_v20 }
0x13c5   :  { %7010 = vmatpush2.bf16.msra.mxu0 %v8827_v37 }
0x13c6   :  { %7011 = vmatprep.subr.bf16.mxu0 %v8832_v56 }
0x13c9   :  { %7012 = vmatpush2.bf16.msra.mxu0 %v8830_v34 }
0x13ca   :  { %7013 = vmatprep.subr.bf16.mxu0 %v8835_v45 }
0x13cd   :  { %7014 = vmatpush2.bf16.msra.mxu0 %v8833_v11 }
0x13d0   :  { %7016 = vmatmul.mubr.bf16.vlgmr.msra.gmra.mxu0 %v10125_v54  ;;  %v8853_v54 = vld [vmem:[#allocation11 + $0x244] ss:$16 sps:$4 sm:$0xff]  }
0x13d1   :  { %6950 = vmatprep.subr.bf16.mxu1 %v8853_v54  ;;  %v8901_v54 = vld [vmem:[#allocation11 + $0x24c] ss:$16 sps:$4 sm:$0xff]  }
0x13d2   :  { %6951 = vmatpush1.bf16.msra.mxu1 %v8851_v19  ;;  %v8899_v19 = vld [vmem:[#allocation11 + $0x248] ss:$16 sps:$4 sm:$0xff]  }
0x13d3   :  { %6952 = vmatprep.subr.bf16.mxu1 %v8856_v9  ;;  %v8904_v9 = vld [vmem:[#allocation11 + $0x22c] ss:$16 sps:$4 sm:$0xff]  }
0x13d6   :  { %6953 = vmatpush1.bf16.msra.mxu1 %v8854_v15  ;;  %v8902_v15 = vld [vmem:[#allocation11 + $0x228] ss:$16 sps:$4 sm:$0xff]  }
0x13d7   :  { %6954 = vmatprep.subr.bf16.mxu1 %v8859_v27  ;;  %v8907_v27 = vld [vmem:[#allocation11 + $0x20c] ss:$16 sps:$4 sm:$0xff]  }
0x13da   :  { %6955 = vmatpush1.bf16.msra.mxu1 %v8857_v62  ;;  %v8905_v62 = vld [vmem:[#allocation11 + $0x208] ss:$16 sps:$4 sm:$0xff]  }
0x13db   :  { %6956 = vmatprep.subr.bf16.mxu1 %v8862_v39  ;;  %v8910_v39 = vld [vmem:[#allocation11 + $0x3ec] ss:$16 sps:$4 sm:$0xff]  }
0x13de   :  { %6957 = vmatpush2.bf16.msra.mxu1 %v8860_v6  ;;  %v8908_v6 = vld [vmem:[#allocation11 + $0x3e8] ss:$16 sps:$4 sm:$0xff]  }
0x13df   :  { %6958 = vmatprep.subr.bf16.mxu1 %v8865_v18  ;;  %v8913_v18 = vld [vmem:[#allocation11 + $0x3cc] ss:$16 sps:$4 sm:$0xff]  }
0x13e2   :  { %6959 = vmatpush2.bf16.msra.mxu1 %v8863_v60  ;;  %v8911_v60 = vld [vmem:[#allocation11 + $0x3c8] ss:$16 sps:$4 sm:$0xff]  }
0x13e3   :  { %6960 = vmatprep.subr.bf16.mxu1 %v8868_v24  ;;  %v8916_v24 = vld [vmem:[#allocation11 + $0x3ac] ss:$16 sps:$4 sm:$0xff]  }
0x13e6   :  { %6961 = vmatpush2.bf16.msra.mxu1 %v8866_v28  ;;  %v8914_v28 = vld [vmem:[#allocation11 + $0x3a8] ss:$16 sps:$4 sm:$0xff]  }
0x13e7   :  { %6962 = vmatprep.subr.bf16.mxu1 %v8871_v2  ;;  %v8919_v2 = vld [vmem:[#allocation11 + $0x38c] ss:$16 sps:$4 sm:$0xff]  }
0x13ea   :  { %6963 = vmatpush2.bf16.msra.mxu1 %v8869_v13  ;;  %v8917_v13 = vld [vmem:[#allocation11 + $0x388] ss:$16 sps:$4 sm:$0xff]  }
0x13eb   :  { %6964 = vmatprep.subr.bf16.mxu1 %v8874_v61  ;;  %v8922_v61 = vld [vmem:[#allocation11 + $0x36c] ss:$16 sps:$4 sm:$0xff]  }
0x13ee   :  { %6965 = vmatpush2.bf16.msra.mxu1 %v8872_v22  ;;  %v8920_v22 = vld [vmem:[#allocation11 + $0x368] ss:$16 sps:$4 sm:$0xff]  }
0x13ef   :  { %6966 = vmatprep.subr.bf16.mxu1 %v8877_v58  ;;  %v8925_v58 = vld [vmem:[#allocation11 + $0x34c] ss:$16 sps:$4 sm:$0xff]  }
0x13f2   :  { %6967 = vmatpush2.bf16.msra.mxu1 %v8875_v14  ;;  %v8923_v14 = vld [vmem:[#allocation11 + $0x348] ss:$16 sps:$4 sm:$0xff]  }
0x13f3   :  { %6968 = vmatprep.subr.bf16.mxu1 %v8880_v43  ;;  %v8928_v43 = vld [vmem:[#allocation11 + $0x32c] ss:$16 sps:$4 sm:$0xff]  }
0x13f6   :  { %6969 = vmatpush2.bf16.msra.mxu1 %v8878_v7  ;;  %v8926_v7 = vld [vmem:[#allocation11 + $0x328] ss:$16 sps:$4 sm:$0xff]  }
0x13f7   :  { %6970 = vmatprep.subr.bf16.mxu1 %v8883_v59  ;;  %v8931_v59 = vld [vmem:[#allocation11 + $0x30c] ss:$16 sps:$4 sm:$0xff]  }
0x13fa   :  { %6971 = vmatpush2.bf16.msra.mxu1 %v8881_v25  ;;  %v8929_v25 = vld [vmem:[#allocation11 + $0x308] ss:$16 sps:$4 sm:$0xff]  }
0x13fb   :  { %7026 = vmatprep.subr.bf16.mxu1 %v8886_v8 }
0x1410   :  { %v5978_v44 = vpop.f32.mrf.mxu0 }
0x1411   :  { %v6033_v5 = vpack.c.bf16 %v5978_v44, %v5978_v44 }
0x1412   :  { %v8128_v35 = vpop.f32.mrf.mxu0 }
0x1413   :  { %6055 = vrot.lane.b32.xlu0 %v6033_v5, %s9207_s4 }
0x1414   :  { %v5981_v42 = vpop.f32.mrf.mxu0  ;;  %v6027_v17 = vpop.f32.mrf.mxu1 }
0x1415   :  { %v6034_v41 = vpack.c.bf16 %v6027_v17, %v6027_v17 }
0x1416   :  { %v8129_v50 = vpop.f32.mrf.mxu0  ;;  %v8134_v36 = vpop.f32.mrf.mxu1 }
0x1417   :  { %6057 = vrot.lane.b32.xlu1 %v6034_v41, %s9207_s4  ;;  %6049 = vrot.lane.b32.xlu0 %v5589_v32, %s9207_s4  ;;  %v6227_v41 = vld [vmem:[#allocation13] sm:$0xf] }
0x1418   :  { %v6030_v55 = vpop.f32.mrf.mxu1  ;;  %v6236_v50 = vrot.slane %v6227_v41, %v9423_v47  ;;  %v6232_v36 = vrot.slane %v6227_v41, %v9420_v46 }
0x141a   :  { %v8135_v4 = vpop.f32.mrf.mxu1 }
0x141b   :  { %6051 = vrot.lane.b32.xlu1 %v5590_v52, %s9207_s4  ;;  %v9208_v52 = vmov 1966171168  }
0x141c   :  { %v7078_v4 = vunpack.c.l.s4 %v9208_v52 }
0x1450   :  { %v6931_v44 = vpop.f32.mrf.mxu0 }
0x1452   :  { %v6933_v5 = vpop.f32.mrf.mxu0 }
0x1454   :  { %v6935_v8 = vpop.f32.mrf.mxu0 }
0x1456   :  { %v6937_v42 = vpop.f32.mrf.mxu0 }
0x1485   :  { %v6056_v33 = vpop.permute.xlu0 %6055 }
0x1486   :  { %v6079_v56 = vsel %vm4269_vm10, %v5805_v38, %v6056_v33  ;;  %v6934_v38 = vadd.f32 %v6933_v5, %v6236_v50 }
0x1489   :  { %v6058_v37 = vpop.permute.xlu1 %6057  ;;  %v6050_v11 = vpop.permute.xlu0 %6049 }
0x148a   :  { %v6082_v34 = vsel %vm4269_vm10, %v5806_v57, %v6058_v37  ;;  %v6073_v20 = vsel %vm4269_vm10, %v5361_v1, %v6050_v11  ;;  %v6240_v57 = vrot.slane %v6227_v41, %v9426_v48  ;;  %v6244_v37 = vrot.slane %v6227_v41, %v9429_v49 }
0x148b   :  { %v7727_v45 = vcombine.low %v6079_v56, %v6082_v34  ;;  %v6932_v56 = vadd.f32 %v6931_v44, %v6232_v36  ;;  %v7079_v11 = vunpack.c.0.s8 %v7078_v4 }
0x148d   :  { %v6052_v31 = vpop.permute.xlu1 %6051  ;;  %6972 = vmatprep.mubr.bf16.mxu1 %v7727_v45 }
0x148e   :  { %v6076_v21 = vsel %vm4269_vm10, %v5362_v29, %v6052_v31 }
0x148f   :  { %v10153_v16 = vcombine.low %v6073_v20, %v6076_v21  ;;  %v6938_v21 = vadd.f32 %v6937_v42, %v6236_v50 }
0x1490   :  { %v7017_v17 = vpop.f32.mrf.mxu0 }
0x1491   :  { %6973 = vmatmul.mubr.bf16.vlgmr.msra.gmra.mxu1 %v10153_v16  ;;  %v7018_v20 = vadd.f32 %v7017_v17, %v6240_v57 }
0x1492   :  { %7027 = vmatpush1.bf16.msra.mxu1 %v8884_v12  ;;  %7058 = vmatprep.mubr.bf16.mxu1 %v7727_v45  ;;  %v7019_v55 = vpop.f32.mrf.mxu0 }
0x1493   :  { %7028 = vmatprep.subr.bf16.mxu1 %v8889_v23  ;;  %v7020_v47 = vadd.f32 %v7019_v55, %v6244_v37 }
0x1494   :  { %v7021_v34 = vpop.f32.mrf.mxu0 }
0x1496   :  { %7029 = vmatpush1.bf16.msra.mxu1 %v8887_v53  ;;  %v7023_v46 = vpop.f32.mrf.mxu0 }
0x1497   :  { %7030 = vmatprep.subr.bf16.mxu1 %v8892_v40 }
0x149a   :  { %7031 = vmatpush1.bf16.msra.mxu1 %v8890_v63  ;;  %v6936_v63 = vadd.f32 %v6935_v8, %v6232_v36 }
0x149b   :  { %7032 = vmatprep.subr.bf16.mxu1 %v8895_v26 }
0x149e   :  { %7033 = vmatpush1.bf16.msra.mxu1 %v8893_v30  ;;  %v7024_v30 = vadd.f32 %v7023_v46, %v6244_v37 }
0x149f   :  { %7034 = vmatprep.subr.bf16.mxu1 %v8898_v51 }
0x14a2   :  { %7035 = vmatpush1.bf16.msra.mxu1 %v8896_v10 }
0x14a3   :  { %7036 = vmatprep.subr.bf16.mxu1 %v8901_v54  ;;  %v7022_v54 = vadd.f32 %v7021_v34, %v6240_v57 }
0x14a6   :  { %7037 = vmatpush1.bf16.msra.mxu1 %v8899_v19 }
0x14a7   :  { %7038 = vmatprep.subr.bf16.mxu1 %v8904_v9 }
0x14aa   :  { %7039 = vmatpush1.bf16.msra.mxu1 %v8902_v15 }
0x14ab   :  { %7040 = vmatprep.subr.bf16.mxu1 %v8907_v27 }
0x14ae   :  { %7041 = vmatpush1.bf16.msra.mxu1 %v8905_v62 }
0x14af   :  { %7042 = vmatprep.subr.bf16.mxu1 %v8910_v39 }
0x14b2   :  { %7043 = vmatpush2.bf16.msra.mxu1 %v8908_v6 }
0x14b3   :  { %7044 = vmatprep.subr.bf16.mxu1 %v8913_v18 }
0x14b6   :  { %7045 = vmatpush2.bf16.msra.mxu1 %v8911_v60 }
0x14b7   :  { %7046 = vmatprep.subr.bf16.mxu1 %v8916_v24 }
0x14ba   :  { %7047 = vmatpush2.bf16.msra.mxu1 %v8914_v28 }
0x14bb   :  { %7048 = vmatprep.subr.bf16.mxu1 %v8919_v2 }
0x14be   :  { %7049 = vmatpush2.bf16.msra.mxu1 %v8917_v13 }
0x14bf   :  { %7050 = vmatprep.subr.bf16.mxu1 %v8922_v61 }
0x14c2   :  { %7051 = vmatpush2.bf16.msra.mxu1 %v8920_v22 }
0x14c3   :  { %7052 = vmatprep.subr.bf16.mxu1 %v8925_v58 }
0x14c6   :  { %7053 = vmatpush2.bf16.msra.mxu1 %v8923_v14 }
0x14c7   :  { %7054 = vmatprep.subr.bf16.mxu1 %v8928_v43 }
0x14ca   :  { %7055 = vmatpush2.bf16.msra.mxu1 %v8926_v7 }
0x14cb   :  { %7056 = vmatprep.subr.bf16.mxu1 %v8931_v59 }
0x14ce   :  { %7057 = vmatpush2.bf16.msra.mxu1 %v8929_v25 }
0x14d1   :  { %7059 = vmatmul.mubr.bf16.vlgmr.msra.gmra.mxu1 %v10153_v16  ;;  %v7082_v16 = vsub.s32 %v7079_v11, %v9275_v3 }
0x1551   :  { %v6974_v35 = vpop.f32.mrf.mxu1 }
0x1552   :  { %v6975_v29 = vadd.f32 %v6974_v35, %v6932_v56 }
0x1553   :  { %v6976_v32 = vpop.f32.mrf.mxu1 }
0x1554   :  { %v6977_v45 = vadd.f32 %v6976_v32, %v6934_v38 }
0x1555   :  { %v6978_v33 = vpop.f32.mrf.mxu1 }
0x1556   :  { %v7073_v12 = vcombine.low %v6975_v29, %v6977_v45  ;;  %v7074_v53 = vcombine.high %v6975_v29, %v6977_v45  ;;  %v6979_v9 = vadd.f32 %v6978_v33, %v6936_v63 }
0x1557   :  { %v6980_v1 = vpop.f32.mrf.mxu1 }
0x1558   :  { %v6981_v49 = vadd.f32 %v6980_v1, %v6938_v21  ;;  %v7083_v19 = vrot.slane %v7073_v12, %v7082_v16  ;;  %v7090_v27 = vrot.slane %v7074_v53, %v7082_v16 }
0x155a   :  { %v7172_v18 = vcombine.low %v6979_v9, %v6981_v49  ;;  %v7173_v3 = vcombine.high %v6979_v9, %v6981_v49 }
0x155c   :  { %v7182_v25 = vrot.slane %v7172_v18, %v7082_v16  ;;  %v7189_v44 = vrot.slane %v7173_v3, %v7082_v16 }
0x1591   :  { %v7060_v31 = vpop.f32.mrf.mxu1 }
0x1592   :  { %v7061_v40 = vadd.f32 %v7060_v31, %v7018_v20 }
0x1593   :  { %v7062_v23 = vpop.f32.mrf.mxu1 }
0x1594   :  { %v7063_v48 = vadd.f32 %v7062_v23, %v7020_v47 }
0x1595   :  { %v7064_v26 = vpop.f32.mrf.mxu1 }
0x1596   :  { %v7075_v51 = vcombine.low %v7061_v40, %v7063_v48  ;;  %v7076_v10 = vcombine.high %v7061_v40, %v7063_v48  ;;  %v7065_v60 = vadd.f32 %v7064_v26, %v7022_v54 }
0x1597   :  { %v7066_v15 = vpop.f32.mrf.mxu1 }
0x1598   :  { %v7097_v62 = vrot.slane %v7075_v51, %v7082_v16  ;;  %v7104_v39 = vrot.slane %v7076_v10, %v7082_v16  ;;  %v7067_v6 = vadd.f32 %v7066_v15, %v7024_v30 }
0x159a   :  { %v7105_v24 = vcombine.low %v7083_v19, %v7097_v62  ;;  %v7106_v28 = vcombine.high %v7083_v19, %v7097_v62  ;;  %v7107_v2 = vcombine.low %v7090_v27, %v7104_v39  ;;  %v7108_v13 = vcombine.high %v7090_v27, %v7104_v39 }
0x159b   :  { %v7174_v22 = vcombine.low %v7065_v60, %v7067_v6  ;;  %v7175_v58 = vcombine.high %v7065_v60, %v7067_v6 }
0x159c   :  { %v7115_v14 = vrot.slane %v7105_v24, %v7082_v16  ;;  %v7122_v43 = vrot.slane %v7107_v2, %v7082_v16  ;;  %v7129_v7 = vrot.slane %v7106_v28, %v7082_v16  ;;  %v7136_v59 = vrot.slane %v7108_v13, %v7082_v16 }
0x159d   :  { %v7196_v5 = vrot.slane %v7174_v22, %v7082_v16  ;;  %v7203_v8 = vrot.slane %v7175_v58, %v7082_v16 }
0x159e   :  { %v7137_v35 = vcombine.high %v7115_v14, %v7115_v14  ;;  %v7138_v42 = vcombine.high %v7122_v43, %v7122_v43  ;;  %v7139_v17 = vcombine.high %v7129_v7, %v7129_v7  ;;  %v7140_v32 = vcombine.high %v7136_v59, %v7136_v59  ;;  %7153 = vst.msk [vmem:[#allocation14] ss:$2 sm:$0xf] %vm10163_vm12, %v7115_v14 }
0x159f   :  { %7155 = vst.msk [vmem:[#allocation14 + $0x8] ss:$2 sm:$0xf] %vm10163_vm12, %v7129_v7  ;;  %7161 = vst.msk [vmem:[#allocation14 + $0x20] ss:$2 sm:$0xf] %vm10163_vm12, %v7122_v43  ;;  %v7204_v0 = vcombine.low %v7182_v25, %v7196_v5  ;;  %v7205_v41 = vcombine.high %v7182_v25, %v7196_v5  ;;  %v7206_v50 = vcombine.low %v7189_v44, %v7203_v8 }
0x15a0   :  { %7163 = vst.msk [vmem:[#allocation14 + $0x28] ss:$2 sm:$0xf] %vm10163_vm12, %v7136_v59  ;;  %v7207_v36 = vcombine.high %v7189_v44, %v7203_v8  ;;  %7157 = vst.msk [vmem:[#allocation14 + $0x10] ss:$2 sm:$0xf] %vm10163_vm12, %v7137_v35 }
0x15a1   :  { %7159 = vst.msk [vmem:[#allocation14 + $0x18] ss:$2 sm:$0xf] %vm10163_vm12, %v7139_v17  ;;  %7165 = vst.msk [vmem:[#allocation14 + $0x30] ss:$2 sm:$0xf] %vm10163_vm12, %v7138_v42  ;;  %v7214_v55 = vrot.slane %v7204_v0, %v7082_v16  ;;  %v7221_v52 = vrot.slane %v7206_v50, %v7082_v16  ;;  %v7228_v4 = vrot.slane %v7205_v41, %v7082_v16 }
0x15a2   :  { %7167 = vst.msk [vmem:[#allocation14 + $0x38] ss:$2 sm:$0xf] %vm10163_vm12, %v7140_v32  ;;  %v7235_v33 = vrot.slane %v7207_v36, %v7082_v16 }
0x15a3   :  { %v7236_v38 = vcombine.high %v7214_v55, %v7214_v55  ;;  %v7237_v57 = vcombine.high %v7221_v52, %v7221_v52  ;;  %v7238_v37 = vcombine.high %v7228_v4, %v7228_v4  ;;  %7249 = vst.msk [vmem:[#allocation14 + $0x1] ss:$2 sm:$0xf] %vm10163_vm12, %v7214_v55  ;;  %7251 = vst.msk [vmem:[#allocation14 + $0x9] ss:$2 sm:$0xf] %vm10163_vm12, %v7228_v4 }
0x15a4   :  { %v7239_v56 = vcombine.high %v7235_v33, %v7235_v33  ;;  %7257 = vst.msk [vmem:[#allocation14 + $0x21] ss:$2 sm:$0xf] %vm10163_vm12, %v7221_v52  ;;  %7259 = vst.msk [vmem:[#allocation14 + $0x29] ss:$2 sm:$0xf] %vm10163_vm12, %v7235_v33 }
0x15a5   :  { %7253 = vst.msk [vmem:[#allocation14 + $0x11] ss:$2 sm:$0xf] %vm10163_vm12, %v7236_v38  ;;  %7255 = vst.msk [vmem:[#allocation14 + $0x19] ss:$2 sm:$0xf] %vm10163_vm12, %v7238_v37 }
0x15a6   :  { %7261 = vst.msk [vmem:[#allocation14 + $0x31] ss:$2 sm:$0xf] %vm10163_vm12, %v7237_v57  ;;  %7263 = vst.msk [vmem:[#allocation14 + $0x39] ss:$2 sm:$0xf] %vm10163_vm12, %v7239_v56 }
0x15a7   :  { %9171 = shalt.err (!%p9168_p11)
}
0x15a8   :  { %7275 = dma.vmem_to_hbm [thread:$0]  %s7270_s14, 1024, %s10212_s7, [#allocation4], %s9198_s21, %s9198_s21, %s9199_s22  }
0x15a9   :  { %9188 = dma.done.wait [#allocation4], 1024  }
0x15aa   :  { %9189 = vsyncadd [#allocation4], 4294966272 }
0x15ab   :  { %7279 = vsyncpa [#allocation3], 1 }
0x15ac   :  { %7280 = vsyncpa [#allocation6], 1 }
0x15ad   :  { %7281 = vsyncpa [#allocation9], 1 }
0x15ae   :  { %7282 = vsyncpa [#allocation12], 1 }
0x15af   :  { %7283 = vsyncpa [#allocation4], 1 }

</bundles_post_ra>
